<compile_context>
chip_gen: v5e
topology: v5e:2x2
jax: 0.10.0
libtpu: 0.0.40
codegen_flags: <defaults>
</compile_context>

<pallas_src>
import functools
import math

import jax
import jax.numpy as jnp
from jax import lax
from jax.experimental import pallas as pl
from jax.experimental.pallas import tpu as pltpu

DIM = 300                     # attention embed dim (fixed by Attention(300, 4))
NUM_HEADS = 4
HEAD_DIM = DIM // NUM_HEADS   # 75
HP = 128                      # padded (lane-aligned) head dim
DIM_PAD = 384                 # 300 -> 3 * 128
QKV_PAD = NUM_HEADS * HP      # 512
VMEM_LIMIT = 48 * 1024 * 1024  # < v7x physical 64 MiB; > v5e/v6e scoped defaults


def _round_up(x, m):
    return ((x + m - 1) // m) * m


def _row_tile():
    # 128 rows fill the v5e 128x128 MXU; 256 matches the v6e/v7x 256x256 MXU.
    try:
        kind = jax.devices()[0].device_kind.lower()
        if "v5 lite" in kind or "v5e" in kind:
            return 128
    except Exception:
        pass
    return 256


# --------------------------------------------------------------------------- #
# fused kernel (small/medium N): everything in one pallas_call.
# K/V and out1 for ALL rows are computed once (grid step 0) into VMEM scratch;
# each grid step then does q-projection + attention + out-proj + residual + L2-norm
# for its row tile.  Grid axis must be "arbitrary" (scratch carries across steps).
# --------------------------------------------------------------------------- #
def fused_kernel(n_ref, x_ref, w1_ref, b1_ref, wq_ref, bq_ref, wk_ref, bk_ref,
                 wv_ref, bv_ref, wo_ref, bo_ref, out_ref, out1_sc, k_sc, v_sc):
    i = pl.program_id(0)
    n_real = n_ref[0]
    tile = out_ref.shape[0]
    n_pad = k_sc.shape[0]
    neg = jnp.float32(-1e30)

    @pl.when(i == 0)
    def _():
        x = x_ref[...]                                            # bf16 (n_pad, din_pad)
        out1 = jnp.dot(x, w1_ref[...], preferred_element_type=jnp.float32) + b1_ref[...]
        out1_sc[...] = out1                                       # f32 residual (VMEM only)
        h = out1.astype(jnp.bfloat16)
        k_sc[...] = (jnp.dot(h, wk_ref[...], preferred_element_type=jnp.float32)
                     + bk_ref[...]).astype(jnp.bfloat16)
        v_sc[...] = (jnp.dot(h, wv_ref[...], preferred_element_type=jnp.float32)
                     + bv_ref[...]).astype(jnp.bfloat16)

    start = pl.multiple_of(i * tile, tile)
    out1_t = out1_sc[pl.ds(start, tile), :]                       # (tile, 384) f32
    h_t = out1_t.astype(jnp.bfloat16)
    # fused (wq @ win_q); 1/sqrt(head_dim) already folded into wq/bq
    q = (jnp.dot(h_t, wq_ref[...], preferred_element_type=jnp.float32)
         + bq_ref[...]).astype(jnp.bfloat16)                      # (tile, 512)

    k = k_sc[...]                                                 # (n_pad, 512) bf16
    v = v_sc[...]

    # key-padding mask, hoisted out of the static 4-head loop
    key_mask = lax.broadcasted_iota(jnp.int32, (1, n_pad), 1) < n_real

    heads = []
    for h_idx in range(NUM_HEADS):                                # static unroll
        lo = h_idx * HP
        qh = q[:, lo:lo + HP]
        kh = k[:, lo:lo + HP]
        vh = v[:, lo:lo + HP]
        # q @ k^T without materializing a transpose
        s = lax.dot_general(qh, kh, (((1,), (1,)), ((), ())),
                            preferred_element_type=jnp.float32)   # (tile, n_pad)
        s = jnp.where(key_mask, s, neg)
        m = jnp.max(s, axis=-1, keepdims=True)
        e = jnp.exp(s - m)
        p = e * pl.reciprocal(jnp.sum(e, axis=-1, keepdims=True), approx=True)
        heads.append(jnp.dot(p.astype(jnp.bfloat16), vh,
                             preferred_element_type=jnp.float32).astype(jnp.bfloat16))

    o_all = jnp.concatenate(heads, axis=1)                        # (tile, 512) bf16
    mha = jnp.dot(o_all, wo_ref[...], preferred_element_type=jnp.float32) + bo_ref[...]
    out2 = mha + out1_t                                           # residual (f32)
    ss = jnp.sum(out2 * out2, axis=1, keepdims=True)
    # F.normalize(dim=1, p=2): out / max(||out||, 1e-12)
    out_ref[...] = out2 * lax.rsqrt(jnp.maximum(ss, 1e-24))


# --------------------------------------------------------------------------- #
# large-N path, kernel 1: Linear + k/v projections (row-local).
# out1 is stored bf16 between kernels (halves f32 intermediate HBM traffic);
# q is NOT written to HBM (recomputed from out1 in kernel 2).
# --------------------------------------------------------------------------- #
def proj_kv_kernel(x_ref, w1_ref, b1_ref, wk_ref, bk_ref, wv_ref, bv_ref,
                   out1_ref, k_ref, v_ref):
    x = x_ref[...]                                                # bf16
    out1 = jnp.dot(x, w1_ref[...], preferred_element_type=jnp.float32) + b1_ref[...]
    out1_ref[...] = out1.astype(jnp.bfloat16)
    h = out1.astype(jnp.bfloat16)
    k_ref[...] = (jnp.dot(h, wk_ref[...], preferred_element_type=jnp.float32)
                  + bk_ref[...]).astype(jnp.bfloat16)
    v_ref[...] = (jnp.dot(h, wv_ref[...], preferred_element_type=jnp.float32)
                  + bv_ref[...]).astype(jnp.bfloat16)


# --------------------------------------------------------------------------- #
# large-N path, kernel 2: flash-style attention (key tiles + online softmax)
# + q from out1 tile + out-projection + residual + L2 normalize.
# grid = (query tiles [parallel], key tiles [arbitrary]); K/V never fully resident.
# --------------------------------------------------------------------------- #
def flash_attn_kernel(n_ref, out1_ref, k_ref, v_ref, wq_ref, bq_ref, wo_ref, bo_ref,
                      out_ref, q_sc, m_sc, l_sc, acc_sc):
    j = pl.program_id(1)
    n_real = n_ref[0]
    tk = k_ref.shape[0]
    neg = jnp.float32(-1e30)

    @pl.when(j == 0)
    def _():
        h = out1_ref[...]                                         # bf16 (tq, 384)
        q_sc[...] = (jnp.dot(h, wq_ref[...], preferred_element_type=jnp.float32)
                     + bq_ref[...]).astype(jnp.bfloat16)          # scale folded in
        m_sc[...] = jnp.full_like(m_sc, neg)
        l_sc[...] = jnp.zeros_like(l_sc)
        acc_sc[...] = jnp.zeros_like(acc_sc)

    q = q_sc[...]                                                 # (tq, 512) bf16
    k = k_ref[...]                                                # (tk, 512) bf16
    v = v_ref[...]

    # key-padding mask for this key tile, hoisted out of the head loop
    key_idx = j * tk + lax.broadcasted_iota(jnp.int32, (1, tk), 1)
    key_mask = key_idx < n_real

    for h_idx in range(NUM_HEADS):                                # static unroll
        lo = h_idx * HP
        qh = q[:, lo:lo + HP]
        kh = k[:, lo:lo + HP]
        vh = v[:, lo:lo + HP]
        s = lax.dot_general(qh, kh, (((1,), (1,)), ((), ())),
                            preferred_element_type=jnp.float32)   # (tq, tk)
        s = jnp.where(key_mask, s, neg)
        m_prev = m_sc[h_idx]                                      # (tq, 1)
        m_new = jnp.maximum(m_prev, jnp.max(s, axis=-1, keepdims=True))
        alpha = jnp.exp(m_prev - m_new)
        p = jnp.exp(s - m_new)
        l_sc[h_idx] = alpha * l_sc[h_idx] + jnp.sum(p, axis=-1, keepdims=True)
        acc_sc[h_idx] = alpha * acc_sc[h_idx] + jnp.dot(
            p.astype(jnp.bfloat16), vh, preferred_element_type=jnp.float32)
        m_sc[h_idx] = m_new

    @pl.when(j == pl.num_programs(1) - 1)
    def _():
        heads = []
        for h_idx in range(NUM_HEADS):
            inv_l = pl.reciprocal(l_sc[h_idx], approx=True)
            heads.append((acc_sc[h_idx] * inv_l).astype(jnp.bfloat16))
        o_all = jnp.concatenate(heads, axis=1)                    # (tq, 512) bf16
        mha = jnp.dot(o_all, wo_ref[...], preferred_element_type=jnp.float32) + bo_ref[...]
        out2 = mha + out1_ref[...].astype(jnp.float32)            # residual (f32)
        ss = jnp.sum(out2 * out2, axis=1, keepdims=True)
        out_ref[...] = out2 * lax.rsqrt(jnp.maximum(ss, 1e-24))


# --------------------------------------------------------------------------- #
# host-side weight fusion + padding (call ONCE, outside the per-forward path)
# --------------------------------------------------------------------------- #
def prepare_params(p, d_in):
    """Fuse wq/wk/wv with the MHA in-projection, fold in the 1/sqrt(75) softmax scale,
    and zero-pad to lane-aligned shapes (bf16 matmul weights, f32 biases)."""
    scale = 1.0 / math.sqrt(HEAD_DIM)
    din_pad = _round_up(max(d_in, 1), 128)

    def fuse(w, b, win, bin_, s):
        return (w @ win) * s, (b @ win + bin_) * s

    wq_f, bq_f = fuse(p["wq"], p["bq"], p["win_q"], p["bin_q"], scale)
    wk_f, bk_f = fuse(p["wk"], p["bk"], p["win_k"], p["bin_k"], 1.0)
    wv_f, bv_f = fuse(p["wv"], p["bv"], p["win_v"], p["bin_v"], 1.0)

    def pad_qkv(w, b):
        wp = jnp.zeros((DIM_PAD, QKV_PAD), jnp.float32)
        bp = jnp.zeros((1, QKV_PAD), jnp.float32)
        for h in range(NUM_HEADS):
            src = slice(h * HEAD_DIM, (h + 1) * HEAD_DIM)
            dst = slice(h * HP, h * HP + HEAD_DIM)
            wp = wp.at[:DIM, dst].set(w[:, src])
            bp = bp.at[:, dst].set(b[:, src])
        return wp.astype(jnp.bfloat16), bp

    wq_p, bq_p = pad_qkv(wq_f, bq_f)
    wk_p, bk_p = pad_qkv(wk_f, bk_f)
    wv_p, bv_p = pad_qkv(wv_f, bv_f)

    wo_p = jnp.zeros((QKV_PAD, DIM_PAD), jnp.float32)
    for h in range(NUM_HEADS):
        wo_p = wo_p.at[h * HP:h * HP + HEAD_DIM, :DIM].set(
            p["wo"][h * HEAD_DIM:(h + 1) * HEAD_DIM, :])
    bo_p = jnp.zeros((1, DIM_PAD), jnp.float32).at[:, :DIM].set(p["bo"])

    w1_p = jnp.zeros((din_pad, DIM_PAD), jnp.float32).at[:d_in, :DIM].set(p["w1"])
    b1_p = jnp.zeros((1, DIM_PAD), jnp.float32).at[:, :DIM].set(p["b1"])

    return dict(w1=w1_p.astype(jnp.bfloat16), b1=b1_p,
                wq=wq_p, bq=bq_p, wk=wk_p, bk=bk_p, wv=wv_p, bv=bv_p,
                wo=wo_p.astype(jnp.bfloat16), bo=bo_p)


# --------------------------------------------------------------------------- #
# wrapper
# --------------------------------------------------------------------------- #
def encoder_net_forward(x, pp, *, max_fused_rows=1024):
    n, d_in = x.shape
    din_pad = pp["w1"].shape[0]
    assert d_in <= din_pad, "params were prepared for a smaller input dim"

    n_real_arr = jnp.array([n], jnp.int32)        # scalar-prefetch: mask padded key rows

    # ---------------- fused single-kernel path (K/V fits VMEM) ---------------- #
    tile = min(128, _round_up(n, 16))             # attn q tile <= 128; 16-row bf16 packing
    n_pad = _round_up(n, tile)
    if n_pad <= max_fused_rows:
        x_pad = jnp.zeros((n_pad, din_pad), jnp.bfloat16).at[:n, :d_in].set(
            x.astype(jnp.bfloat16))
        grid = (n_pad // tile,)

        def full(r, c):
            # TODO(synk): constant-index resident blocks could be single-buffered
            # (pipeline_mode=pl.Buffered(1)) to save VMEM on v7x.
            return pl.BlockSpec((r, c), lambda i, n_ref: (0, 0))

        out_pad = pl.pallas_call(
            fused_kernel,
            out_shape=jax.ShapeDtypeStruct((n_pad, DIM_PAD), jnp.float32),
            grid_spec=pltpu.PrefetchScalarGridSpec(
                num_scalar_prefetch=1,
                grid=grid,
                in_specs=[full(n_pad, din_pad),                       # x (resident)
                          full(din_pad, DIM_PAD), full(1, DIM_PAD),   # w1, b1
                          full(DIM_PAD, QKV_PAD), full(1, QKV_PAD),   # wq, bq
                          full(DIM_PAD, QKV_PAD), full(1, QKV_PAD),   # wk, bk
                          full(DIM_PAD, QKV_PAD), full(1, QKV_PAD),   # wv, bv
                          full(QKV_PAD, DIM_PAD), full(1, DIM_PAD)],  # wo, bo
                out_specs=pl.BlockSpec((tile, DIM_PAD), lambda i, n_ref: (i, 0)),
                scratch_shapes=[pltpu.VMEM((n_pad, DIM_PAD), jnp.float32),   # out1
                                pltpu.VMEM((n_pad, QKV_PAD), jnp.bfloat16),  # k
                                pltpu.VMEM((n_pad, QKV_PAD), jnp.bfloat16)], # v
            ),
            # "arbitrary": step 0 fills the K/V scratch used by later steps.
            compiler_params=pltpu.CompilerParams(
                dimension_semantics=("arbitrary",),
                vmem_limit_bytes=VMEM_LIMIT),
        )(n_real_arr, x_pad, pp["w1"], pp["b1"], pp["wq"], pp["bq"],
          pp["wk"], pp["bk"], pp["wv"], pp["bv"], pp["wo"], pp["bo"])
        return out_pad[:n, :DIM]

    # ---------------- large-N path: proj kernel + flash attention ---------------- #
    tq, tk = 128, 256
    tile1 = min(_row_tile(), 256)
    n_pad = _round_up(n, 256)                      # divisible by tile1, tq, tk
    x_pad = jnp.zeros((n_pad, din_pad), jnp.bfloat16).at[:n, :d_in].set(
        x.astype(jnp.bfloat16))

    def row1(c):
        return pl.BlockSpec((tile1, c), lambda i: (i, 0))

    def full1(r, c):
        return pl.BlockSpec((r, c), lambda i: (0, 0))

    out1, k, v = pl.pallas_call(
        proj_kv_kernel,
        out_shape=(jax.ShapeDtypeStruct((n_pad, DIM_PAD), jnp.bfloat16),
                   jax.ShapeDtypeStruct((n_pad, QKV_PAD), jnp.bfloat16),
                   jax.ShapeDtypeStruct((n_pad, QKV_PAD), jnp.bfloat16)),
        grid=(n_pad // tile1,),
        in_specs=[row1(din_pad),
                  full1(din_pad, DIM_PAD), full1(1, DIM_PAD),
                  full1(DIM_PAD, QKV_PAD), full1(1, QKV_PAD),
                  full1(DIM_PAD, QKV_PAD), full1(1, QKV_PAD)],
        out_specs=(row1(DIM_PAD), row1(QKV_PAD), row1(QKV_PAD)),
        # TODO(synk): on v7x use pltpu.CORE_PARALLEL here to split rows across the 2 TCs.
        compiler_params=pltpu.CompilerParams(dimension_semantics=("parallel",)),
    )(x_pad, pp["w1"], pp["b1"], pp["wk"], pp["bk"], pp["wv"], pp["bv"])

    def fullf(r, c):
        return pl.BlockSpec((r, c), lambda i, j, n_ref: (0, 0))

    out_pad = pl.pallas_call(
        flash_attn_kernel,
        out_shape=jax.ShapeDtypeStruct((n_pad, DIM_PAD), jnp.float32),
        grid_spec=pltpu.PrefetchScalarGridSpec(
            num_scalar_prefetch=1,
            grid=(n_pad // tq, n_pad // tk),
            in_specs=[pl.BlockSpec((tq, DIM_PAD), lambda i, j, n_ref: (i, 0)),  # out1
                      pl.BlockSpec((tk, QKV_PAD), lambda i, j, n_ref: (j, 0)),  # k tile
                      pl.BlockSpec((tk, QKV_PAD), lambda i, j, n_ref: (j, 0)),  # v tile
                      fullf(DIM_PAD, QKV_PAD), fullf(1, QKV_PAD),               # wq, bq
                      fullf(QKV_PAD, DIM_PAD), fullf(1, DIM_PAD)],              # wo, bo
            out_specs=pl.BlockSpec((tq, DIM_PAD), lambda i, j, n_ref: (i, 0)),
            scratch_shapes=[pltpu.VMEM((tq, QKV_PAD), jnp.bfloat16),          # q
                            pltpu.VMEM((NUM_HEADS, tq, 1), jnp.float32),      # m
                            pltpu.VMEM((NUM_HEADS, tq, 1), jnp.float32),      # l
                            pltpu.VMEM((NUM_HEADS, tq, HP), jnp.float32)],    # acc
        ),
        compiler_params=pltpu.CompilerParams(
            dimension_semantics=("parallel", "arbitrary"),
            vmem_limit_bytes=VMEM_LIMIT),
    )(n_real_arr, out1, k, v, pp["wq"], pp["bq"], pp["wo"], pp["bo"])

    return out_pad[:n, :DIM]


# --------------------------------------------------------------------------- #
# pure-JAX reference (unfused, f32) mirroring the PyTorch semantics
# --------------------------------------------------------------------------- #
def reference_forward(x, p):
    n = x.shape[0]
    out1 = x @ p["w1"] + p["b1"]
    q = out1 @ p["wq"] + p["bq"]
    k = out1 @ p["wk"] + p["bk"]
    v = out1 @ p["wv"] + p["bv"]
    qp = (q @ p["win_q"] + p["bin_q"]).reshape(n, NUM_HEADS, HEAD_DIM).transpose(1, 0, 2)
    kp = (k @ p["win_k"] + p["bin_k"]).reshape(n, NUM_HEADS, HEAD_DIM).transpose(1, 0, 2)
    vp = (v @ p["win_v"] + p["bin_v"]).reshape(n, NUM_HEADS, HEAD_DIM).transpose(1, 0, 2)
    s = jnp.einsum("hnd,hmd->hnm", qp, kp) / math.sqrt(HEAD_DIM)
    a = jax.nn.softmax(s, axis=-1)
    o = jnp.einsum("hnm,hmd->hnd", a, vp).transpose(1, 0, 2).reshape(n, DIM)
    mha = o @ p["wo"] + p["bo"]
    out2 = mha + out1
    nrm = jnp.linalg.norm(out2, axis=1, keepdims=True)
    return out2 / jnp.maximum(nrm, 1e-12)


def init_params(key, d_in):
    names_shapes = [
        ("w1", (d_in, DIM)), ("b1", (1, DIM)),
        ("wq", (DIM, DIM)), ("bq", (1, DIM)),
        ("wk", (DIM, DIM)), ("bk", (1, DIM)),
        ("wv", (DIM, DIM)), ("bv", (1, DIM)),
        ("win_q", (DIM, DIM)), ("bin_q", (1, DIM)),
        ("win_k", (DIM, DIM)), ("bin_k", (1, DIM)),
        ("win_v", (DIM, DIM)), ("bin_v", (1, DIM)),
        ("wo", (DIM, DIM)), ("bo", (1, DIM)),
    ]
    keys = jax.random.split(key, len(names_shapes))
    return {name: 0.05 * jax.random.normal(k, shape, dtype=jnp.float32)
            for (name, shape), k in zip(names_shapes, keys)}


if __name__ == "__main__":
    key = jax.random.PRNGKey(0)
    kx, kp, kx2 = jax.random.split(key, 3)

    N, D_IN = 8, 64                        # dims = [64, 300]
    x = jax.random.normal(kx, (N, D_IN), dtype=jnp.float32)
    params = init_params(kp, D_IN)
    pp = prepare_params(params, D_IN)      # one-time host-side fusion + padding

    # small-N test: fused single-kernel path
    fwd_fused = jax.jit(functools.partial(encoder_net_forward, max_fused_rows=1024))
    out = jax.block_until_ready(fwd_fused(x, pp))
    ref = reference_forward(x, params)
    assert out.shape == (N, DIM)
    err = float(jnp.max(jnp.abs(out - ref)))
    assert err < 1e-2, f"fused path mismatch vs reference: {err}"

    # also exercise the large-N flash path (forced via max_fused_rows=0)
    N2 = 300
    x2 = jax.random.normal(kx2, (N2, D_IN), dtype=jnp.float32)
    fwd_flash = jax.jit(functools.partial(encoder_net_forward, max_fused_rows=0))
    out2 = jax.block_until_ready(fwd_flash(x2, pp))
    ref2 = reference_forward(x2, params)
    assert out2.shape == (N2, DIM)
    err2 = float(jnp.max(jnp.abs(out2 - ref2)))
    assert err2 < 1e-2, f"flash path mismatch vs reference: {err2}"

    print("KERNEL_OK")
</pallas_src>

<mosaic_0001>
module attributes {stable_mosaic.version = 11 : i64} {
  func.func @fused_kernel(%arg0: i32, %arg1: memref<1xi32, #tpu.memory_space<smem>>, %arg2: memref<16x128xbf16, #tpu.memory_space<vmem>>, %arg3: memref<128x384xbf16, #tpu.memory_space<vmem>>, %arg4: memref<1x384xf32, #tpu.memory_space<vmem>>, %arg5: memref<384x512xbf16, #tpu.memory_space<vmem>>, %arg6: memref<1x512xf32, #tpu.memory_space<vmem>>, %arg7: memref<384x512xbf16, #tpu.memory_space<vmem>>, %arg8: memref<1x512xf32, #tpu.memory_space<vmem>>, %arg9: memref<384x512xbf16, #tpu.memory_space<vmem>>, %arg10: memref<1x512xf32, #tpu.memory_space<vmem>>, %arg11: memref<512x384xbf16, #tpu.memory_space<vmem>>, %arg12: memref<1x384xf32, #tpu.memory_space<vmem>>, %arg13: memref<16x384xf32, #tpu.memory_space<vmem>>, %arg14: memref<16x384xf32, #tpu.memory_space<vmem>>, %arg15: memref<16x512xbf16, #tpu.memory_space<vmem>>, %arg16: memref<16x512xbf16, #tpu.memory_space<vmem>>) attributes {dimension_semantics = [#tpu.dimension_semantics<arbitrary>], iteration_bounds = array<i64: 1>, scalar_prefetch = 1 : i64, scratch_operands = 3 : i64, tpu.core_type = #tpu.core_type<tc>, window_params = [{pipeline_mode = #tpu.pipeline_mode<synchronous>, transform_indices = @transform_0, window_bounds = array<i64: 16, 128>}, {pipeline_mode = #tpu.pipeline_mode<synchronous>, transform_indices = @transform_1, window_bounds = array<i64: 128, 384>}, {pipeline_mode = #tpu.pipeline_mode<synchronous>, transform_indices = @transform_2, window_bounds = array<i64: 1, 384>}, {pipeline_mode = #tpu.pipeline_mode<synchronous>, transform_indices = @transform_3, window_bounds = array<i64: 384, 512>}, {pipeline_mode = #tpu.pipeline_mode<synchronous>, transform_indices = @transform_4, window_bounds = array<i64: 1, 512>}, {pipeline_mode = #tpu.pipeline_mode<synchronous>, transform_indices = @transform_5, window_bounds = array<i64: 384, 512>}, {pipeline_mode = #tpu.pipeline_mode<synchronous>, transform_indices = @transform_6, window_bounds = array<i64: 1, 512>}, {pipeline_mode = #tpu.pipeline_mode<synchronous>, transform_indices = @transform_7, window_bounds = array<i64: 384, 512>}, {pipeline_mode = #tpu.pipeline_mode<synchronous>, transform_indices = @transform_8, window_bounds = array<i64: 1, 512>}, {pipeline_mode = #tpu.pipeline_mode<synchronous>, transform_indices = @transform_9, window_bounds = array<i64: 512, 384>}, {pipeline_mode = #tpu.pipeline_mode<synchronous>, transform_indices = @transform_10, window_bounds = array<i64: 1, 384>}, {transform_indices = @transform_11, window_bounds = array<i64: 16, 384>}]} {
    %c0 = arith.constant 0 : index
    %0 = memref.load %arg1[%c0] : memref<1xi32, #tpu.memory_space<smem>>
    %c0_i32 = arith.constant 0 : i32
    %1 = arith.cmpi eq, %arg0, %c0_i32 : i32
    %2 = arith.extui %1 : i1 to i32
    %c0_i32_0 = arith.constant 0 : i32
    %3 = arith.cmpi ne, %2, %c0_i32_0 : i32
    scf.if %3 {
      %c0_39 = arith.constant 0 : index
      %c0_40 = arith.constant 0 : index
      %120 = vector.load %arg2[%c0_39, %c0_40] : memref<16x128xbf16, #tpu.memory_space<vmem>>, vector<16x128xbf16>
      %c0_41 = arith.constant 0 : index
      %c0_42 = arith.constant 0 : index
      %121 = vector.load %arg3[%c0_41, %c0_42] : memref<128x384xbf16, #tpu.memory_space<vmem>>, vector<128x384xbf16>
      %cst_43 = arith.constant dense<0.000000e+00> : vector<16x384xf32>
      %122 = tpu.matmul %120, %121, %cst_43 {dimension_numbers = #tpu.dot_dimension_numbers<[1], [0], [0], [1], [0, 0, 1, 1], [], []>} : vector<16x128xbf16>, vector<128x384xbf16>, vector<16x384xf32> -> vector<16x384xf32>
      %c0_44 = arith.constant 0 : index
      %c0_45 = arith.constant 0 : index
      %123 = vector.load %arg4[%c0_44, %c0_45] : memref<1x384xf32, #tpu.memory_space<vmem>>, vector<1x384xf32>
      %124 = vector.broadcast %123 : vector<1x384xf32> to vector<16x384xf32>
      %125 = arith.addf %122, %124 : vector<16x384xf32>
      %c0_46 = arith.constant 0 : index
      %c0_47 = arith.constant 0 : index
      %126 = vector.load %arg14[%c0_46, %c0_47] : memref<16x384xf32, #tpu.memory_space<vmem>>, vector<16x384xf32>
      tpu.vector_store %arg14[%c0_46, %c0_47], %125 {strides = array<i32>} : memref<16x384xf32, #tpu.memory_space<vmem>>, vector<16x384xf32>,
      %127 = arith.truncf %125 : vector<16x384xf32> to vector<16x384xbf16>
      %c0_48 = arith.constant 0 : index
      %c0_49 = arith.constant 0 : index
      %128 = vector.load %arg7[%c0_48, %c0_49] : memref<384x512xbf16, #tpu.memory_space<vmem>>, vector<384x512xbf16>
      %cst_50 = arith.constant dense<0.000000e+00> : vector<16x512xf32>
      %129 = tpu.matmul %127, %128, %cst_50 {dimension_numbers = #tpu.dot_dimension_numbers<[1], [0], [0], [1], [0, 0, 1, 1], [], []>} : vector<16x384xbf16>, vector<384x512xbf16>, vector<16x512xf32> -> vector<16x512xf32>
      %c0_51 = arith.constant 0 : index
      %c0_52 = arith.constant 0 : index
      %130 = vector.load %arg8[%c0_51, %c0_52] : memref<1x512xf32, #tpu.memory_space<vmem>>, vector<1x512xf32>
      %131 = vector.broadcast %130 : vector<1x512xf32> to vector<16x512xf32>
      %132 = arith.addf %129, %131 : vector<16x512xf32>
      %133 = arith.truncf %132 : vector<16x512xf32> to vector<16x512xbf16>
      %c0_53 = arith.constant 0 : index
      %c0_54 = arith.constant 0 : index
      %134 = vector.load %arg15[%c0_53, %c0_54] : memref<16x512xbf16, #tpu.memory_space<vmem>>, vector<16x512xbf16>
      tpu.vector_store %arg15[%c0_53, %c0_54], %133 {strides = array<i32>} : memref<16x512xbf16, #tpu.memory_space<vmem>>, vector<16x512xbf16>,
      %c0_55 = arith.constant 0 : index
      %c0_56 = arith.constant 0 : index
      %135 = vector.load %arg9[%c0_55, %c0_56] : memref<384x512xbf16, #tpu.memory_space<vmem>>, vector<384x512xbf16>
      %cst_57 = arith.constant dense<0.000000e+00> : vector<16x512xf32>
      %136 = tpu.matmul %127, %135, %cst_57 {dimension_numbers = #tpu.dot_dimension_numbers<[1], [0], [0], [1], [0, 0, 1, 1], [], []>} : vector<16x384xbf16>, vector<384x512xbf16>, vector<16x512xf32> -> vector<16x512xf32>
      %c0_58 = arith.constant 0 : index
      %c0_59 = arith.constant 0 : index
      %137 = vector.load %arg10[%c0_58, %c0_59] : memref<1x512xf32, #tpu.memory_space<vmem>>, vector<1x512xf32>
      %138 = vector.broadcast %137 : vector<1x512xf32> to vector<16x512xf32>
      %139 = arith.addf %136, %138 : vector<16x512xf32>
      %140 = arith.truncf %139 : vector<16x512xf32> to vector<16x512xbf16>
      %c0_60 = arith.constant 0 : index
      %c0_61 = arith.constant 0 : index
      %141 = vector.load %arg16[%c0_60, %c0_61] : memref<16x512xbf16, #tpu.memory_space<vmem>>, vector<16x512xbf16>
      tpu.vector_store %arg16[%c0_60, %c0_61], %140 {strides = array<i32>} : memref<16x512xbf16, #tpu.memory_space<vmem>>, vector<16x512xbf16>,
    } else {
    }
    %c16_i32 = arith.constant 16 : i32
    %4 = arith.muli %arg0, %c16_i32 : i32
    %5 = tpu.assume_multiple %4, 16 : i32
    %6 = arith.index_cast %5 : i32 to index
    %c0_1 = arith.constant 0 : index
    %7 = vector.load %arg14[%6, %c0_1] : memref<16x384xf32, #tpu.memory_space<vmem>>, vector<16x384xf32>
    %8 = arith.truncf %7 : vector<16x384xf32> to vector<16x384xbf16>
    %c0_2 = arith.constant 0 : index
    %c0_3 = arith.constant 0 : index
    %9 = vector.load %arg5[%c0_2, %c0_3] : memref<384x512xbf16, #tpu.memory_space<vmem>>, vector<384x512xbf16>
    %cst = arith.constant dense<0.000000e+00> : vector<16x512xf32>
    %10 = tpu.matmul %8, %9, %cst {dimension_numbers = #tpu.dot_dimension_numbers<[1], [0], [0], [1], [0, 0, 1, 1], [], []>} : vector<16x384xbf16>, vector<384x512xbf16>, vector<16x512xf32> -> vector<16x512xf32>
    %c0_4 = arith.constant 0 : index
    %c0_5 = arith.constant 0 : index
    %11 = vector.load %arg6[%c0_4, %c0_5] : memref<1x512xf32, #tpu.memory_space<vmem>>, vector<1x512xf32>
    %12 = vector.broadcast %11 : vector<1x512xf32> to vector<16x512xf32>
    %13 = arith.addf %10, %12 : vector<16x512xf32>
    %14 = arith.truncf %13 : vector<16x512xf32> to vector<16x512xbf16>
    %c0_6 = arith.constant 0 : index
    %c0_7 = arith.constant 0 : index
    %15 = vector.load %arg15[%c0_6, %c0_7] : memref<16x512xbf16, #tpu.memory_space<vmem>>, vector<16x512xbf16>
    %c0_8 = arith.constant 0 : index
    %c0_9 = arith.constant 0 : index
    %16 = vector.load %arg16[%c0_8, %c0_9] : memref<16x512xbf16, #tpu.memory_space<vmem>>, vector<16x512xbf16>
    %17 = tpu.iota {dimensions = array<i32: 1>} : vector<1x16xi32>
    %18 = vector.broadcast %0 : i32 to vector<1x16xi32>
    %19 = arith.cmpi slt, %17, %18 : vector<1x16xi32>
    %20 = vector.extract_strided_slice %14 {offsets = [0, 0], sizes = [16, 128], strides = [1, 1]} : vector<16x512xbf16> to vector<16x128xbf16>
    %21 = vector.extract_strided_slice %15 {offsets = [0, 0], sizes = [16, 128], strides = [1, 1]} : vector<16x512xbf16> to vector<16x128xbf16>
    %22 = vector.extract_strided_slice %16 {offsets = [0, 0], sizes = [16, 128], strides = [1, 1]} : vector<16x512xbf16> to vector<16x128xbf16>
    %cst_10 = arith.constant dense<0.000000e+00> : vector<16x16xf32>
    %23 = tpu.matmul %20, %21, %cst_10 {dimension_numbers = #tpu.dot_dimension_numbers<[1], [1], [0], [0], [0, 0, 1, 0], [], []>} : vector<16x128xbf16>, vector<16x128xbf16>, vector<16x16xf32> -> vector<16x16xf32>
    %cst_11 = arith.constant -1.000000e+30 : f32
    %24 = vector.shape_cast %19 : vector<1x16xi1> to vector<1x16xi1>
    %25 = vector.broadcast %24 : vector<1x16xi1> to vector<16x16xi1>
    %26 = vector.broadcast %cst_11 : f32 to vector<16x16xf32>
    %27 = arith.select %25, %23, %26 : vector<16x16xi1>, vector<16x16xf32>
    %cst_12 = arith.constant dense<0xFF800000> : vector<16xf32>
    %28 = vector.multi_reduction <maximumf>, %27, %cst_12 [1] : vector<16x16xf32> to vector<16xf32>
    %29 = vector.shape_cast %28 : vector<16xf32> to vector<16x1xf32>
    %30 = vector.broadcast %29 : vector<16x1xf32> to vector<16x16xf32>
    %31 = arith.subf %27, %30 : vector<16x16xf32>
    %32 = math.exp %31 : vector<16x16xf32>
    %cst_13 = arith.constant dense<0.000000e+00> : vector<16xf32>
    %33 = vector.multi_reduction <add>, %32, %cst_13 [1] : vector<16x16xf32> to vector<16xf32>
    %34 = vector.shape_cast %33 : vector<16xf32> to vector<16x1xf32>
    %35 = tpu.reciprocal %34 {approx = true} : vector<16x1xf32> -> vector<16x1xf32>
    %36 = vector.broadcast %35 : vector<16x1xf32> to vector<16x16xf32>
    %37 = arith.mulf %32, %36 : vector<16x16xf32>
    %38 = arith.truncf %37 : vector<16x16xf32> to vector<16x16xbf16>
    %cst_14 = arith.constant dense<0.000000e+00> : vector<16x128xf32>
    %39 = tpu.matmul %38, %22, %cst_14 {dimension_numbers = #tpu.dot_dimension_numbers<[1], [0], [0], [1], [0, 0, 1, 1], [], []>} : vector<16x16xbf16>, vector<16x128xbf16>, vector<16x128xf32> -> vector<16x128xf32>
    %40 = arith.truncf %39 : vector<16x128xf32> to vector<16x128xbf16>
    %41 = vector.extract_strided_slice %14 {offsets = [0, 128], sizes = [16, 128], strides = [1, 1]} : vector<16x512xbf16> to vector<16x128xbf16>
    %42 = vector.extract_strided_slice %15 {offsets = [0, 128], sizes = [16, 128], strides = [1, 1]} : vector<16x512xbf16> to vector<16x128xbf16>
    %43 = vector.extract_strided_slice %16 {offsets = [0, 128], sizes = [16, 128], strides = [1, 1]} : vector<16x512xbf16> to vector<16x128xbf16>
    %cst_15 = arith.constant dense<0.000000e+00> : vector<16x16xf32>
    %44 = tpu.matmul %41, %42, %cst_15 {dimension_numbers = #tpu.dot_dimension_numbers<[1], [1], [0], [0], [0, 0, 1, 0], [], []>} : vector<16x128xbf16>, vector<16x128xbf16>, vector<16x16xf32> -> vector<16x16xf32>
    %cst_16 = arith.constant -1.000000e+30 : f32
    %45 = vector.shape_cast %19 : vector<1x16xi1> to vector<1x16xi1>
    %46 = vector.broadcast %45 : vector<1x16xi1> to vector<16x16xi1>
    %47 = vector.broadcast %cst_16 : f32 to vector<16x16xf32>
    %48 = arith.select %46, %44, %47 : vector<16x16xi1>, vector<16x16xf32>
    %cst_17 = arith.constant dense<0xFF800000> : vector<16xf32>
    %49 = vector.multi_reduction <maximumf>, %48, %cst_17 [1] : vector<16x16xf32> to vector<16xf32>
    %50 = vector.shape_cast %49 : vector<16xf32> to vector<16x1xf32>
    %51 = vector.broadcast %50 : vector<16x1xf32> to vector<16x16xf32>
    %52 = arith.subf %48, %51 : vector<16x16xf32>
    %53 = math.exp %52 : vector<16x16xf32>
    %cst_18 = arith.constant dense<0.000000e+00> : vector<16xf32>
    %54 = vector.multi_reduction <add>, %53, %cst_18 [1] : vector<16x16xf32> to vector<16xf32>
    %55 = vector.shape_cast %54 : vector<16xf32> to vector<16x1xf32>
    %56 = tpu.reciprocal %55 {approx = true} : vector<16x1xf32> -> vector<16x1xf32>
    %57 = vector.broadcast %56 : vector<16x1xf32> to vector<16x16xf32>
    %58 = arith.mulf %53, %57 : vector<16x16xf32>
    %59 = arith.truncf %58 : vector<16x16xf32> to vector<16x16xbf16>
    %cst_19 = arith.constant dense<0.000000e+00> : vector<16x128xf32>
    %60 = tpu.matmul %59, %43, %cst_19 {dimension_numbers = #tpu.dot_dimension_numbers<[1], [0], [0], [1], [0, 0, 1, 1], [], []>} : vector<16x16xbf16>, vector<16x128xbf16>, vector<16x128xf32> -> vector<16x128xf32>
    %61 = arith.truncf %60 : vector<16x128xf32> to vector<16x128xbf16>
    %62 = vector.extract_strided_slice %14 {offsets = [0, 256], sizes = [16, 128], strides = [1, 1]} : vector<16x512xbf16> to vector<16x128xbf16>
    %63 = vector.extract_strided_slice %15 {offsets = [0, 256], sizes = [16, 128], strides = [1, 1]} : vector<16x512xbf16> to vector<16x128xbf16>
    %64 = vector.extract_strided_slice %16 {offsets = [0, 256], sizes = [16, 128], strides = [1, 1]} : vector<16x512xbf16> to vector<16x128xbf16>
    %cst_20 = arith.constant dense<0.000000e+00> : vector<16x16xf32>
    %65 = tpu.matmul %62, %63, %cst_20 {dimension_numbers = #tpu.dot_dimension_numbers<[1], [1], [0], [0], [0, 0, 1, 0], [], []>} : vector<16x128xbf16>, vector<16x128xbf16>, vector<16x16xf32> -> vector<16x16xf32>
    %cst_21 = arith.constant -1.000000e+30 : f32
    %66 = vector.shape_cast %19 : vector<1x16xi1> to vector<1x16xi1>
    %67 = vector.broadcast %66 : vector<1x16xi1> to vector<16x16xi1>
    %68 = vector.broadcast %cst_21 : f32 to vector<16x16xf32>
    %69 = arith.select %67, %65, %68 : vector<16x16xi1>, vector<16x16xf32>
    %cst_22 = arith.constant dense<0xFF800000> : vector<16xf32>
    %70 = vector.multi_reduction <maximumf>, %69, %cst_22 [1] : vector<16x16xf32> to vector<16xf32>
    %71 = vector.shape_cast %70 : vector<16xf32> to vector<16x1xf32>
    %72 = vector.broadcast %71 : vector<16x1xf32> to vector<16x16xf32>
    %73 = arith.subf %69, %72 : vector<16x16xf32>
    %74 = math.exp %73 : vector<16x16xf32>
    %cst_23 = arith.constant dense<0.000000e+00> : vector<16xf32>
    %75 = vector.multi_reduction <add>, %74, %cst_23 [1] : vector<16x16xf32> to vector<16xf32>
    %76 = vector.shape_cast %75 : vector<16xf32> to vector<16x1xf32>
    %77 = tpu.reciprocal %76 {approx = true} : vector<16x1xf32> -> vector<16x1xf32>
    %78 = vector.broadcast %77 : vector<16x1xf32> to vector<16x16xf32>
    %79 = arith.mulf %74, %78 : vector<16x16xf32>
    %80 = arith.truncf %79 : vector<16x16xf32> to vector<16x16xbf16>
    %cst_24 = arith.constant dense<0.000000e+00> : vector<16x128xf32>
    %81 = tpu.matmul %80, %64, %cst_24 {dimension_numbers = #tpu.dot_dimension_numbers<[1], [0], [0], [1], [0, 0, 1, 1], [], []>} : vector<16x16xbf16>, vector<16x128xbf16>, vector<16x128xf32> -> vector<16x128xf32>
    %82 = arith.truncf %81 : vector<16x128xf32> to vector<16x128xbf16>
    %83 = vector.extract_strided_slice %14 {offsets = [0, 384], sizes = [16, 128], strides = [1, 1]} : vector<16x512xbf16> to vector<16x128xbf16>
    %84 = vector.extract_strided_slice %15 {offsets = [0, 384], sizes = [16, 128], strides = [1, 1]} : vector<16x512xbf16> to vector<16x128xbf16>
    %85 = vector.extract_strided_slice %16 {offsets = [0, 384], sizes = [16, 128], strides = [1, 1]} : vector<16x512xbf16> to vector<16x128xbf16>
    %cst_25 = arith.constant dense<0.000000e+00> : vector<16x16xf32>
    %86 = tpu.matmul %83, %84, %cst_25 {dimension_numbers = #tpu.dot_dimension_numbers<[1], [1], [0], [0], [0, 0, 1, 0], [], []>} : vector<16x128xbf16>, vector<16x128xbf16>, vector<16x16xf32> -> vector<16x16xf32>
    %cst_26 = arith.constant -1.000000e+30 : f32
    %87 = vector.shape_cast %19 : vector<1x16xi1> to vector<1x16xi1>
    %88 = vector.broadcast %87 : vector<1x16xi1> to vector<16x16xi1>
    %89 = vector.broadcast %cst_26 : f32 to vector<16x16xf32>
    %90 = arith.select %88, %86, %89 : vector<16x16xi1>, vector<16x16xf32>
    %cst_27 = arith.constant dense<0xFF800000> : vector<16xf32>
    %91 = vector.multi_reduction <maximumf>, %90, %cst_27 [1] : vector<16x16xf32> to vector<16xf32>
    %92 = vector.shape_cast %91 : vector<16xf32> to vector<16x1xf32>
    %93 = vector.broadcast %92 : vector<16x1xf32> to vector<16x16xf32>
    %94 = arith.subf %90, %93 : vector<16x16xf32>
    %95 = math.exp %94 : vector<16x16xf32>
    %cst_28 = arith.constant dense<0.000000e+00> : vector<16xf32>
    %96 = vector.multi_reduction <add>, %95, %cst_28 [1] : vector<16x16xf32> to vector<16xf32>
    %97 = vector.shape_cast %96 : vector<16xf32> to vector<16x1xf32>
    %98 = tpu.reciprocal %97 {approx = true} : vector<16x1xf32> -> vector<16x1xf32>
    %99 = vector.broadcast %98 : vector<16x1xf32> to vector<16x16xf32>
    %100 = arith.mulf %95, %99 : vector<16x16xf32>
    %101 = arith.truncf %100 : vector<16x16xf32> to vector<16x16xbf16>
    %cst_29 = arith.constant dense<0.000000e+00> : vector<16x128xf32>
    %102 = tpu.matmul %101, %85, %cst_29 {dimension_numbers = #tpu.dot_dimension_numbers<[1], [0], [0], [1], [0, 0, 1, 1], [], []>} : vector<16x16xbf16>, vector<16x128xbf16>, vector<16x128xf32> -> vector<16x128xf32>
    %103 = arith.truncf %102 : vector<16x128xf32> to vector<16x128xbf16>
    %104 = tpu.concatenate %40, %61, %82, %103 in 1 : vector<16x128xbf16>, vector<16x128xbf16>, vector<16x128xbf16>, vector<16x128xbf16> -> vector<16x512xbf16>
    %c0_30 = arith.constant 0 : index
    %c0_31 = arith.constant 0 : index
    %105 = vector.load %arg11[%c0_30, %c0_31] : memref<512x384xbf16, #tpu.memory_space<vmem>>, vector<512x384xbf16>
    %cst_32 = arith.constant dense<0.000000e+00> : vector<16x384xf32>
    %106 = tpu.matmul %104, %105, %cst_32 {dimension_numbers = #tpu.dot_dimension_numbers<[1], [0], [0], [1], [0, 0, 1, 1], [], []>} : vector<16x512xbf16>, vector<512x384xbf16>, vector<16x384xf32> -> vector<16x384xf32>
    %c0_33 = arith.constant 0 : index
    %c0_34 = arith.constant 0 : index
    %107 = vector.load %arg12[%c0_33, %c0_34] : memref<1x384xf32, #tpu.memory_space<vmem>>, vector<1x384xf32>
    %108 = vector.broadcast %107 : vector<1x384xf32> to vector<16x384xf32>
    %109 = arith.addf %106, %108 : vector<16x384xf32>
    %110 = arith.addf %109, %7 : vector<16x384xf32>
    %111 = arith.mulf %110, %110 : vector<16x384xf32>
    %cst_35 = arith.constant dense<0.000000e+00> : vector<16xf32>
    %112 = vector.multi_reduction <add>, %111, %cst_35 [1] : vector<16x384xf32> to vector<16xf32>
    %113 = vector.shape_cast %112 : vector<16xf32> to vector<16x1xf32>
    %cst_36 = arith.constant 1.000000e-24 : f32
    %114 = vector.broadcast %cst_36 : f32 to vector<16x1xf32>
    %115 = arith.maximumf %113, %114 : vector<16x1xf32>
    %116 = math.rsqrt %115 : vector<16x1xf32>
    %117 = vector.broadcast %116 : vector<16x1xf32> to vector<16x384xf32>
    %118 = arith.mulf %110, %117 : vector<16x384xf32>
    %c0_37 = arith.constant 0 : index
    %c0_38 = arith.constant 0 : index
    %119 = vector.load %arg13[%c0_37, %c0_38] : memref<16x384xf32, #tpu.memory_space<vmem>>, vector<16x384xf32>
    tpu.vector_store %arg13[%c0_37, %c0_38], %118 {strides = array<i32>} : memref<16x384xf32, #tpu.memory_space<vmem>>, vector<16x384xf32>,
    return
  }
  func.func @transform_0(%arg0: i32, %arg1: memref<1xi32, #tpu.memory_space<smem>>) -> (i32, i32) {
    %c0_i32 = arith.constant 0 : i32
    %c0_i32_0 = arith.constant 0 : i32
    %c0_i32_1 = arith.constant 0 : i32
    return %c0_i32, %c0_i32_0 : i32, i32
  }
  func.func @transform_1(%arg0: i32, %arg1: memref<1xi32, #tpu.memory_space<smem>>) -> (i32, i32) {
    %c0_i32 = arith.constant 0 : i32
    %c0_i32_0 = arith.constant 0 : i32
    %c0_i32_1 = arith.constant 0 : i32
    return %c0_i32, %c0_i32_0 : i32, i32
  }
  func.func @transform_2(%arg0: i32, %arg1: memref<1xi32, #tpu.memory_space<smem>>) -> (i32, i32) {
    %c0_i32 = arith.constant 0 : i32
    %c0_i32_0 = arith.constant 0 : i32
    %c0_i32_1 = arith.constant 0 : i32
    return %c0_i32, %c0_i32_0 : i32, i32
  }
  func.func @transform_3(%arg0: i32, %arg1: memref<1xi32, #tpu.memory_space<smem>>) -> (i32, i32) {
    %c0_i32 = arith.constant 0 : i32
    %c0_i32_0 = arith.constant 0 : i32
    %c0_i32_1 = arith.constant 0 : i32
    return %c0_i32, %c0_i32_0 : i32, i32
  }
  func.func @transform_4(%arg0: i32, %arg1: memref<1xi32, #tpu.memory_space<smem>>) -> (i32, i32) {
    %c0_i32 = arith.constant 0 : i32
    %c0_i32_0 = arith.constant 0 : i32
    %c0_i32_1 = arith.constant 0 : i32
    return %c0_i32, %c0_i32_0 : i32, i32
  }
  func.func @transform_5(%arg0: i32, %arg1: memref<1xi32, #tpu.memory_space<smem>>) -> (i32, i32) {
    %c0_i32 = arith.constant 0 : i32
    %c0_i32_0 = arith.constant 0 : i32
    %c0_i32_1 = arith.constant 0 : i32
    return %c0_i32, %c0_i32_0 : i32, i32
  }
  func.func @transform_6(%arg0: i32, %arg1: memref<1xi32, #tpu.memory_space<smem>>) -> (i32, i32) {
    %c0_i32 = arith.constant 0 : i32
    %c0_i32_0 = arith.constant 0 : i32
    %c0_i32_1 = arith.constant 0 : i32
    return %c0_i32, %c0_i32_0 : i32, i32
  }
  func.func @transform_7(%arg0: i32, %arg1: memref<1xi32, #tpu.memory_space<smem>>) -> (i32, i32) {
    %c0_i32 = arith.constant 0 : i32
    %c0_i32_0 = arith.constant 0 : i32
    %c0_i32_1 = arith.constant 0 : i32
    return %c0_i32, %c0_i32_0 : i32, i32
  }
  func.func @transform_8(%arg0: i32, %arg1: memref<1xi32, #tpu.memory_space<smem>>) -> (i32, i32) {
    %c0_i32 = arith.constant 0 : i32
    %c0_i32_0 = arith.constant 0 : i32
    %c0_i32_1 = arith.constant 0 : i32
    return %c0_i32, %c0_i32_0 : i32, i32
  }
  func.func @transform_9(%arg0: i32, %arg1: memref<1xi32, #tpu.memory_space<smem>>) -> (i32, i32) {
    %c0_i32 = arith.constant 0 : i32
    %c0_i32_0 = arith.constant 0 : i32
    %c0_i32_1 = arith.constant 0 : i32
    return %c0_i32, %c0_i32_0 : i32, i32
  }
  func.func @transform_10(%arg0: i32, %arg1: memref<1xi32, #tpu.memory_space<smem>>) -> (i32, i32) {
    %c0_i32 = arith.constant 0 : i32
    %c0_i32_0 = arith.constant 0 : i32
    %c0_i32_1 = arith.constant 0 : i32
    return %c0_i32, %c0_i32_0 : i32, i32
  }
  func.func @transform_11(%arg0: i32, %arg1: memref<1xi32, #tpu.memory_space<smem>>) -> (i32, i32) {
    %c0_i32 = arith.constant 0 : i32
    %c0_i32_0 = arith.constant 0 : i32
    return %arg0, %c0_i32 : i32, i32
  }
}

</mosaic_0001>

<bundles_post_ra>
// kernel: encoder_net_forward.1
= control target key start
LH: loop header
LB: loop body
LE: loop exit
PB: predicated region body
PF: predicated region fallthrough
CT: control target
= control target key end

     0   :  { %18 = vsyncpa [#allocation8], 0  ;;  %s6441_s0 = inlined_call_operand.<no memory space> [shape: s32[1], index: 0, kind: input, shape index: {}]   ;;  %s6442_s1 = inlined_call_operand.vmem [shape: bf16[16,128], index: 1, kind: input, shape index: {}]   ;;  %s6443_s2 = inlined_call_operand.hbm [shape: bf16[128,384], index: 2, kind: input, shape index: {}]   ;;  %s6444_s3 = inlined_call_operand.vmem [shape: f32[1,384], index: 3, kind: input, shape index: {}]   ;;  %s6445_s4 = inlined_call_operand.hbm [shape: bf16[384,512], index: 4, kind: input, shape index: {}]   ;;  %s6446_s5 = inlined_call_operand.vmem [shape: f32[1,512], index: 5, kind: input, shape index: {}]   ;;  %s6447_s6 = inlined_call_operand.hbm [shape: bf16[384,512], index: 6, kind: input, shape index: {}]   ;;  %s6448_s7 = inlined_call_operand.vmem [shape: f32[1,512], index: 7, kind: input, shape index: {}]   ;;  %s6449_s8 = inlined_call_operand.hbm [shape: bf16[384,512], index: 8, kind: input, shape index: {}]   ;;  %s6450_s9 = inlined_call_operand.vmem [shape: f32[1,512], index: 9, kind: input, shape index: {}]   ;;  %s6451_s10 = inlined_call_operand.hbm [shape: bf16[512,384], index: 10, kind: input, shape index: {}]   ;;  %s6452_s11 = inlined_call_operand.vmem [shape: f32[1,384], index: 11, kind: input, shape index: {}]   ;;  %s6453_s12 = inlined_call_operand.vmem [shape: f32[16,384], index: 12, kind: output, shape index: {}]  }
   0x1   :  { %19 = vsyncpa [#allocation10], 0  ;;  %s42_s23 = sshll.u32 %s6445_s4, 4  ;;  %s43_s23 = int_to_ptr.hbm [resolvable:$true] %s42_s23 }
   0x2   :  { %20 = vsyncpa [#allocation13], 0  ;;  %s6118_s24 = smov [#allocation9]   ;;  %s72_s28 = sshll.u32 %s6449_s8, 4  ;;  %s73_s28 = int_to_ptr.hbm [resolvable:$true] %s72_s28 }
   0x3   :  { %s44_s25 = sshll.u32 %s6118_s24, 4  ;;  %s6119_s29 = smov 256   ;;  %s45_s25 = int_to_ptr.vmem [resolvable:$true] %s44_s25 }
   0x4   :  { %s6120_s30 = smov 16   ;;  %s6121_s13 = smov [#allocation12]  }
   0x5   :  { %50 = dma.hbm_to_vmem [thread:$0]  %s43_s23, 12288, %s45_s25, [#allocation10], %s6119_s29, %s6119_s29, %s6120_s30  }
   0x6   :  { %s74_s14 = sshll.u32 %s6121_s13, 4  ;;  %s27_s17 = sshll.u32 %s6443_s2, 4  ;;  %s75_s14 = int_to_ptr.vmem [resolvable:$true] %s74_s14  ;;  %s28_s17 = int_to_ptr.hbm [resolvable:$true] %s27_s17 }
   0x7   :  { %80 = dma.hbm_to_vmem [thread:$0]  %s73_s28, 12288, %s75_s14, [#allocation13], %s6119_s29, %s6119_s29, %s6120_s30  }
   0x8   :  { %s6122_s4 = smov [#allocation7]   ;;  %s57_s8 = sshll.u32 %s6447_s6, 4  ;;  %s58_s8 = int_to_ptr.hbm [resolvable:$true] %s57_s8 }
   0x9   :  { %s29_s18 = sshll.u32 %s6122_s4, 4  ;;  %s6123_s21 = smov 192   ;;  %s30_s18 = int_to_ptr.vmem [resolvable:$true] %s29_s18 }
   0xa   :  { %s6124_s22 = smov 12   ;;  %s6125_s23 = smov [#allocation11]  }
   0xb   :  { %35 = dma.hbm_to_vmem [thread:$0]  %s28_s17, 3072, %s30_s18, [#allocation8], %s6123_s21, %s6123_s21, %s6124_s22  }
   0xc   :  { %s59_s24 = sshll.u32 %s6125_s23, 4  ;;  %s87_s2 = sshll.u32 %s6451_s10, 4  ;;  %s60_s24 = int_to_ptr.vmem [resolvable:$true] %s59_s24  ;;  %s88_s2 = int_to_ptr.hbm [resolvable:$true] %s87_s2 }
   0xd   :  { %65 = dma.hbm_to_vmem [thread:$0]  %s58_s8, 12288, %s60_s24, [#allocation10], %s6119_s29, %s6119_s29, %s6120_s30  }
   0xe   :  { %s6126_s27 = smov [#allocation14]  }
   0xf   :  { %s89_s28 = sshll.u32 %s6126_s27, 4  ;;  %s90_s28 = int_to_ptr.vmem [resolvable:$true] %s89_s28 }
  0x10   :  { %95 = dma.hbm_to_vmem [thread:$0]  %s88_s2, 12288, %s90_s28, [#allocation13], %s6123_s21, %s6123_s21, %s6124_s22  }
  0x11   :  { %6112 = dma.done.wait [#allocation8], 3072  }
  0x12   :  { %6113 = vsyncadd [#allocation8], 4294964224 }
  0x13   :  { %6114 = dma.done.wait [#allocation10], 24576  }
  0x14   :  { %6115 = vsyncadd [#allocation10], 4294942720 }
  0x15   :  { %6116 = dma.done.wait [#allocation13], 24576  }
  0x16   :  { %6117 = vsyncadd [#allocation13], 4294942720  ;;  %v3948_v0 = vld [vmem:[#allocation7 + $0xa8] sm:$0xf]  ;;  %v5553_v1 = vld [vmem:[#allocation7 + $0xb0] sm:$0xf0] }
  0x17   :  { %v5552_v2 = vld [vmem:[#allocation7 + $0xac] sm:$0xf]  ;;  %v3949_v3 = vor.u32 %v5553_v1, %v3948_v0  ;;  %v3950_v4 = vld [vmem:[#allocation7 + $0xb4] sm:$0xf0]  ;;  %v3956_v5 = vld [vmem:[#allocation7 + $0xb0] sm:$0xf] }
  0x18   :  { %v5554_v6 = vld [vmem:[#allocation7 + $0xb8] sm:$0xf0]  ;;  %v3953_v7 = vor.u32 %v5552_v2, %v3950_v4  ;;  %v3936_v9 = vld [vmem:[#allocation7 + $0x90] sm:$0xf]  ;;  %v5549_v11 = vld [vmem:[#allocation7 + $0x94] sm:$0xf] }
  0x19   :  { %v3957_v8 = vor.u32 %v5554_v6, %v3956_v5  ;;  %v5550_v10 = vld [vmem:[#allocation7 + $0x98] sm:$0xf0]  ;;  %300 = vmatpush.bf16.msra.mxu0 %v3949_v3  ;;  %v3938_v13 = vld [vmem:[#allocation7 + $0x9c] sm:$0xf0]  ;;  %v3944_v14 = vld [vmem:[#allocation7 + $0x98] sm:$0xf] }
  0x1a   :  { %v3937_v12 = vor.u32 %v5550_v10, %v3936_v9  ;;  %v5551_v15 = vld [vmem:[#allocation7 + $0xa0] sm:$0xf0]  ;;  %314 = vmatpush.bf16.msra.mxu1 %v3953_v7  ;;  %v3941_v16 = vor.u32 %v5549_v11, %v3938_v13  ;;  %v3924_v18 = vld [vmem:[#allocation7 + $0x78] sm:$0xf]  ;;  %v5546_v20 = vld [vmem:[#allocation7 + $0x7c] sm:$0xf] }
  0x1b   :  { %328 = vmatpush.bf16.msra.mxu2 %v3957_v8  ;;  %v3945_v17 = vor.u32 %v5551_v15, %v3944_v14  ;;  %v5547_v19 = vld [vmem:[#allocation7 + $0x80] sm:$0xf0]  ;;  %v3926_v21 = vld [vmem:[#allocation7 + $0x84] sm:$0xf0]  ;;  %v3932_v22 = vld [vmem:[#allocation7 + $0x80] sm:$0xf] }
  0x1c   :  { %v5548_v23 = vld [vmem:[#allocation7 + $0x88] sm:$0xf0]  ;;  %v3925_v24 = vor.u32 %v5547_v19, %v3924_v18  ;;  %v3929_v25 = vor.u32 %v5546_v20, %v3926_v21  ;;  %v3912_v27 = vld [vmem:[#allocation7 + $0x60] sm:$0xf]  ;;  %v5543_v29 = vld [vmem:[#allocation7 + $0x64] sm:$0xf] }
  0x1d   :  { %301 = vmatpush.bf16.msra.mxu0 %v3937_v12  ;;  %v3933_v26 = vor.u32 %v5548_v23, %v3932_v22  ;;  %v5544_v28 = vld [vmem:[#allocation7 + $0x68] sm:$0xf0]  ;;  %v3914_v30 = vld [vmem:[#allocation7 + $0x6c] sm:$0xf0]  ;;  %v3920_v31 = vld [vmem:[#allocation7 + $0x68] sm:$0xf] }
  0x1e   :  { %315 = vmatpush.bf16.msra.mxu1 %v3941_v16  ;;  %v5545_v32 = vld [vmem:[#allocation7 + $0x70] sm:$0xf0]  ;;  %v3913_v33 = vor.u32 %v5544_v28, %v3912_v27  ;;  %v3917_v34 = vor.u32 %v5543_v29, %v3914_v30  ;;  %v3900_v36 = vld [vmem:[#allocation7 + $0x48] sm:$0xf]  ;;  %v5540_v38 = vld [vmem:[#allocation7 + $0x4c] sm:$0xf] }
  0x1f   :  { %329 = vmatpush.bf16.msra.mxu2 %v3945_v17  ;;  %v3921_v35 = vor.u32 %v5545_v32, %v3920_v31  ;;  %v5541_v37 = vld [vmem:[#allocation7 + $0x50] sm:$0xf0]  ;;  %v3902_v39 = vld [vmem:[#allocation7 + $0x54] sm:$0xf0]  ;;  %v3908_v40 = vld [vmem:[#allocation7 + $0x50] sm:$0xf] }
  0x20   :  { %v5542_v41 = vld [vmem:[#allocation7 + $0x58] sm:$0xf0]  ;;  %v3901_v42 = vor.u32 %v5541_v37, %v3900_v36  ;;  %v3888_v43 = vld [vmem:[#allocation7 + $0x30] sm:$0xf]  ;;  %v3905_v45 = vor.u32 %v5540_v38, %v3902_v39  ;;  %v5537_v47 = vld [vmem:[#allocation7 + $0x34] sm:$0xf] }
  0x21   :  { %302 = vmatpush.bf16.msra.mxu0 %v3925_v24  ;;  %v5538_v44 = vld [vmem:[#allocation7 + $0x38] sm:$0xf0]  ;;  %v3909_v46 = vor.u32 %v5542_v41, %v3908_v40  ;;  %v4072_v48 = vld [vmem:[#allocation11 + $0xe0] sm:$0xf]  ;;  %v5585_v49 = vld [vmem:[#allocation11 + $0xec] sm:$0xf0] }
  0x22   :  { %316 = vmatpush.bf16.msra.mxu1 %v3929_v25  ;;  %v3890_v50 = vld [vmem:[#allocation7 + $0x3c] sm:$0xf0]  ;;  %v3896_v51 = vld [vmem:[#allocation7 + $0x38] sm:$0xf]  ;;  %v5539_v52 = vld [vmem:[#allocation7 + $0x40] sm:$0xf0]  ;;  %v4073_v53 = vor.u32 %v5585_v49, %v4072_v48  ;;  %v3889_v56 = vor.u32 %v5538_v44, %v3888_v43 }
  0x23   :  { %330 = vmatpush.bf16.msra.mxu2 %v3933_v26  ;;  %v4056_v54 = vld [vmem:[#allocation11 + $0xc0] sm:$0xf]  ;;  %v5581_v55 = vld [vmem:[#allocation11 + $0xcc] sm:$0xf0]  ;;  %v3876_v57 = vld [vmem:[#allocation7 + $0x18] sm:$0xf]  ;;  %v3893_v60 = vor.u32 %v5537_v47, %v3890_v50  ;;  %v3897_v61 = vor.u32 %v5539_v52, %v3896_v51 }
  0x24   :  { %v5535_v58 = vld [vmem:[#allocation7 + $0x20] sm:$0xf0]  ;;  %937 = vmatpush.bf16.msra.mxu3 %v4073_v53  ;;  %v4057_v59 = vor.u32 %v5581_v55, %v4056_v54  ;;  %v5534_v62 = vld [vmem:[#allocation7 + $0x1c] sm:$0xf]  ;;  %v3878_v63 = vld [vmem:[#allocation7 + $0x24] sm:$0xf0] }
  0x25   :  { %303 = vmatpush.bf16.msra.mxu0 %v3913_v33  ;;  %v3884_v0 = vld [vmem:[#allocation7 + $0x20] sm:$0xf]  ;;  %v5536_v1 = vld [vmem:[#allocation7 + $0x28] sm:$0xf0]  ;;  %v5577_v3 = vld [vmem:[#allocation11 + $0xac] sm:$0xf0]  ;;  %v3877_v4 = vor.u32 %v5535_v58, %v3876_v57  ;;  %v3881_v9 = vor.u32 %v5534_v62, %v3878_v63 }
  0x26   :  { %317 = vmatpush.bf16.msra.mxu1 %v3917_v34  ;;  %v4040_v2 = vld [vmem:[#allocation11 + $0xa0] sm:$0xf]  ;;  %v5532_v6 = vld [vmem:[#allocation7 + $0x8] sm:$0xf0]  ;;  %v5531_v7 = vld [vmem:[#allocation7 + $0x4] sm:$0xf]  ;;  %v3885_v10 = vor.u32 %v5536_v1, %v3884_v0 }
  0x27   :  { %331 = vmatpush.bf16.msra.mxu2 %v3921_v35  ;;  %v3864_v5 = vld [vmem:[#allocation7] sm:$0xf]  ;;  %v4041_v8 = vor.u32 %v5577_v3, %v4040_v2  ;;  %v3866_v11 = vld [vmem:[#allocation7 + $0xc] sm:$0xf0]  ;;  %v3872_v14 = vld [vmem:[#allocation7 + $0x8] sm:$0xf] }
  0x28   :  { %938 = vmatpush.bf16.msra.mxu3 %v4057_v59  ;;  %v4024_v12 = vld [vmem:[#allocation11 + $0x80] sm:$0xf]  ;;  %v5573_v13 = vld [vmem:[#allocation11 + $0x8c] sm:$0xf0]  ;;  %v5533_v15 = vld [vmem:[#allocation7 + $0x10] sm:$0xf0]  ;;  %v3865_v20 = vor.u32 %v5532_v6, %v3864_v5  ;;  %v3869_v24 = vor.u32 %v5531_v7, %v3866_v11 }
  0x29   :  { %304 = vmatpush.bf16.msra.mxu0 %v3901_v42  ;;  %v4200_v16 = vld [vmem:[#allocation11 + $0x1e0] sm:$0xf]  ;;  %v5617_v17 = vld [vmem:[#allocation11 + $0x1ec] sm:$0xf0]  ;;  %v5583_v18 = vld [vmem:[#allocation11 + $0xe4] sm:$0xf]  ;;  %v4025_v23 = vor.u32 %v5573_v13, %v4024_v12  ;;  %v3873_v25 = vor.u32 %v5533_v15, %v3872_v14 }
  0x2a   :  { %318 = vmatpush.bf16.msra.mxu1 %v3905_v45  ;;  %v4074_v19 = vld [vmem:[#allocation11 + $0xf0] sm:$0xf0]  ;;  %v4328_v21 = vld [vmem:[#allocation11 + $0x2e0] sm:$0xf]  ;;  %v5649_v22 = vld [vmem:[#allocation11 + $0x2ec] sm:$0xf0]  ;;  %v4201_v27 = vor.u32 %v5617_v17, %v4200_v16 }
  0x2b   :  { %332 = vmatpush.bf16.msra.mxu2 %v3909_v46  ;;  %v5530_v26 = vld [vmem:[%s6442_s1] sm:$0xff]  ;;  %v4077_v28 = vor.u32 %v5583_v18, %v4074_v19  ;;  %v5569_v31 = vld [vmem:[#allocation11 + $0x6c] sm:$0xf0]  ;;  %v4058_v34 = vld [vmem:[#allocation11 + $0xd0] sm:$0xf0]  ;;  %v4329_v35 = vor.u32 %v5649_v22, %v4328_v21  ;;  %vm2690_vm1 = vcmask 130048  }
  0x2c   :  { %939 = vmatpush.bf16.msra.mxu3 %v4041_v8  ;;  %v4184_v29 = vld [vmem:[#allocation11 + $0x1c0] sm:$0xf]  ;;  %v5613_v32 = vld [vmem:[#allocation11 + $0x1cc] sm:$0xf0]  ;;  %v5579_v33 = vld [vmem:[#allocation11 + $0xc4] sm:$0xf] }
  0x2d   :  { %305 = vmatpush.bf16.msra.mxu0 %v3889_v56  ;;  %v4008_v30 = vld [vmem:[#allocation11 + $0x60] sm:$0xf]  ;;  %v5645_v37 = vld [vmem:[#allocation11 + $0x2cc] sm:$0xf0]  ;;  %v4185_v39 = vor.u32 %v5613_v32, %v4184_v29  ;;  %v4061_v40 = vor.u32 %v5579_v33, %v4058_v34  ;;  %v5575_v45 = vld [vmem:[#allocation11 + $0xa4] sm:$0xf] }
  0x2e   :  { %319 = vmatpush.bf16.msra.mxu1 %v3893_v60  ;;  %v4312_v36 = vld [vmem:[#allocation11 + $0x2c0] sm:$0xf]  ;;  %v4009_v38 = vor.u32 %v5569_v31, %v4008_v30  ;;  %v5565_v43 = vld [vmem:[#allocation11 + $0x4c] sm:$0xf0]  ;;  %v4042_v46 = vld [vmem:[#allocation11 + $0xb0] sm:$0xf0] }
  0x2f   :  { %333 = vmatpush.bf16.msra.mxu2 %v3897_v61  ;;  %v4168_v41 = vld [vmem:[#allocation11 + $0x1a0] sm:$0xf]  ;;  %v5609_v44 = vld [vmem:[#allocation11 + $0x1ac] sm:$0xf0]  ;;  %v4313_v47 = vor.u32 %v5645_v37, %v4312_v36  ;;  %v4045_v52 = vor.u32 %v5575_v45, %v4042_v46  ;;  %v5571_v57 = vld [vmem:[#allocation11 + $0x84] sm:$0xf] }
  0x30   :  { %940 = vmatpush.bf16.msra.mxu3 %v4025_v23  ;;  %v3992_v42 = vld [vmem:[#allocation11 + $0x40] sm:$0xf]  ;;  %v5641_v49 = vld [vmem:[#allocation11 + $0x2ac] sm:$0xf0]  ;;  %v4169_v51 = vor.u32 %v5609_v44, %v4168_v41  ;;  %v4026_v58 = vld [vmem:[#allocation11 + $0x90] sm:$0xf0] }
  0x31   :  { %306 = vmatpush.bf16.msra.mxu0 %v3877_v4  ;;  %v4296_v48 = vld [vmem:[#allocation11 + $0x2a0] sm:$0xf]  ;;  %v3993_v50 = vor.u32 %v5565_v43, %v3992_v42  ;;  %v5561_v55 = vld [vmem:[#allocation11 + $0x2c] sm:$0xf0]  ;;  %v4029_v1 = vor.u32 %v5571_v57, %v4026_v58  ;;  %v5567_v5 = vld [vmem:[#allocation11 + $0x64] sm:$0xf] }
  0x32   :  { %320 = vmatpush.bf16.msra.mxu1 %v3881_v9  ;;  %v4152_v53 = vld [vmem:[#allocation11 + $0x180] sm:$0xf]  ;;  %v5605_v56 = vld [vmem:[#allocation11 + $0x18c] sm:$0xf0]  ;;  %v4297_v59 = vor.u32 %v5641_v49, %v4296_v48  ;;  %v4010_v6 = vld [vmem:[#allocation11 + $0x70] sm:$0xf0] }
  0x33   :  { %334 = vmatpush.bf16.msra.mxu2 %v3885_v10  ;;  %v3976_v54 = vld [vmem:[#allocation11 + $0x20] sm:$0xf]  ;;  %v5637_v61 = vld [vmem:[#allocation11 + $0x28c] sm:$0xf0]  ;;  %v4153_v0 = vor.u32 %v5605_v56, %v4152_v53  ;;  %v5615_v10 = vld [vmem:[#allocation11 + $0x1e4] sm:$0xf]  ;;  %v4013_v14 = vor.u32 %v5567_v5, %v4010_v6 }
  0x34   :  { %941 = vmatpush.bf16.msra.mxu3 %v4009_v38  ;;  %v4280_v60 = vld [vmem:[#allocation11 + $0x280] sm:$0xf]  ;;  %v3977_v63 = vor.u32 %v5561_v55, %v3976_v54  ;;  %v5601_v2 = vld [vmem:[#allocation11 + $0x16c] sm:$0xf0]  ;;  %v4202_v11 = vld [vmem:[#allocation11 + $0x1f0] sm:$0xf0] }
  0x35   :  { %307 = vmatpush.bf16.msra.mxu0 %v3865_v20  ;;  %v4136_v62 = vld [vmem:[#allocation11 + $0x160] sm:$0xf]  ;;  %v5557_v4 = vld [vmem:[#allocation11 + $0xc] sm:$0xf0]  ;;  %v4281_v7 = vor.u32 %v5637_v61, %v4280_v60  ;;  %v5563_v17 = vld [vmem:[#allocation11 + $0x44] sm:$0xf]  ;;  %v4205_v21 = vor.u32 %v5615_v10, %v4202_v11 }
  0x36   :  { %321 = vmatpush.bf16.msra.mxu1 %v3869_v24  ;;  %v3960_v3 = vld [vmem:[#allocation11] sm:$0xf]  ;;  %v5633_v9 = vld [vmem:[#allocation11 + $0x26c] sm:$0xf0]  ;;  %v4137_v13 = vor.u32 %v5601_v2, %v4136_v62  ;;  %v3994_v18 = vld [vmem:[#allocation11 + $0x50] sm:$0xf0] }
  0x37   :  { %335 = vmatpush.bf16.msra.mxu2 %v3873_v25  ;;  %v4264_v8 = vld [vmem:[#allocation11 + $0x260] sm:$0xf]  ;;  %v3961_v12 = vor.u32 %v5557_v4, %v3960_v3  ;;  %v5597_v16 = vld [vmem:[#allocation11 + $0x14c] sm:$0xf0]  ;;  %v5611_v23 = vld [vmem:[#allocation11 + $0x1c4] sm:$0xf] }
  0x38   :  { %308 = vmatmul.bf16.vlgmr.msra.gmra.mxu0 %v5530_v26  ;;  %942 = vmatpush.bf16.msra.mxu3 %v3993_v50  ;;  %v4120_v15 = vld [vmem:[#allocation11 + $0x140] sm:$0xf]  ;;  %v4265_v19 = vor.u32 %v5633_v9, %v4264_v8  ;;  %v5629_v22 = vld [vmem:[#allocation11 + $0x24c] sm:$0xf0]  ;;  %v4186_v24 = vld [vmem:[#allocation11 + $0x1d0] sm:$0xf0] }
  0x39   :  { %951 = vmatpush.bf16.msrb.mxu0 %v4201_v27  ;;  %322 = vmatmul.bf16.vlgmr.msra.gmra.mxu1 %v5530_v26  ;;  %v4248_v20 = vld [vmem:[#allocation11 + $0x240] sm:$0xf]  ;;  %v4121_v25 = vor.u32 %v5597_v16, %v4120_v15  ;;  %v5559_v29 = vld [vmem:[#allocation11 + $0x24] sm:$0xf]  ;;  %v3978_v30 = vld [vmem:[#allocation11 + $0x30] sm:$0xf0]  ;;  %v4189_v33 = vor.u32 %v5611_v23, %v4186_v24 }
  0x3a   :  { %965 = vmatpush.bf16.msrb.mxu1 %v4329_v35  ;;  %336 = vmatmul.bf16.vlgmr.msra.gmra.mxu2 %v5530_v26  ;;  %v3997_v26 = vor.u32 %v5563_v17, %v3994_v18  ;;  %v4104_v27 = vld [vmem:[#allocation11 + $0x120] sm:$0xf]  ;;  %v4249_v31 = vor.u32 %v5629_v22, %v4248_v20  ;;  %v5625_v34 = vld [vmem:[#allocation11 + $0x22c] sm:$0xf0]  ;;  %v5607_v35 = vld [vmem:[#allocation11 + $0x1a4] sm:$0xf]  ;;  %v3981_v38 = vor.u32 %v5559_v29, %v3978_v30 }
  0x3b   :  { %979 = vmatpush.bf16.msrb.mxu2 %v4077_v28  ;;  %v5593_v28 = vld [vmem:[#allocation11 + $0x12c] sm:$0xf0]  ;;  %v4232_v32 = vld [vmem:[#allocation11 + $0x220] sm:$0xf]  ;;  %v4170_v36 = vld [vmem:[#allocation11 + $0x1b0] sm:$0xf0] }
  0x3c   :  { %943 = vmatpush.bf16.msra.mxu3 %v3977_v63  ;;  %v4105_v37 = vor.u32 %v5593_v28, %v4104_v27  ;;  %v5555_v41 = vld [vmem:[#allocation11 + $0x4] sm:$0xf]  ;;  %v3962_v42 = vld [vmem:[#allocation11 + $0x10] sm:$0xf0]  ;;  %v4233_v45 = vor.u32 %v5625_v34, %v4232_v32  ;;  %v4173_v46 = vor.u32 %v5607_v35, %v4170_v36  ;;  %v5618_v48 = vld [vmem:[#allocation11 + $0x1f4] sm:$0xf0] }
  0x3d   :  { %952 = vmatpush.bf16.msrb.mxu0 %v4185_v39  ;;  %v4088_v39 = vld [vmem:[#allocation11 + $0x100] sm:$0xf]  ;;  %v5647_v43 = vld [vmem:[#allocation11 + $0x2e4] sm:$0xf]  ;;  %v4330_v44 = vld [vmem:[#allocation11 + $0x2f0] sm:$0xf0]  ;;  %v3965_v54 = vor.u32 %v5555_v41, %v3962_v42 }
  0x3e   :  { %966 = vmatpush.bf16.msrb.mxu1 %v4313_v47  ;;  %v4208_v47 = vld [vmem:[#allocation11 + $0x1e8] sm:$0xf]  ;;  %v4216_v49 = vld [vmem:[#allocation11 + $0x200] sm:$0xf]  ;;  %v5621_v50 = vld [vmem:[#allocation11 + $0x20c] sm:$0xf0]  ;;  %v4333_v57 = vor.u32 %v5647_v43, %v4330_v44 }
  0x3f   :  { %980 = vmatpush.bf16.msrb.mxu2 %v4061_v40  ;;  %v5589_v40 = vld [vmem:[#allocation11 + $0x10c] sm:$0xf0]  ;;  %v4080_v55 = vld [vmem:[#allocation11 + $0xe8] sm:$0xf]  ;;  %v5586_v56 = vld [vmem:[#allocation11 + $0xf4] sm:$0xf0]  ;;  %v4209_v58 = vor.u32 %v5618_v48, %v4208_v47  ;;  %v4217_v63 = vor.u32 %v5621_v50, %v4216_v49 }
  0x40   :  { %944 = vmatpush.bf16.msra.mxu3 %v3961_v12  ;;  %v4089_v53 = vor.u32 %v5589_v40, %v4088_v39  ;;  %v4314_v60 = vld [vmem:[#allocation11 + $0x2d0] sm:$0xf0]  ;;  %v4192_v61 = vld [vmem:[#allocation11 + $0x1c8] sm:$0xf]  ;;  %v5614_v62 = vld [vmem:[#allocation11 + $0x1d4] sm:$0xf0] }
  0x41   :  { %953 = vmatpush.bf16.msrb.mxu0 %v4169_v51  ;;  %v5603_v51 = vld [vmem:[#allocation11 + $0x184] sm:$0xf]  ;;  %v4064_v2 = vld [vmem:[#allocation11 + $0xc8] sm:$0xf]  ;;  %v5582_v3 = vld [vmem:[#allocation11 + $0xd4] sm:$0xf0]  ;;  %v4193_v5 = vor.u32 %v5614_v62, %v4192_v61 }
  0x42   :  { %967 = vmatpush.bf16.msrb.mxu1 %v4297_v59  ;;  %v5643_v59 = vld [vmem:[#allocation11 + $0x2c4] sm:$0xf]  ;;  %v4176_v8 = vld [vmem:[#allocation11 + $0x1a8] sm:$0xf]  ;;  %v5610_v9 = vld [vmem:[#allocation11 + $0x1b4] sm:$0xf0]  ;;  %v4065_v10 = vor.u32 %v5582_v3, %v4064_v2 }
  0x43   :  { %981 = vmatpush.bf16.msrb.mxu2 %v4045_v52  ;;  %v4154_v52 = vld [vmem:[#allocation11 + $0x190] sm:$0xf0]  ;;  %v4317_v4 = vor.u32 %v5643_v59, %v4314_v60  ;;  %v5639_v6 = vld [vmem:[#allocation11 + $0x2a4] sm:$0xf]  ;;  %v4048_v11 = vld [vmem:[#allocation11 + $0xa8] sm:$0xf] }
  0x44   :  { %993 = vmatpush.bf16.msrb.mxu3 %v4205_v21  ;;  %v5578_v12 = vld [vmem:[#allocation11 + $0xb4] sm:$0xf0]  ;;  %v5635_v15 = vld [vmem:[#allocation11 + $0x284] sm:$0xf]  ;;  %v4282_v16 = vld [vmem:[#allocation11 + $0x290] sm:$0xf0] }
  0x45   :  { %954 = vmatpush.bf16.msrb.mxu0 %v4153_v0  ;;  %v4157_v0 = vor.u32 %v5603_v51, %v4154_v52  ;;  %v4160_v17 = vld [vmem:[#allocation11 + $0x188] sm:$0xf]  ;;  %v5606_v18 = vld [vmem:[#allocation11 + $0x194] sm:$0xf0]  ;;  %v4285_v20 = vor.u32 %v5635_v15, %v4282_v16  ;;  %v5599_v22 = vld [vmem:[#allocation11 + $0x164] sm:$0xf] }
  0x46   :  { %968 = vmatpush.bf16.msrb.mxu1 %v4281_v7  ;;  %v4298_v7 = vld [vmem:[#allocation11 + $0x2b0] sm:$0xf0]  ;;  %v4161_v21 = vor.u32 %v5606_v18, %v4160_v17  ;;  %v5631_v24 = vld [vmem:[#allocation11 + $0x264] sm:$0xf]  ;;  %v4144_v27 = vld [vmem:[#allocation11 + $0x168] sm:$0xf] }
  0x47   :  { %982 = vmatpush.bf16.msrb.mxu2 %v4029_v1  ;;  %v4081_v1 = vor.u32 %v5586_v56, %v4080_v55  ;;  %v4138_v23 = vld [vmem:[#allocation11 + $0x170] sm:$0xf0]  ;;  %v5602_v28 = vld [vmem:[#allocation11 + $0x174] sm:$0xf0]  ;;  %v5595_v34 = vld [vmem:[#allocation11 + $0x144] sm:$0xf] }
  0x48   :  { %994 = vmatpush.bf16.msrb.mxu3 %v4189_v33  ;;  %v4145_v30 = vor.u32 %v5602_v28, %v4144_v27  ;;  %v5574_v32 = vld [vmem:[#allocation11 + $0x94] sm:$0xf0]  ;;  %v4122_v35 = vld [vmem:[#allocation11 + $0x150] sm:$0xf0]  ;;  %v5627_v36 = vld [vmem:[#allocation11 + $0x244] sm:$0xf] }
  0x49   :  { %955 = vmatpush.bf16.msrb.mxu0 %v4137_v13  ;;  %v4301_v13 = vor.u32 %v5639_v6, %v4298_v7  ;;  %v4128_v39 = vld [vmem:[#allocation11 + $0x148] sm:$0xf]  ;;  %v5598_v40 = vld [vmem:[#allocation11 + $0x154] sm:$0xf0]  ;;  %v4106_v47 = vld [vmem:[#allocation11 + $0x130] sm:$0xf0] }
  0x4a   :  { %969 = vmatpush.bf16.msrb.mxu1 %v4265_v19  ;;  %v4049_v19 = vor.u32 %v5578_v12, %v4048_v11  ;;  %v4129_v42 = vor.u32 %v5598_v40, %v4128_v39  ;;  %v4016_v43 = vld [vmem:[#allocation11 + $0x68] sm:$0xf]  ;;  %v5570_v44 = vld [vmem:[#allocation11 + $0x74] sm:$0xf0]  ;;  %v5623_v48 = vld [vmem:[#allocation11 + $0x224] sm:$0xf] }
  0x4b   :  { %983 = vmatpush.bf16.msrb.mxu2 %v4013_v14  ;;  %v4177_v14 = vor.u32 %v5610_v9, %v4176_v8  ;;  %v4234_v50 = vld [vmem:[#allocation11 + $0x230] sm:$0xf0]  ;;  %v4112_v51 = vld [vmem:[#allocation11 + $0x128] sm:$0xf]  ;;  %v5594_v52 = vld [vmem:[#allocation11 + $0x134] sm:$0xf0] }
  0x4c   :  { %995 = vmatpush.bf16.msrb.mxu3 %v4173_v46  ;;  %v5591_v46 = vld [vmem:[#allocation11 + $0x124] sm:$0xf]  ;;  %v4000_v55 = vld [vmem:[#allocation11 + $0x48] sm:$0xf]  ;;  %v5566_v56 = vld [vmem:[#allocation11 + $0x54] sm:$0xf0] }
  0x4d   :  { %956 = vmatpush.bf16.msrb.mxu0 %v4121_v25  ;;  %v4141_v25 = vor.u32 %v5599_v22, %v4138_v23  ;;  %v4109_v49 = vor.u32 %v5591_v46, %v4106_v47  ;;  %v4090_v59 = vld [vmem:[#allocation11 + $0x110] sm:$0xf0]  ;;  %v5619_v60 = vld [vmem:[#allocation11 + $0x204] sm:$0xf]  ;;  %v3984_v3 = vld [vmem:[#allocation11 + $0x28] sm:$0xf] }
  0x4e   :  { %970 = vmatpush.bf16.msrb.mxu1 %v4249_v31  ;;  %v4032_v31 = vld [vmem:[#allocation11 + $0x88] sm:$0xf]  ;;  %v4218_v62 = vld [vmem:[#allocation11 + $0x210] sm:$0xf0]  ;;  %v5558_v7 = vld [vmem:[#allocation11 + $0x14] sm:$0xf0] }
  0x4f   :  { %984 = vmatpush.bf16.msrb.mxu2 %v3997_v26  ;;  %v4266_v26 = vld [vmem:[#allocation11 + $0x270] sm:$0xf0]  ;;  %v4033_v33 = vor.u32 %v5574_v32, %v4032_v31  ;;  %v3968_v6 = vld [vmem:[#allocation11 + $0x8] sm:$0xf]  ;;  %v158_v11 = vld [vmem:[%s6444_s3] sm:$0x7] }
  0x50   :  { %996 = vmatpush.bf16.msrb.mxu3 %v4157_v0  ;;  %v4269_v29 = vor.u32 %v5631_v24, %v4266_v26  ;;  %v5590_v0 = vld [vmem:[#allocation11 + $0x114] sm:$0xf0]  ;;  %v3969_v8 = vor.u32 %v5558_v7, %v3968_v6  ;;  %v160_v12 = vperm.slane %v158_v11, 0  ;;  %v4336_v15 = vld [vmem:[#allocation11 + $0x2e8] sm:$0xf]  ;;  %v162_v26 = vperm.slane %v158_v11, 2 }
  0x51   :  { %957 = vmatpush.bf16.msrb.mxu0 %v4105_v37  ;;  %v4125_v37 = vor.u32 %v5595_v34, %v4122_v35  ;;  %v5650_v16 = vld [vmem:[#allocation11 + $0x2f4] sm:$0xf0]  ;;  %v5584_v17 = vld [vmem:[#allocation11 + $0xec] sm:$0xf]  ;;  %v4320_v32 = vld [vmem:[#allocation11 + $0x2c8] sm:$0xf] }
  0x52   :  { %971 = vmatpush.bf16.msrb.mxu1 %v4233_v45  ;;  %v4017_v45 = vor.u32 %v5570_v44, %v4016_v43  ;;  %v4337_v28 = vor.u32 %v5650_v16, %v4336_v15  ;;  %v5580_v34 = vld [vmem:[#allocation11 + $0xcc] sm:$0xf]  ;;  %v5642_v46 = vld [vmem:[#allocation11 + $0x2b4] sm:$0xf0]  ;;  %v4162_v16 = vld [vmem:[#allocation11 + $0x198] sm:$0xf0] }
  0x53   :  { %985 = vmatpush.bf16.msrb.mxu2 %v3981_v38  ;;  %v4250_v38 = vld [vmem:[#allocation11 + $0x250] sm:$0xf0]  ;;  %v5616_v40 = vld [vmem:[#allocation11 + $0x1ec] sm:$0xf] }
  0x54   :  { %997 = vmatpush.bf16.msrb.mxu3 %v4141_v25  ;;  %v4253_v41 = vor.u32 %v5627_v36, %v4250_v38  ;;  %v4066_v36 = vld [vmem:[#allocation11 + $0xd8] sm:$0xf0]  ;;  %v5576_v47 = vld [vmem:[#allocation11 + $0xac] sm:$0xf] }
  0x55   :  { %958 = vmatpush.bf16.msrb.mxu0 %v4089_v53  ;;  %v4237_v53 = vor.u32 %v5623_v48, %v4234_v50  ;;  %v4322_v38 = vld [vmem:[#allocation11 + $0x2d8] sm:$0xf0]  ;;  %v4069_v43 = vor.u32 %v5580_v34, %v4066_v36  ;;  %v5604_v15 = vld [vmem:[#allocation11 + $0x18c] sm:$0xf] }
  0x56   :  { %972 = vmatpush.bf16.msrb.mxu1 %v4217_v63  ;;  %v4096_v63 = vld [vmem:[#allocation11 + $0x108] sm:$0xf]  ;;  %v4050_v50 = vld [vmem:[#allocation11 + $0xb8] sm:$0xf0] }
  0x57   :  { %986 = vmatpush.bf16.msrb.mxu2 %v3965_v54  ;;  %v4113_v54 = vor.u32 %v5594_v52, %v4112_v51  ;;  %v4097_v2 = vor.u32 %v5590_v0, %v4096_v63  ;;  %v5640_v51 = vld [vmem:[#allocation11 + $0x2ac] sm:$0xf]  ;;  %v4306_v52 = vld [vmem:[#allocation11 + $0x2b8] sm:$0xf0] }
  0x58   :  { %998 = vmatpush.bf16.msrb.mxu3 %v4125_v37  ;;  %v5644_v37 = vld [vmem:[#allocation11 + $0x2cc] sm:$0xf]  ;;  %v4034_v63 = vld [vmem:[#allocation11 + $0x98] sm:$0xf0] }
  0x59   :  { %1007 = vmatpush.bf16.msra.mxu0 %v4333_v57  ;;  %v4001_v57 = vor.u32 %v5566_v56, %v4000_v55  ;;  %v4325_v44 = vor.u32 %v5644_v37, %v4322_v38  ;;  %v5612_v56 = vld [vmem:[#allocation11 + $0x1cc] sm:$0xf]  ;;  %v4240_v37 = vld [vmem:[#allocation11 + $0x228] sm:$0xf] }
  0x5a   :  { %1021 = vmatpush.bf16.msra.mxu1 %v4081_v1  ;;  %v4221_v1 = vor.u32 %v5619_v60, %v4218_v62  ;;  %v4288_v60 = vld [vmem:[#allocation11 + $0x288] sm:$0xf]  ;;  %v5572_v62 = vld [vmem:[#allocation11 + $0x8c] sm:$0xf] }
  0x5b   :  { %1035 = vmatpush.bf16.msra.mxu2 %v4209_v58  ;;  %v5587_v58 = vld [vmem:[#allocation11 + $0x104] sm:$0xf]  ;;  %v5636_v0 = vld [vmem:[#allocation11 + $0x28c] sm:$0xf]  ;;  %v4037_v6 = vor.u32 %v5572_v62, %v4034_v63  ;;  %v4584_v62 = vld [vmem:[#allocation12 + $0x1e0] sm:$0xf] }
  0x5c   :  { %999 = vmatpush.bf16.msrb.mxu3 %v4109_v49  ;;  %v4093_v61 = vor.u32 %v5587_v58, %v4090_v59  ;;  %v4053_v58 = vor.u32 %v5576_v47, %v4050_v50  ;;  %v4309_v59 = vor.u32 %v5640_v51, %v4306_v52  ;;  %v4224_v51 = vld [vmem:[#allocation11 + $0x208] sm:$0xf]  ;;  %v5622_v52 = vld [vmem:[#allocation11 + $0x214] sm:$0xf0]  ;;  %v5713_v63 = vld [vmem:[#allocation12 + $0x1ec] sm:$0xf0] }
  0x5d   :  { %1008 = vmatpush.bf16.msra.mxu0 %v4317_v4  ;;  %v5562_v4 = vld [vmem:[#allocation11 + $0x34] sm:$0xf0] }
  0x5e   :  { %1022 = vmatpush.bf16.msra.mxu1 %v4065_v10 }
  0x5f   :  { %1036 = vmatpush.bf16.msra.mxu2 %v4193_v5  ;;  %v3985_v5 = vor.u32 %v5562_v4, %v3984_v3  ;;  %v5608_v4 = vld [vmem:[#allocation11 + $0x1ac] sm:$0xf] }
  0x60   :  { %1000 = vmatpush.bf16.msrb.mxu3 %v4093_v61  ;;  %v5638_v61 = vld [vmem:[#allocation11 + $0x294] sm:$0xf0] }
  0x61   :  { %1009 = vmatpush.bf16.msra.mxu0 %v4301_v13  ;;  %v161_v13 = vperm.slane %v158_v11, 1  ;;  %v4289_v3 = vor.u32 %v5638_v61, %v4288_v60  ;;  %v4018_v11 = vld [vmem:[#allocation11 + $0x78] sm:$0xf0]  ;;  %v4456_v60 = vld [vmem:[#allocation12 + $0xe0] sm:$0xf] }
  0x62   :  { %1023 = vmatpush.bf16.msra.mxu1 %v4049_v19  ;;  %v4082_v19 = vld [vmem:[#allocation11 + $0xf8] sm:$0xf0]  ;;  %v5681_v61 = vld [vmem:[#allocation12 + $0xec] sm:$0xf0] }
  0x63   :  { %1037 = vmatpush.bf16.msra.mxu2 %v4177_v14 }
  0x65   :  { %1010 = vmatpush.bf16.msra.mxu0 %v4285_v20  ;;  %v5648_v20 = vld [vmem:[#allocation11 + $0x2ec] sm:$0xf] }
  0x66   :  { %1024 = vmatpush.bf16.msra.mxu1 %v4033_v33  ;;  %v5646_v33 = vld [vmem:[#allocation11 + $0x2d4] sm:$0xf0] }
  0x67   :  { %1038 = vmatpush.bf16.msra.mxu2 %v4161_v21  ;;  %v4338_v21 = vld [vmem:[#allocation11 + $0x2f8] sm:$0xf0]  ;;  %v4321_v39 = vor.u32 %v5646_v33, %v4320_v32  ;;  %v5600_v32 = vld [vmem:[#allocation11 + $0x16c] sm:$0xf] }
  0x68   :  { %v4341_v31 = vor.u32 %v5648_v20, %v4338_v21  ;;  %v5630_v21 = vld [vmem:[#allocation11 + $0x254] sm:$0xf0]  ;;  %v4146_v33 = vld [vmem:[#allocation11 + $0x178] sm:$0xf0] }
  0x69   :  { %1011 = vmatpush.bf16.msra.mxu0 %v4269_v29 }
  0x6a   :  { %1025 = vmatpush.bf16.msra.mxu1 %v4017_v45  ;;  %v4304_v45 = vld [vmem:[#allocation11 + $0x2a8] sm:$0xf] }
  0x6b   :  { %1039 = vmatpush.bf16.msra.mxu2 %v4145_v30  ;;  %v4085_v30 = vor.u32 %v5584_v17, %v4082_v19  ;;  %v4305_v55 = vor.u32 %v5642_v46, %v4304_v45  ;;  %v4256_v19 = vld [vmem:[#allocation11 + $0x248] sm:$0xf]  ;;  %v5596_v45 = vld [vmem:[#allocation11 + $0x14c] sm:$0xf]  ;;  %v4130_v46 = vld [vmem:[#allocation11 + $0x158] sm:$0xf0] }
  0x6c   :  { %v4257_v34 = vor.u32 %v5630_v21, %v4256_v19  ;;  %v5745_v21 = vld [vmem:[#allocation12 + $0x2ec] sm:$0xf0] }
  0x6d   :  { %1012 = vmatpush.bf16.msra.mxu0 %v4253_v41  ;;  %v4210_v41 = vld [vmem:[#allocation11 + $0x1f8] sm:$0xf0] }
  0x6e   :  { %1026 = vmatpush.bf16.msra.mxu1 %v4001_v57  ;;  %v4194_v57 = vld [vmem:[#allocation11 + $0x1d8] sm:$0xf0] }
  0x6f   :  { %1040 = vmatpush.bf16.msra.mxu2 %v4129_v42 }
  0x71   :  { %1013 = vmatpush.bf16.msra.mxu0 %v4237_v53  ;;  %v4213_v53 = vor.u32 %v5616_v40, %v4210_v41  ;;  %v5560_v40 = vld [vmem:[#allocation11 + $0x2c] sm:$0xf]  ;;  %v3986_v41 = vld [vmem:[#allocation11 + $0x38] sm:$0xf0] }
  0x72   :  { %1027 = vmatpush.bf16.msra.mxu1 %v3985_v5  ;;  %v4178_v5 = vld [vmem:[#allocation11 + $0x1b8] sm:$0xf0]  ;;  %v3989_v50 = vor.u32 %v5560_v40, %v3986_v41  ;;  %v5741_v40 = vld [vmem:[#allocation12 + $0x2cc] sm:$0xf0] }
  0x73   :  { %1041 = vmatpush.bf16.msra.mxu2 %v4113_v54 }
  0x75   :  { %1014 = vmatpush.bf16.msra.mxu0 %v4221_v1  ;;  %v4290_v1 = vld [vmem:[#allocation11 + $0x298] sm:$0xf0] }
  0x76   :  { %1028 = vmatpush.bf16.msra.mxu1 %v3969_v8  ;;  %v4293_v7 = vor.u32 %v5636_v0, %v4290_v1  ;;  %v4272_v8 = vld [vmem:[#allocation11 + $0x268] sm:$0xf]  ;;  %v5679_v0 = vld [vmem:[#allocation12 + $0xe4] sm:$0xf]  ;;  %v4458_v1 = vld [vmem:[#allocation12 + $0xf0] sm:$0xf0] }
  0x77   :  { %1042 = vmatpush.bf16.msra.mxu2 %v4097_v2  ;;  %v4197_v2 = vor.u32 %v5612_v56, %v4194_v57  ;;  %v3970_v56 = vld [vmem:[#allocation11 + $0x18] sm:$0xf0]  ;;  %v5620_v57 = vld [vmem:[#allocation11 + $0x20c] sm:$0xf] }
  0xb5   :  { %v309_v9 = vpop.f32.mrf.mxu0 }
  0xb6   :  { %v323_v10 = vpop.f32.mrf.mxu1  ;;  %v6213_v22 = vadd.f32 %v309_v9, %v160_v12  ;;  %v5634_v9 = vld [vmem:[#allocation11 + $0x274] sm:$0xf0] }
  0xb7   :  { %v6217_v25 = vadd.f32 %v323_v10, %v161_v13  ;;  %v5568_v10 = vld [vmem:[#allocation11 + $0x6c] sm:$0xf]  ;;  %v4273_v17 = vor.u32 %v5634_v9, %v4272_v8  ;;  %v4585_v8 = vor.u32 %v5713_v63, %v4584_v62  ;;  %v4461_v9 = vor.u32 %v5679_v0, %v4458_v1  ;;  %v5663_v62 = vld [vmem:[#allocation12 + $0x64] sm:$0xf]  ;;  %v4394_v63 = vld [vmem:[#allocation12 + $0x70] sm:$0xf0] }
  0xbd   :  { %v337_v14 = vpop.f32.mrf.mxu2  ;;  %v311_v18 = vpop.f32.mrf.mxu0 }
  0xbe   :  { %v6215_v23 = vadd.f32 %v311_v18, %v160_v12  ;;  %v325_v24 = vpop.f32.mrf.mxu1  ;;  %v6232_v48 = vadd.f32 %v337_v14, %v162_v26  ;;  %v4181_v12 = vor.u32 %v5608_v4, %v4178_v5  ;;  %v4274_v14 = vld [vmem:[#allocation11 + $0x278] sm:$0xf0]  ;;  %v4021_v18 = vor.u32 %v5568_v10, %v4018_v11  ;;  %v5592_v4 = vld [vmem:[#allocation11 + $0x12c] sm:$0xf]  ;;  %v4440_v10 = vld [vmem:[#allocation12 + $0xc0] sm:$0xf] }
  0xbf   :  { %v6219_v27 = vadd.f32 %v325_v24, %v161_v13  ;;  %v5632_v13 = vld [vmem:[#allocation11 + $0x26c] sm:$0xf]  ;;  %v4114_v5 = vld [vmem:[#allocation11 + $0x138] sm:$0xf0]  ;;  %v5677_v11 = vld [vmem:[#allocation12 + $0xcc] sm:$0xf0] }
  0xc0   :  { %v6223_v29 = vpack.c.bf16 %v6215_v23, %v6213_v22  ;;  %v4277_v20 = vor.u32 %v5632_v13, %v4274_v14  ;;  %v5564_v24 = vld [vmem:[#allocation11 + $0x4c] sm:$0xf]  ;;  %v4117_v13 = vor.u32 %v5592_v4, %v4114_v5  ;;  %v5709_v14 = vld [vmem:[#allocation12 + $0x1cc] sm:$0xf0]  ;;  %v4441_v19 = vor.u32 %v5677_v11, %v4440_v10  ;;  %v5659_v10 = vld [vmem:[#allocation12 + $0x44] sm:$0xf] }
  0xc1   :  { %v6227_v35 = vpack.c.bf16 %v6219_v27, %v6217_v25  ;;  %v4397_v5 = vor.u32 %v5663_v62, %v4394_v63  ;;  %v4378_v11 = vld [vmem:[#allocation12 + $0x50] sm:$0xf0]  ;;  %v5739_v63 = vld [vmem:[#allocation12 + $0x2c4] sm:$0xf] }
  0xc2   :  { %945 = vmatmul.bf16.vlgmr.msra.gmra.mxu3 %v6223_v29  ;;  %987 = vmatmul.bf16.vlgmr.msrb.gmra.mxu2 %v6223_v29 }
  0xc3   :  { %959 = vmatmul.bf16.vlgmr.msrb.gmra.mxu0 %v6227_v35  ;;  %1049 = vmatpush.bf16.msra.mxu3 %v4337_v28  ;;  %v4165_v28 = vor.u32 %v5604_v15, %v4162_v16  ;;  %v5675_v15 = vld [vmem:[#allocation12 + $0xc4] sm:$0xf]  ;;  %v4442_v16 = vld [vmem:[#allocation12 + $0xd0] sm:$0xf0] }
  0xc4   :  { %1063 = vmatpush.bf16.msrb.mxu0 %v4085_v30  ;;  %1091 = vmatpush.bf16.msrb.mxu2 %v4341_v31  ;;  %v5628_v30 = vld [vmem:[#allocation11 + $0x24c] sm:$0xf]  ;;  %v4258_v31 = vld [vmem:[#allocation11 + $0x258] sm:$0xf0] }
  0xc5   :  { %v339_v42 = vpop.f32.mrf.mxu2  ;;  %v4261_v38 = vor.u32 %v5628_v30, %v4258_v31  ;;  %v5673_v30 = vld [vmem:[#allocation12 + $0xac] sm:$0xf0]  ;;  %v4552_v31 = vld [vmem:[#allocation12 + $0x1a0] sm:$0xf] }
  0xc6   :  { %v6234_v49 = vadd.f32 %v339_v42, %v162_v26  ;;  %v4002_v26 = vld [vmem:[#allocation11 + $0x58] sm:$0xf0]  ;;  %v4149_v42 = vor.u32 %v5600_v32, %v4146_v33  ;;  %v5705_v33 = vld [vmem:[#allocation12 + $0x1ac] sm:$0xf0] }
  0xc7   :  { %1050 = vmatpush.bf16.msra.mxu3 %v4321_v39  ;;  %v4005_v36 = vor.u32 %v5564_v24, %v4002_v26  ;;  %v5626_v39 = vld [vmem:[#allocation11 + $0x234] sm:$0xf0]  ;;  %v4445_v26 = vor.u32 %v5675_v15, %v4442_v16  ;;  %v4553_v41 = vor.u32 %v5705_v33, %v4552_v31  ;;  %v5729_v15 = vld [vmem:[#allocation12 + $0x26c] sm:$0xf0]  ;;  %v4344_v33 = vld [vmem:[#allocation12] sm:$0xf] }
  0xc8   :  { %v6238_v54 = vpack.c.bf16 %v6234_v49, %v6232_v48  ;;  %1064 = vmatpush.bf16.msrb.mxu0 %v4069_v43  ;;  %1092 = vmatpush.bf16.msrb.mxu2 %v4325_v44  ;;  %v5624_v43 = vld [vmem:[#allocation11 + $0x22c] sm:$0xf]  ;;  %v4242_v44 = vld [vmem:[#allocation11 + $0x238] sm:$0xf0]  ;;  %v4241_v47 = vor.u32 %v5626_v39, %v4240_v37  ;;  %v4696_v39 = vld [vmem:[#allocation12 + $0x2c0] sm:$0xf] }
  0xca   :  { %973 = vmatmul.bf16.vlgmr.msrb.gmra.mxu1 %v6238_v54 }
  0xcb   :  { %1077 = vmatpush.bf16.msrb.mxu1 %v4213_v53  ;;  %1051 = vmatpush.bf16.msra.mxu3 %v4305_v55  ;;  %v5556_v53 = vld [vmem:[#allocation11 + $0xc] sm:$0xf]  ;;  %v4245_v55 = vor.u32 %v5624_v43, %v4242_v44  ;;  %v4408_v43 = vld [vmem:[#allocation12 + $0x80] sm:$0xf]  ;;  %v5669_v44 = vld [vmem:[#allocation12 + $0x8c] sm:$0xf0] }
  0xcc   :  { %1065 = vmatpush.bf16.msrb.mxu0 %v4053_v58  ;;  %1093 = vmatpush.bf16.msrb.mxu2 %v4309_v59  ;;  %v4226_v58 = vld [vmem:[#allocation11 + $0x218] sm:$0xf0]  ;;  %v4133_v59 = vor.u32 %v5596_v45, %v4130_v46  ;;  %v4536_v45 = vld [vmem:[#allocation12 + $0x180] sm:$0xf]  ;;  %v5701_v46 = vld [vmem:[#allocation12 + $0x18c] sm:$0xf0] }
  0xcf   :  { %1078 = vmatpush.bf16.msrb.mxu1 %v4197_v2  ;;  %1052 = vmatpush.bf16.msra.mxu3 %v4289_v3  ;;  %v4225_v2 = vor.u32 %v5622_v52, %v4224_v51  ;;  %v3973_v3 = vor.u32 %v5556_v53, %v3970_v56  ;;  %v4697_v51 = vor.u32 %v5741_v40, %v4696_v39  ;;  %v4680_v53 = vld [vmem:[#allocation12 + $0x2a0] sm:$0xf]  ;;  %v5685_v39 = vld [vmem:[#allocation12 + $0x10c] sm:$0xf0]  ;;  %v5651_v40 = vld [vmem:[#allocation12 + $0x4] sm:$0xf] }
  0xd0   :  { %1066 = vmatpush.bf16.msrb.mxu0 %v4037_v6  ;;  %1094 = vmatpush.bf16.msrb.mxu2 %v4293_v7  ;;  %v4229_v6 = vor.u32 %v5620_v57, %v4226_v58  ;;  %v4457_v7 = vor.u32 %v5681_v61, %v4456_v60  ;;  %v4409_v52 = vor.u32 %v5669_v44, %v4408_v43  ;;  %v4392_v58 = vld [vmem:[#allocation12 + $0x60] sm:$0xf]  ;;  %v5697_v61 = vld [vmem:[#allocation12 + $0x16c] sm:$0xf0]  ;;  %v4586_v43 = vld [vmem:[#allocation12 + $0x1f0] sm:$0xf0] }
  0xd1   :  { %v4537_v56 = vor.u32 %v5701_v46, %v4536_v45  ;;  %v4520_v60 = vld [vmem:[#allocation12 + $0x160] sm:$0xf]  ;;  %v5743_v45 = vld [vmem:[#allocation12 + $0x2e4] sm:$0xf]  ;;  %v4714_v46 = vld [vmem:[#allocation12 + $0x2f0] sm:$0xf0] }
  0xd2   :  { %1001 = vmatmul.bf16.vlgmr.msrb.gmra.mxu3 %v6227_v35  ;;  %1043 = vmatmul.bf16.vlgmr.msra.gmra.mxu2 %v6227_v35  ;;  %v4521_v4 = vor.u32 %v5697_v61, %v4520_v60  ;;  %v4570_v60 = vld [vmem:[#allocation12 + $0x1d0] sm:$0xf0] }
  0xd3   :  { %1079 = vmatpush.bf16.msrb.mxu1 %v4181_v12  ;;  %1015 = vmatmul.bf16.vlgmr.msra.gmra.mxu0 %v6238_v54  ;;  %v4568_v12 = vld [vmem:[#allocation12 + $0x1c0] sm:$0xf] }
  0xd4   :  { %1053 = vmatpush.bf16.msra.mxu3 %v4273_v17  ;;  %1067 = vmatpush.bf16.msrb.mxu0 %v4021_v18  ;;  %v5588_v17 = vld [vmem:[#allocation11 + $0x10c] sm:$0xf]  ;;  %v4098_v18 = vld [vmem:[#allocation11 + $0x118] sm:$0xf0]  ;;  %v4569_v24 = vor.u32 %v5709_v14, %v4568_v12  ;;  %v4648_v14 = vld [vmem:[#allocation12 + $0x260] sm:$0xf] }
  0xd5   :  { %1095 = vmatpush.bf16.msrb.mxu2 %v4277_v20  ;;  %v4712_v20 = vld [vmem:[#allocation12 + $0x2e0] sm:$0xf]  ;;  %v4101_v32 = vor.u32 %v5588_v17, %v4098_v18  ;;  %v4381_v17 = vor.u32 %v5659_v10, %v4378_v11  ;;  %v5703_v11 = vld [vmem:[#allocation12 + $0x1a4] sm:$0xf] }
  0xd6   :  { %v4713_v37 = vor.u32 %v5745_v21, %v4712_v20  ;;  %v4360_v18 = vld [vmem:[#allocation12 + $0x20] sm:$0xf]  ;;  %v5689_v21 = vld [vmem:[#allocation12 + $0x12c] sm:$0xf0] }
  0xd7   :  { %1080 = vmatpush.bf16.msrb.mxu1 %v4165_v28  ;;  %v4424_v28 = vld [vmem:[#allocation12 + $0xa0] sm:$0xf] }
  0xd8   :  { %1054 = vmatpush.bf16.msra.mxu3 %v4257_v34  ;;  %1068 = vmatpush.bf16.msrb.mxu0 %v4005_v36  ;;  %v5671_v34 = vld [vmem:[#allocation12 + $0xa4] sm:$0xf]  ;;  %v4426_v36 = vld [vmem:[#allocation12 + $0xb0] sm:$0xf0]  ;;  %v4488_v20 = vld [vmem:[#allocation12 + $0x120] sm:$0xf] }
  0xd9   :  { %1096 = vmatpush.bf16.msrb.mxu2 %v4261_v38  ;;  %v4425_v38 = vor.u32 %v5673_v30, %v4424_v28  ;;  %v4649_v28 = vor.u32 %v5729_v15, %v4648_v14  ;;  %v4632_v30 = vld [vmem:[#allocation12 + $0x240] sm:$0xf]  ;;  %v4682_v15 = vld [vmem:[#allocation12 + $0x2b0] sm:$0xf0] }
  0xda   :  { %1029 = vmatmul.bf16.vlgmr.msra.gmra.mxu1 %v6223_v29 }
  0xdb   :  { %1081 = vmatpush.bf16.msrb.mxu1 %v4149_v42  ;;  %v4429_v42 = vor.u32 %v5671_v34, %v4426_v36  ;;  %v5653_v34 = vld [vmem:[#allocation12 + $0xc] sm:$0xf0]  ;;  %v4489_v36 = vor.u32 %v5689_v21, %v4488_v20 }
  0xdc   :  { %1055 = vmatpush.bf16.msra.mxu3 %v4241_v47  ;;  %1069 = vmatpush.bf16.msrb.mxu0 %v3989_v50  ;;  %v5667_v47 = vld [vmem:[#allocation12 + $0x84] sm:$0xf]  ;;  %v4410_v50 = vld [vmem:[#allocation12 + $0x90] sm:$0xf0] }
  0xdd   :  { %1097 = vmatpush.bf16.msrb.mxu2 %v4245_v55  ;;  %v5737_v55 = vld [vmem:[#allocation12 + $0x2ac] sm:$0xf0]  ;;  %v4413_v57 = vor.u32 %v5667_v47, %v4410_v50  ;;  %v4592_v47 = vld [vmem:[#allocation12 + $0x1e8] sm:$0xf]  ;;  %v4345_v50 = vor.u32 %v5653_v34, %v4344_v33  ;;  %v5702_v34 = vld [vmem:[#allocation12 + $0x194] sm:$0xf0] }
  0xde   :  { %v4681_v0 = vor.u32 %v5737_v55, %v4680_v53  ;;  %v5721_v53 = vld [vmem:[#allocation12 + $0x22c] sm:$0xf0]  ;;  %v4544_v33 = vld [vmem:[#allocation12 + $0x188] sm:$0xf] }
  0xdf   :  { %1082 = vmatpush.bf16.msrb.mxu1 %v4133_v59  ;;  %v5665_v59 = vld [vmem:[#allocation12 + $0x6c] sm:$0xf0] }
  0xe0   :  { %1056 = vmatpush.bf16.msra.mxu3 %v4225_v2  ;;  %1070 = vmatpush.bf16.msrb.mxu0 %v3973_v3  ;;  %v4393_v1 = vor.u32 %v5665_v59, %v4392_v58  ;;  %v4664_v2 = vld [vmem:[#allocation12 + $0x280] sm:$0xf]  ;;  %v5733_v3 = vld [vmem:[#allocation12 + $0x28c] sm:$0xf0]  ;;  %v4717_v58 = vor.u32 %v5743_v45, %v4714_v46  ;;  %v5707_v59 = vld [vmem:[#allocation12 + $0x1c4] sm:$0xf] }
  0xe1   :  { %1098 = vmatpush.bf16.msrb.mxu2 %v4229_v6  ;;  %v4376_v6 = vld [vmem:[#allocation12 + $0x40] sm:$0xf]  ;;  %v4665_v12 = vor.u32 %v5733_v3, %v4664_v2  ;;  %v5710_v2 = vld [vmem:[#allocation12 + $0x1d4] sm:$0xf0]  ;;  %v4650_v45 = vld [vmem:[#allocation12 + $0x270] sm:$0xf0] }
  0xe2   :  { %v4600_v3 = vld [vmem:[#allocation12 + $0x200] sm:$0xf]  ;;  %v4528_v46 = vld [vmem:[#allocation12 + $0x168] sm:$0xf] }
  0xe3   :  { %1083 = vmatpush.bf16.msrb.mxu1 %v4117_v13  ;;  %1057 = vmatmul.bf16.vlgmr.msra.gmra.mxu3 %v6238_v54 }
  0xe4   :  { %1699 = vmatpush.bf16.msrb.mxu3 %v4457_v7  ;;  %1713 = vmatpush.bf16.msra.mxu0 %v4585_v8  ;;  %v5661_v7 = vld [vmem:[#allocation12 + $0x4c] sm:$0xf0]  ;;  %v4504_v8 = vld [vmem:[#allocation12 + $0x140] sm:$0xf] }
  0xe5   :  { %1741 = vmatpush.bf16.msra.mxu2 %v4461_v9  ;;  %1071 = vmatmul.bf16.vlgmr.msrb.gmra.mxu0 %v6223_v29  ;;  %v5693_v9 = vld [vmem:[#allocation12 + $0x14c] sm:$0xf0]  ;;  %v4377_v13 = vor.u32 %v5661_v7, %v4376_v6  ;;  %v5682_v6 = vld [vmem:[#allocation12 + $0xf4] sm:$0xf0]  ;;  %v4573_v7 = vor.u32 %v5707_v59, %v4570_v60  ;;  %v4634_v60 = vld [vmem:[#allocation12 + $0x250] sm:$0xf0] }
  0xe6   :  { %1099 = vmatmul.bf16.vlgmr.msrb.gmra.mxu2 %v6238_v54  ;;  %v4505_v16 = vor.u32 %v5693_v9, %v4504_v8 }
  0xe7   :  { %1084 = vmatpush.bf16.msrb.mxu1 %v4101_v32  ;;  %v5725_v32 = vld [vmem:[#allocation12 + $0x24c] sm:$0xf0] }
  0xe8   :  { %1700 = vmatpush.bf16.msrb.mxu3 %v4441_v19  ;;  %1714 = vmatpush.bf16.msra.mxu0 %v4569_v24  ;;  %v5657_v19 = vld [vmem:[#allocation12 + $0x2c] sm:$0xf0]  ;;  %v5655_v24 = vld [vmem:[#allocation12 + $0x24] sm:$0xf]  ;;  %v4633_v44 = vor.u32 %v5725_v32, %v4632_v30  ;;  %v4666_v32 = vld [vmem:[#allocation12 + $0x290] sm:$0xf0] }
  0xe9   :  { %1742 = vmatpush.bf16.msra.mxu2 %v4445_v26  ;;  %v4362_v26 = vld [vmem:[#allocation12 + $0x30] sm:$0xf0]  ;;  %v4361_v31 = vor.u32 %v5657_v19, %v4360_v18  ;;  %v4448_v18 = vld [vmem:[#allocation12 + $0xc8] sm:$0xf]  ;;  %v5678_v19 = vld [vmem:[#allocation12 + $0xd4] sm:$0xf0] }
  0xea   :  { %1085 = vmatmul.bf16.vlgmr.msrb.gmra.mxu1 %v6227_v35  ;;  %v5731_v30 = vld [vmem:[#allocation12 + $0x284] sm:$0xf] }
  0xeb   :  { %1727 = vmatpush.bf16.msra.mxu1 %v4713_v37  ;;  %v4365_v37 = vor.u32 %v5655_v24, %v4362_v26  ;;  %v5699_v26 = vld [vmem:[#allocation12 + $0x184] sm:$0xf] }
  0xec   :  { %1701 = vmatpush.bf16.msrb.mxu3 %v4425_v38  ;;  %1715 = vmatpush.bf16.msra.mxu0 %v4553_v41  ;;  %v4472_v38 = vld [vmem:[#allocation12 + $0x100] sm:$0xf]  ;;  %v4346_v41 = vld [vmem:[#allocation12 + $0x10] sm:$0xf0] }
  0xed   :  { %1743 = vmatpush.bf16.msra.mxu2 %v4429_v42  ;;  %v5711_v42 = vld [vmem:[#allocation12 + $0x1e4] sm:$0xf]  ;;  %v4473_v55 = vor.u32 %v5685_v39, %v4472_v38  ;;  %v4669_v39 = vor.u32 %v5731_v30, %v4666_v32  ;;  %v5680_v30 = vld [vmem:[#allocation12 + $0xec] sm:$0xf] }
  0xee   :  { %v5744_v32 = vld [vmem:[#allocation12 + $0x2ec] sm:$0xf] }
  0xef   :  { %1728 = vmatpush.bf16.msra.mxu1 %v4697_v51  ;;  %v5714_v51 = vld [vmem:[#allocation12 + $0x1f4] sm:$0xf0] }
  0xf0   :  { %1702 = vmatpush.bf16.msrb.mxu3 %v4409_v52  ;;  %1716 = vmatpush.bf16.msra.mxu0 %v4537_v56  ;;  %v4616_v52 = vld [vmem:[#allocation12 + $0x220] sm:$0xf]  ;;  %v4349_v56 = vor.u32 %v5651_v40, %v4346_v41  ;;  %v4593_v61 = vor.u32 %v5714_v51, %v4592_v47  ;;  %v4545_v40 = vor.u32 %v5702_v34, %v4544_v33  ;;  %v5695_v41 = vld [vmem:[#allocation12 + $0x164] sm:$0xf]  ;;  %v5698_v47 = vld [vmem:[#allocation12 + $0x174] sm:$0xf0] }
  0xf1   :  { %1744 = vmatpush.bf16.msra.mxu2 %v4413_v57  ;;  %v4589_v57 = vor.u32 %v5711_v42, %v4586_v43  ;;  %v4617_v62 = vor.u32 %v5721_v53, %v4616_v52  ;;  %v4522_v42 = vld [vmem:[#allocation12 + $0x170] sm:$0xf0]  ;;  %v5727_v43 = vld [vmem:[#allocation12 + $0x264] sm:$0xf]  ;;  %v5670_v51 = vld [vmem:[#allocation12 + $0x94] sm:$0xf0] }
  0xf2   :  { %v4525_v52 = vor.u32 %v5695_v41, %v4522_v42  ;;  %v4653_v53 = vor.u32 %v5727_v43, %v4650_v45  ;;  %v4722_v34 = vld [vmem:[#allocation12 + $0x2f8] sm:$0xf0]  ;;  %v4704_v42 = vld [vmem:[#allocation12 + $0x2c8] sm:$0xf]  ;;  %v5742_v43 = vld [vmem:[#allocation12 + $0x2d4] sm:$0xf0] }
  0xf3   :  { %1729 = vmatpush.bf16.msra.mxu1 %v4681_v0  ;;  %v4698_v0 = vld [vmem:[#allocation12 + $0x2d0] sm:$0xf0] }
  0xf4   :  { %1703 = vmatpush.bf16.msrb.mxu3 %v4393_v1  ;;  %1717 = vmatpush.bf16.msra.mxu0 %v4521_v4  ;;  %v4576_v1 = vld [vmem:[#allocation12 + $0x1c8] sm:$0xf]  ;;  %v5717_v4 = vld [vmem:[#allocation12 + $0x20c] sm:$0xf0]  ;;  %v4701_v8 = vor.u32 %v5739_v63, %v4698_v0  ;;  %v5666_v0 = vld [vmem:[#allocation12 + $0x74] sm:$0xf0] }
  0xf5   :  { %1745 = vmatpush.bf16.msra.mxu2 %v4397_v5  ;;  %v4464_v5 = vld [vmem:[#allocation12 + $0xe8] sm:$0xf]  ;;  %v4577_v9 = vor.u32 %v5710_v2, %v4576_v1  ;;  %v4601_v10 = vor.u32 %v5717_v4, %v4600_v3  ;;  %v5687_v4 = vld [vmem:[#allocation12 + $0x124] sm:$0xf] }
  0xf6   :  { %v4465_v14 = vor.u32 %v5682_v6, %v4464_v5  ;;  %v4400_v63 = vld [vmem:[#allocation12 + $0x68] sm:$0xf]  ;;  %v4490_v5 = vld [vmem:[#allocation12 + $0x130] sm:$0xf0]  ;;  %v5719_v6 = vld [vmem:[#allocation12 + $0x224] sm:$0xf] }
  0xf7   :  { %1730 = vmatpush.bf16.msra.mxu1 %v4665_v12  ;;  %v4554_v12 = vld [vmem:[#allocation12 + $0x1b0] sm:$0xf0] }
  0xf8   :  { %1704 = vmatpush.bf16.msrb.mxu3 %v4377_v13  ;;  %1718 = vmatpush.bf16.msra.mxu0 %v4505_v16  ;;  %v5735_v13 = vld [vmem:[#allocation12 + $0x2a4] sm:$0xf]  ;;  %v4560_v16 = vld [vmem:[#allocation12 + $0x1a8] sm:$0xf]  ;;  %v4557_v20 = vor.u32 %v5703_v11, %v4554_v12  ;;  %v5662_v12 = vld [vmem:[#allocation12 + $0x54] sm:$0xf0] }
  0xf9   :  { %1746 = vmatpush.bf16.msra.mxu2 %v4381_v17  ;;  %v5706_v17 = vld [vmem:[#allocation12 + $0x1b4] sm:$0xf0]  ;;  %v4685_v21 = vor.u32 %v5735_v13, %v4682_v15  ;;  %v4384_v11 = vld [vmem:[#allocation12 + $0x48] sm:$0xf]  ;;  %v4493_v13 = vor.u32 %v5687_v4, %v4490_v5  ;;  %v4474_v15 = vld [vmem:[#allocation12 + $0x110] sm:$0xf0] }
  0xfa   :  { %v4561_v24 = vor.u32 %v5706_v17, %v4560_v16  ;;  %v5708_v4 = vld [vmem:[#allocation12 + $0x1cc] sm:$0xf]  ;;  %v4578_v5 = vld [vmem:[#allocation12 + $0x1d8] sm:$0xf0] }
  0xfb   :  { %1731 = vmatpush.bf16.msra.mxu1 %v4649_v28  ;;  %v4538_v28 = vld [vmem:[#allocation12 + $0x190] sm:$0xf0] }
  0xfc   :  { %1705 = vmatpush.bf16.msrb.mxu3 %v4361_v31  ;;  %1719 = vmatpush.bf16.msra.mxu0 %v4489_v36  ;;  %v4449_v31 = vor.u32 %v5678_v19, %v4448_v18  ;;  %v4432_v36 = vld [vmem:[#allocation12 + $0xa8] sm:$0xf]  ;;  %v4541_v38 = vor.u32 %v5699_v26, %v4538_v28  ;;  %v5715_v18 = vld [vmem:[#allocation12 + $0x204] sm:$0xf]  ;;  %v4602_v19 = vld [vmem:[#allocation12 + $0x210] sm:$0xf0] }
  0xfd   :  { %1747 = vmatpush.bf16.msra.mxu2 %v4365_v37  ;;  %v5674_v37 = vld [vmem:[#allocation12 + $0xb4] sm:$0xf0]  ;;  %v4720_v26 = vld [vmem:[#allocation12 + $0x2e8] sm:$0xf] }
  0xfe   :  { %v5746_v28 = vld [vmem:[#allocation12 + $0x2f4] sm:$0xf0] }
  0xff   :  { %1732 = vmatpush.bf16.msra.mxu1 %v4633_v44  ;;  %v4433_v44 = vor.u32 %v5674_v37, %v4432_v36  ;;  %v4368_v36 = vld [vmem:[#allocation12 + $0x28] sm:$0xf]  ;;  %v5658_v37 = vld [vmem:[#allocation12 + $0x34] sm:$0xf0] }
 0x100   :  { %1706 = vmatpush.bf16.msrb.mxu3 %v4345_v50  ;;  %1720 = vmatpush.bf16.msra.mxu0 %v4473_v55  ;;  %v4416_v50 = vld [vmem:[#allocation12 + $0x88] sm:$0xf]  ;;  %v4529_v55 = vor.u32 %v5698_v47, %v4528_v46  ;;  %v4369_v45 = vor.u32 %v5658_v37, %v4368_v36  ;;  %v5676_v46 = vld [vmem:[#allocation12 + $0xcc] sm:$0xf]  ;;  %v4450_v47 = vld [vmem:[#allocation12 + $0xd8] sm:$0xf0] }
 0x101   :  { %1748 = vmatpush.bf16.msra.mxu2 %v4349_v56  ;;  %v5691_v56 = vld [vmem:[#allocation12 + $0x144] sm:$0xf]  ;;  %v4417_v59 = vor.u32 %v5670_v51, %v4416_v50  ;;  %v5740_v50 = vld [vmem:[#allocation12 + $0x2cc] sm:$0xf]  ;;  %v4706_v51 = vld [vmem:[#allocation12 + $0x2d8] sm:$0xf0] }
 0x103   :  { %1733 = vmatpush.bf16.msra.mxu1 %v4617_v62  ;;  %1707 = vmatmul.bf16.vlgmr.msrb.gmra.mxu3 %v6223_v29  ;;  %v5694_v62 = vld [vmem:[#allocation12 + $0x154] sm:$0xf0] }
 0x104   :  { %1755 = vmatpush.bf16.msra.mxu3 %v4589_v57  ;;  %1769 = vmatpush.bf16.msrb.mxu0 %v4717_v58  ;;  %v4506_v57 = vld [vmem:[#allocation12 + $0x150] sm:$0xf0]  ;;  %v5723_v58 = vld [vmem:[#allocation12 + $0x244] sm:$0xf] }
 0x105   :  { %1797 = vmatpush.bf16.msrb.mxu2 %v4593_v61  ;;  %1721 = vmatmul.bf16.vlgmr.msra.gmra.mxu0 %v6227_v35  ;;  %v4512_v61 = vld [vmem:[#allocation12 + $0x148] sm:$0xf]  ;;  %v4509_v1 = vor.u32 %v5691_v56, %v4506_v57  ;;  %v4637_v2 = vor.u32 %v5723_v58, %v4634_v60  ;;  %v4594_v56 = vld [vmem:[#allocation12 + $0x1f8] sm:$0xf0]  ;;  %v4705_v57 = vor.u32 %v5742_v43, %v4704_v42 }
 0x106   :  { %1749 = vmatmul.bf16.vlgmr.msra.gmra.mxu2 %v6223_v29  ;;  %v4513_v3 = vor.u32 %v5694_v62, %v4512_v61  ;;  %v4453_v58 = vor.u32 %v5676_v46, %v4450_v47  ;;  %v4688_v61 = vld [vmem:[#allocation12 + $0x2a8] sm:$0xf]  ;;  %v5738_v62 = vld [vmem:[#allocation12 + $0x2b4] sm:$0xf0]  ;;  %v4386_v43 = vld [vmem:[#allocation12 + $0x58] sm:$0xf0] }
 0x107   :  { %1734 = vmatpush.bf16.msra.mxu1 %v4601_v10  ;;  %v5690_v10 = vld [vmem:[#allocation12 + $0x134] sm:$0xf0]  ;;  %v5696_v46 = vld [vmem:[#allocation12 + $0x16c] sm:$0xf]  ;;  %v4530_v47 = vld [vmem:[#allocation12 + $0x178] sm:$0xf0] }
 0x108   :  { %1756 = vmatpush.bf16.msra.mxu3 %v4573_v7  ;;  %1770 = vmatpush.bf16.msrb.mxu0 %v4701_v8  ;;  %v4401_v7 = vor.u32 %v5666_v0, %v4400_v63  ;;  %v4618_v8 = vld [vmem:[#allocation12 + $0x230] sm:$0xf0]  ;;  %v5672_v63 = vld [vmem:[#allocation12 + $0xac] sm:$0xf] }
 0x109   :  { %1798 = vmatpush.bf16.msrb.mxu2 %v4577_v9  ;;  %v4496_v9 = vld [vmem:[#allocation12 + $0x128] sm:$0xf]  ;;  %v4621_v16 = vor.u32 %v5719_v6, %v4618_v8  ;;  %v4689_v6 = vor.u32 %v5738_v62, %v4688_v61  ;;  %v5692_v61 = vld [vmem:[#allocation12 + $0x14c] sm:$0xf]  ;;  %v4514_v62 = vld [vmem:[#allocation12 + $0x158] sm:$0xf0] }
 0x10a   :  { %1735 = vmatmul.bf16.vlgmr.msra.gmra.mxu1 %v6238_v54  ;;  %v4497_v17 = vor.u32 %v5690_v10, %v4496_v9  ;;  %v4672_v9 = vld [vmem:[#allocation12 + $0x288] sm:$0xf]  ;;  %v5734_v10 = vld [vmem:[#allocation12 + $0x294] sm:$0xf0] }
 0x10b   :  { %1783 = vmatpush.bf16.msrb.mxu1 %v4465_v14  ;;  %v5683_v14 = vld [vmem:[#allocation12 + $0x104] sm:$0xf] }
 0x10c   :  { %1757 = vmatpush.bf16.msra.mxu3 %v4557_v20  ;;  %1771 = vmatpush.bf16.msrb.mxu0 %v4685_v21  ;;  %v4480_v20 = vld [vmem:[#allocation12 + $0x108] sm:$0xf]  ;;  %v4385_v21 = vor.u32 %v5662_v12, %v4384_v11  ;;  %v4477_v33 = vor.u32 %v5683_v14, %v4474_v15  ;;  %v5668_v11 = vld [vmem:[#allocation12 + $0x8c] sm:$0xf]  ;;  %v4581_v12 = vor.u32 %v5708_v4, %v4578_v5  ;;  %v4674_v15 = vld [vmem:[#allocation12 + $0x298] sm:$0xf0] }
 0x10d   :  { %1799 = vmatpush.bf16.msrb.mxu2 %v4561_v24  ;;  %v5686_v24 = vld [vmem:[#allocation12 + $0x114] sm:$0xf0]  ;;  %v5732_v14 = vld [vmem:[#allocation12 + $0x28c] sm:$0xf]  ;;  %v4354_v5 = vld [vmem:[#allocation12 + $0x18] sm:$0xf0] }
 0x10e   :  { %v5652_v4 = vld [vmem:[#allocation12 + $0xc] sm:$0xf] }
 0x10f   :  { %1784 = vmatpush.bf16.msrb.mxu1 %v4449_v31  ;;  %v4466_v31 = vld [vmem:[#allocation12 + $0xf8] sm:$0xf0] }
 0x110   :  { %1758 = vmatpush.bf16.msra.mxu3 %v4541_v38  ;;  %1772 = vmatpush.bf16.msrb.mxu0 %v4669_v39  ;;  %v4605_v38 = vor.u32 %v5715_v18, %v4602_v19  ;;  %v4481_v39 = vor.u32 %v5686_v24, %v4480_v20  ;;  %v4469_v41 = vor.u32 %v5680_v30, %v4466_v31  ;;  %v5730_v24 = vld [vmem:[#allocation12 + $0x274] sm:$0xf0]  ;;  %v4402_v30 = vld [vmem:[#allocation12 + $0x78] sm:$0xf0]  ;;  %v5728_v31 = vld [vmem:[#allocation12 + $0x26c] sm:$0xf] }
 0x111   :  { %1800 = vmatpush.bf16.msrb.mxu2 %v4545_v40  ;;  %v4721_v40 = vor.u32 %v5746_v28, %v4720_v26  ;;  %v4673_v18 = vor.u32 %v5734_v10, %v4672_v9  ;;  %v4677_v20 = vor.u32 %v5732_v14, %v4674_v15  ;;  %v5664_v26 = vld [vmem:[#allocation12 + $0x6c] sm:$0xf]  ;;  %v4840_v9 = vld [vmem:[#allocation9 + $0xe0] sm:$0xf]  ;;  %v5777_v10 = vld [vmem:[#allocation9 + $0xec] sm:$0xf0] }
 0x112   :  { %v4405_v37 = vor.u32 %v5664_v26, %v4402_v30  ;;  %v4842_v15 = vld [vmem:[#allocation9 + $0xf0] sm:$0xf0]  ;;  %v5773_v26 = vld [vmem:[#allocation9 + $0xcc] sm:$0xf0] }
 0x113   :  { %1785 = vmatpush.bf16.msrb.mxu1 %v4433_v44  ;;  %v4725_v44 = vor.u32 %v5744_v32, %v4722_v34  ;;  %v4658_v32 = vld [vmem:[#allocation12 + $0x278] sm:$0xf0] }
 0x114   :  { %1759 = vmatpush.bf16.msra.mxu3 %v4525_v52  ;;  %1773 = vmatpush.bf16.msrb.mxu0 %v4653_v53  ;;  %v4352_v52 = vld [vmem:[#allocation12 + $0x8] sm:$0xf]  ;;  %v5654_v53 = vld [vmem:[#allocation12 + $0x14] sm:$0xf0]  ;;  %v4546_v34 = vld [vmem:[#allocation12 + $0x198] sm:$0xf0] }
 0x115   :  { %1801 = vmatpush.bf16.msrb.mxu2 %v4529_v55  ;;  %v5712_v55 = vld [vmem:[#allocation12 + $0x1ec] sm:$0xf]  ;;  %v4353_v60 = vor.u32 %v5654_v53, %v4352_v52  ;;  %v4624_v53 = vld [vmem:[#allocation12 + $0x228] sm:$0xf] }
 0x116   :  { %v4597_v0 = vor.u32 %v5712_v55, %v4594_v56  ;;  %v5722_v55 = vld [vmem:[#allocation12 + $0x234] sm:$0xf0]  ;;  %v5656_v56 = vld [vmem:[#allocation12 + $0x2c] sm:$0xf] }
 0x117   :  { %1786 = vmatpush.bf16.msrb.mxu1 %v4417_v59  ;;  %v4709_v59 = vor.u32 %v5740_v50, %v4706_v51 }
 0x118   :  { %1760 = vmatpush.bf16.msra.mxu3 %v4509_v1  ;;  %1774 = vmatpush.bf16.msrb.mxu0 %v4637_v2  ;;  %v4434_v1 = vld [vmem:[#allocation12 + $0xb8] sm:$0xf0]  ;;  %v5736_v2 = vld [vmem:[#allocation12 + $0x2ac] sm:$0xf] }
 0x119   :  { %1802 = vmatpush.bf16.msrb.mxu2 %v4513_v3  ;;  %v4690_v3 = vld [vmem:[#allocation12 + $0x2b8] sm:$0xf0] }
 0x11a   :  { %v4693_v8 = vor.u32 %v5736_v2, %v4690_v3 }
 0x11b   :  { %1787 = vmatpush.bf16.msrb.mxu1 %v4401_v7  ;;  %v4437_v7 = vor.u32 %v5672_v63, %v4434_v1  ;;  %v4625_v63 = vor.u32 %v5722_v55, %v4624_v53  ;;  %v5718_v1 = vld [vmem:[#allocation12 + $0x214] sm:$0xf0]  ;;  %v5080_v53 = vld [vmem:[#allocation9 + $0x2c0] sm:$0xf]  ;;  %v5837_v55 = vld [vmem:[#allocation9 + $0x2cc] sm:$0xf0] }
 0x11c   :  { %1761 = vmatpush.bf16.msra.mxu3 %v4493_v13  ;;  %1775 = vmatpush.bf16.msrb.mxu0 %v4621_v16  ;;  %v4418_v13 = vld [vmem:[#allocation12 + $0x98] sm:$0xf0]  ;;  %v5704_v16 = vld [vmem:[#allocation12 + $0x1ac] sm:$0xf] }
 0x11d   :  { %1803 = vmatpush.bf16.msrb.mxu2 %v4497_v17  ;;  %v4562_v17 = vld [vmem:[#allocation12 + $0x1b8] sm:$0xf0]  ;;  %v4421_v19 = vor.u32 %v5668_v11, %v4418_v13  ;;  %v4968_v11 = vld [vmem:[#allocation9 + $0x1e0] sm:$0xf]  ;;  %v5775_v13 = vld [vmem:[#allocation9 + $0xe4] sm:$0xf] }
 0x11e   :  { %v4565_v28 = vor.u32 %v5704_v16, %v4562_v17  ;;  %v5688_v16 = vld [vmem:[#allocation12 + $0x12c] sm:$0xf]  ;;  %v4498_v17 = vld [vmem:[#allocation12 + $0x138] sm:$0xf0] }
 0x11f   :  { %1788 = vmatpush.bf16.msrb.mxu1 %v4385_v21  ;;  %v4656_v21 = vld [vmem:[#allocation12 + $0x268] sm:$0xf]  ;;  %v4501_v30 = vor.u32 %v5688_v16, %v4498_v17  ;;  %v4778_v16 = vld [vmem:[#allocation9 + $0x70] sm:$0xf0] }
 0x120   :  { %1762 = vmatpush.bf16.msra.mxu3 %v4477_v33  ;;  %1776 = vmatpush.bf16.msrb.mxu0 %v4605_v38  ;;  %v5700_v33 = vld [vmem:[#allocation12 + $0x18c] sm:$0xf]  ;;  %v4657_v36 = vor.u32 %v5730_v24, %v4656_v21  ;;  %v4661_v38 = vor.u32 %v5728_v31, %v4658_v32  ;;  %v4824_v24 = vld [vmem:[#allocation9 + $0xc0] sm:$0xf]  ;;  %v5805_v32 = vld [vmem:[#allocation9 + $0x1cc] sm:$0xf0] }
 0x121   :  { %1804 = vmatpush.bf16.msrb.mxu2 %v4481_v39  ;;  %v4640_v39 = vld [vmem:[#allocation12 + $0x248] sm:$0xf]  ;;  %v4549_v42 = vor.u32 %v5700_v33, %v4546_v34  ;;  %v4952_v31 = vld [vmem:[#allocation9 + $0x1c0] sm:$0xf]  ;;  %v5771_v33 = vld [vmem:[#allocation9 + $0xc4] sm:$0xf] }
 0x122   :  { %v4826_v34 = vld [vmem:[#allocation9 + $0xd0] sm:$0xf0] }
 0x123   :  { %1789 = vmatpush.bf16.msrb.mxu1 %v4369_v45  ;;  %1763 = vmatmul.bf16.vlgmr.msra.gmra.mxu3 %v6227_v35  ;;  %v4642_v45 = vld [vmem:[#allocation12 + $0x258] sm:$0xf0] }
 0x124   :  { %1811 = vmatpush.bf16.msrb.mxu3 %v4721_v40  ;;  %1825 = vmatpush.bf16.msra.mxu0 %v4469_v41  ;;  %v5726_v40 = vld [vmem:[#allocation12 + $0x254] sm:$0xf0]  ;;  %v5660_v41 = vld [vmem:[#allocation12 + $0x4c] sm:$0xf] }
 0x125   :  { %1853 = vmatpush.bf16.msra.mxu2 %v4725_v44  ;;  %1777 = vmatmul.bf16.vlgmr.msrb.gmra.mxu0 %v6238_v54  ;;  %v5724_v44 = vld [vmem:[#allocation12 + $0x24c] sm:$0xf]  ;;  %v4641_v50 = vor.u32 %v5726_v40, %v4640_v39  ;;  %v4389_v51 = vor.u32 %v5660_v41, %v4386_v43  ;;  %v5841_v39 = vld [vmem:[#allocation9 + $0x2ec] sm:$0xf0]  ;;  %v4825_v40 = vor.u32 %v5773_v26, %v4824_v24 }
 0x126   :  { %1805 = vmatmul.bf16.vlgmr.msrb.gmra.mxu2 %v6227_v35  ;;  %v4645_v52 = vor.u32 %v5724_v44, %v4642_v45  ;;  %v4953_v41 = vor.u32 %v5805_v32, %v4952_v31  ;;  %v4808_v44 = vld [vmem:[#allocation9 + $0xa0] sm:$0xf]  ;;  %v5769_v45 = vld [vmem:[#allocation9 + $0xac] sm:$0xf0] }
 0x127   :  { %1790 = vmatpush.bf16.msrb.mxu1 %v4353_v60  ;;  %v4626_v60 = vld [vmem:[#allocation12 + $0x238] sm:$0xf0]  ;;  %v5757_v31 = vld [vmem:[#allocation9 + $0x4c] sm:$0xf0]  ;;  %v4888_v32 = vld [vmem:[#allocation9 + $0x140] sm:$0xf] }
 0x128   :  { %1812 = vmatpush.bf16.msrb.mxu3 %v4705_v57  ;;  %1826 = vmatpush.bf16.msra.mxu0 %v4453_v58  ;;  %v4533_v57 = vor.u32 %v5696_v46, %v4530_v47  ;;  %v4370_v58 = vld [vmem:[#allocation12 + $0x38] sm:$0xf0]  ;;  %v4936_v46 = vld [vmem:[#allocation9 + $0x1a0] sm:$0xf] }
 0x129   :  { %1854 = vmatpush.bf16.msra.mxu2 %v4709_v59  ;;  %v5720_v59 = vld [vmem:[#allocation12 + $0x22c] sm:$0xf]  ;;  %v4373_v2 = vor.u32 %v5656_v56, %v4370_v58  ;;  %v4809_v56 = vor.u32 %v5769_v45, %v4808_v44  ;;  %v4744_v44 = vld [vmem:[#allocation9 + $0x20] sm:$0xf]  ;;  %v5753_v45 = vld [vmem:[#allocation9 + $0x2c] sm:$0xf0] }
 0x12a   :  { %1791 = vmatmul.bf16.vlgmr.msrb.gmra.mxu1 %v6223_v29  ;;  %v4629_v3 = vor.u32 %v5720_v59, %v4626_v60  ;;  %v4792_v60 = vld [vmem:[#allocation9 + $0x80] sm:$0xf] }
 0x12b   :  { %1839 = vmatpush.bf16.msra.mxu1 %v4597_v0  ;;  %v4608_v0 = vld [vmem:[#allocation12 + $0x208] sm:$0xf] }
 0x12c   :  { %1813 = vmatpush.bf16.msrb.mxu3 %v4689_v6  ;;  %1827 = vmatpush.bf16.msra.mxu0 %v4437_v7  ;;  %v5716_v6 = vld [vmem:[#allocation12 + $0x20c] sm:$0xf]  ;;  %v4517_v7 = vor.u32 %v5692_v61, %v4514_v62  ;;  %v4609_v14 = vor.u32 %v5718_v1, %v4608_v0  ;;  %v5765_v61 = vld [vmem:[#allocation9 + $0x8c] sm:$0xf0]  ;;  %v4920_v62 = vld [vmem:[#allocation9 + $0x180] sm:$0xf] }
 0x12d   :  { %1855 = vmatpush.bf16.msra.mxu2 %v4693_v8  ;;  %v4610_v8 = vld [vmem:[#allocation12 + $0x218] sm:$0xf0]  ;;  %v5797_v0 = vld [vmem:[#allocation9 + $0x18c] sm:$0xf0]  ;;  %v5763_v1 = vld [vmem:[#allocation9 + $0x84] sm:$0xf] }
 0x12f   :  { %1840 = vmatpush.bf16.msra.mxu1 %v4581_v12  ;;  %v5809_v12 = vld [vmem:[#allocation9 + $0x1ec] sm:$0xf0] }
 0x130   :  { %1814 = vmatpush.bf16.msrb.mxu3 %v4673_v18  ;;  %1828 = vmatpush.bf16.msra.mxu0 %v4421_v19  ;;  %v4357_v18 = vor.u32 %v5652_v4, %v4354_v5  ;;  %v4613_v19 = vor.u32 %v5716_v6, %v4610_v8  ;;  %v4969_v21 = vor.u32 %v5809_v12, %v4968_v11  ;;  %v5833_v4 = vld [vmem:[#allocation9 + $0x2ac] sm:$0xf0]  ;;  %v4776_v8 = vld [vmem:[#allocation9 + $0x60] sm:$0xf] }
 0x131   :  { %1856 = vmatpush.bf16.msra.mxu2 %v4677_v20  ;;  %v4841_v20 = vor.u32 %v5777_v10, %v4840_v9  ;;  %v4793_v5 = vor.u32 %v5765_v61, %v4792_v60  ;;  %v4921_v6 = vor.u32 %v5797_v0, %v4920_v62  ;;  %v5761_v9 = vld [vmem:[#allocation9 + $0x6c] sm:$0xf0]  ;;  %v4904_v10 = vld [vmem:[#allocation9 + $0x160] sm:$0xf]  ;;  %v4745_v61 = vor.u32 %v5753_v45, %v4744_v44  ;;  %v4960_v44 = vld [vmem:[#allocation9 + $0x1c8] sm:$0xf] }
 0x132   :  { %v4728_v62 = vld [vmem:[#allocation9] sm:$0xf] }
 0x133   :  { %1841 = vmatpush.bf16.msra.mxu1 %v4565_v28  ;;  %v4845_v28 = vor.u32 %v5775_v13, %v4842_v15  ;;  %v5759_v15 = vld [vmem:[#allocation9 + $0x64] sm:$0xf]  ;;  %v4984_v45 = vld [vmem:[#allocation9 + $0x200] sm:$0xf] }
 0x134   :  { %1815 = vmatpush.bf16.msrb.mxu3 %v4657_v36  ;;  %1829 = vmatpush.bf16.msra.mxu0 %v4405_v37  ;;  %v5684_v36 = vld [vmem:[#allocation12 + $0x10c] sm:$0xf]  ;;  %v4482_v37 = vld [vmem:[#allocation12 + $0x118] sm:$0xf0]  ;;  %v4781_v26 = vor.u32 %v5759_v15, %v4778_v16  ;;  %v4976_v15 = vld [vmem:[#allocation9 + $0x1e8] sm:$0xf] }
 0x135   :  { %1857 = vmatpush.bf16.msra.mxu2 %v4661_v38  ;;  %v5096_v38 = vld [vmem:[#allocation9 + $0x2e0] sm:$0xf]  ;;  %v4485_v43 = vor.u32 %v5684_v36, %v4482_v37  ;;  %v5755_v36 = vld [vmem:[#allocation9 + $0x44] sm:$0xf]  ;;  %v4762_v37 = vld [vmem:[#allocation9 + $0x50] sm:$0xf0] }
 0x136   :  { %v5097_v47 = vor.u32 %v5841_v39, %v5096_v38  ;;  %v5032_v38 = vld [vmem:[#allocation9 + $0x260] sm:$0xf]  ;;  %v5825_v39 = vld [vmem:[#allocation9 + $0x26c] sm:$0xf0] }
 0x137   :  { %1842 = vmatpush.bf16.msra.mxu1 %v4549_v42  ;;  %v4829_v42 = vor.u32 %v5771_v33, %v4826_v34  ;;  %v5789_v34 = vld [vmem:[#allocation9 + $0x14c] sm:$0xf0] }
 0x138   :  { %1816 = vmatpush.bf16.msrb.mxu3 %v4641_v50  ;;  %1830 = vmatpush.bf16.msra.mxu0 %v4389_v51  ;;  %v5801_v50 = vld [vmem:[#allocation9 + $0x1ac] sm:$0xf0]  ;;  %v5767_v51 = vld [vmem:[#allocation9 + $0xa4] sm:$0xf] }
 0x139   :  { %1858 = vmatpush.bf16.msra.mxu2 %v4645_v52  ;;  %v4810_v52 = vld [vmem:[#allocation9 + $0xb0] sm:$0xf0] }
 0x13a   :  { %v4813_v58 = vor.u32 %v5767_v51, %v4810_v52  ;;  %v5785_v52 = vld [vmem:[#allocation9 + $0x12c] sm:$0xf0] }
 0x13b   :  { %1843 = vmatpush.bf16.msra.mxu1 %v4533_v57  ;;  %v4937_v57 = vor.u32 %v5801_v50, %v4936_v46  ;;  %v4872_v46 = vld [vmem:[#allocation9 + $0x120] sm:$0xf] }
 0x13c   :  { %1817 = vmatpush.bf16.msrb.mxu3 %v4625_v63  ;;  %1831 = vmatpush.bf16.msra.mxu0 %v4373_v2  ;;  %v5081_v63 = vor.u32 %v5837_v55, %v5080_v53  ;;  %v4794_v2 = vld [vmem:[#allocation9 + $0x90] sm:$0xf0]  ;;  %v5751_v53 = vld [vmem:[#allocation9 + $0x24] sm:$0xf] }
 0x13d   :  { %1859 = vmatpush.bf16.msra.mxu2 %v4629_v3  ;;  %v5064_v3 = vld [vmem:[#allocation9 + $0x2a0] sm:$0xf]  ;;  %v4746_v55 = vld [vmem:[#allocation9 + $0x30] sm:$0xf0] }
 0x13e   :  { %v5065_v11 = vor.u32 %v5833_v4, %v5064_v3  ;;  %v4856_v4 = vld [vmem:[#allocation9 + $0x100] sm:$0xf] }
 0x13f   :  { %1844 = vmatpush.bf16.msra.mxu1 %v4517_v7  ;;  %v4797_v7 = vor.u32 %v5763_v1, %v4794_v2  ;;  %v4873_v1 = vor.u32 %v5785_v52, %v4872_v46  ;;  %v4749_v2 = vor.u32 %v5751_v53, %v4746_v55  ;;  %v5813_v46 = vld [vmem:[#allocation9 + $0x20c] sm:$0xf0] }
 0x140   :  { %1818 = vmatpush.bf16.msrb.mxu3 %v4609_v14  ;;  %1832 = vmatpush.bf16.msra.mxu0 %v4357_v18  ;;  %v6260_v59 = vpop.f32.mrf.mxu0  ;;  %v5793_v14 = vld [vmem:[#allocation9 + $0x16c] sm:$0xf0]  ;;  %v5048_v18 = vld [vmem:[#allocation9 + $0x280] sm:$0xf] }
 0x141   :  { %1860 = vmatpush.bf16.msra.mxu2 %v4613_v19  ;;  %v5829_v19 = vld [vmem:[#allocation9 + $0x28c] sm:$0xf0]  ;;  %v4905_v24 = vor.u32 %v5793_v14, %v4904_v10  ;;  %v4970_v10 = vld [vmem:[#allocation9 + $0x1f0] sm:$0xf0] }
 0x142   :  { %v5049_v33 = vor.u32 %v5829_v19, %v5048_v18  ;;  %v5098_v14 = vld [vmem:[#allocation9 + $0x2f0] sm:$0xf0]  ;;  %v5000_v19 = vld [vmem:[#allocation9 + $0x220] sm:$0xf] }
 0x143   :  { %1845 = vmatpush.bf16.msra.mxu1 %v4501_v30  ;;  %1819 = vmatmul.bf16.vlgmr.msrb.gmra.mxu3 %v6238_v54  ;;  %v4760_v30 = vld [vmem:[#allocation9 + $0x40] sm:$0xf] }
 0x144   :  { %2476 = vmatpush.bf16.msra.mxu3 %v4841_v20  ;;  %2490 = vmatpush.bf16.msrb.mxu0 %v4969_v21  ;;  %v6270_v20 = vld [vmem:[%s6448_s7] sm:$0xf]  ;;  %v4777_v21 = vor.u32 %v5761_v9, %v4776_v8  ;;  %v4730_v8 = vld [vmem:[#allocation9 + $0x10] sm:$0xf0]  ;;  %v5807_v9 = vld [vmem:[#allocation9 + $0x1e4] sm:$0xf] }
 0x145   :  { %2518 = vmatpush.bf16.msrb.mxu2 %v4845_v28  ;;  %1833 = vmatmul.bf16.vlgmr.msra.gmra.mxu0 %v6223_v29  ;;  %v946_v12 = vpop.f32.mrf.mxu3  ;;  %v6263_v13 = vpop.f32.mrf.mxu2  ;;  %v450_v60 = vperm.slane %v6270_v20, 1 }
 0x146   :  { %1861 = vmatmul.bf16.vlgmr.msra.gmra.mxu2 %v6238_v54 }
 0x147   :  { %1846 = vmatpush.bf16.msra.mxu1 %v4485_v43  ;;  %v6265_v17 = vpop.f32.mrf.mxu1  ;;  %v4765_v43 = vor.u32 %v5755_v36, %v4762_v37  ;;  %v4954_v36 = vld [vmem:[#allocation9 + $0x1d0] sm:$0xf0] }
 0x148   :  { %2477 = vmatpush.bf16.msra.mxu3 %v4825_v40  ;;  %2491 = vmatpush.bf16.msrb.mxu0 %v4953_v41  ;;  %v6272_v28 = vpop.f32.mrf.mxu0  ;;  %v449_v40 = vperm.slane %v6270_v20, 0  ;;  %v4761_v41 = vor.u32 %v5757_v31, %v4760_v30  ;;  %v4973_v31 = vor.u32 %v5807_v9, %v4970_v10  ;;  %v5774_v9 = vld [vmem:[#allocation9 + $0xd4] sm:$0xf0] }
 0x149   :  { %2519 = vmatpush.bf16.msrb.mxu2 %v4829_v42  ;;  %v4889_v42 = vor.u32 %v5789_v34, %v4888_v32  ;;  %v5803_v34 = vld [vmem:[#allocation9 + $0x1c4] sm:$0xf] }
 0x14a   :  { %1847 = vmatmul.bf16.vlgmr.msra.gmra.mxu1 %v6227_v35  ;;  %v947_v0 = vadd.f32 %v946_v12, %v449_v40  ;;  %v5810_v12 = vld [vmem:[#allocation9 + $0x1f4] sm:$0xf0] }
 0x14b   :  { %2504 = vmatpush.bf16.msrb.mxu1 %v5097_v47  ;;  %v5033_v47 = vor.u32 %v5825_v39, %v5032_v38  ;;  %v4977_v37 = vor.u32 %v5810_v12, %v4976_v15  ;;  %v5795_v12 = vld [vmem:[#allocation9 + $0x184] sm:$0xf] }
 0x14c   :  { %2478 = vmatpush.bf16.msra.mxu3 %v4809_v56  ;;  %2492 = vmatpush.bf16.msrb.mxu0 %v4937_v57  ;;  %v5016_v57 = vld [vmem:[#allocation9 + $0x240] sm:$0xf] }
 0x14d   :  { %2520 = vmatpush.bf16.msrb.mxu2 %v4813_v58  ;;  %v948_v50 = vpop.f32.mrf.mxu3  ;;  %v6275_v51 = vpop.f32.mrf.mxu2  ;;  %v5821_v58 = vld [vmem:[#allocation9 + $0x24c] sm:$0xf0] }
 0x14e   :  { %v949_v52 = vadd.f32 %v948_v50, %v449_v40  ;;  %v5066_v50 = vld [vmem:[#allocation9 + $0x2b0] sm:$0xf0] }
 0x14f   :  { %2505 = vmatpush.bf16.msrb.mxu1 %v5081_v63  ;;  %v6277_v56 = vpop.f32.mrf.mxu1  ;;  %v5749_v63 = vld [vmem:[#allocation9 + $0xc] sm:$0xf0] }
 0x150   :  { %2479 = vmatpush.bf16.msra.mxu3 %v4793_v5  ;;  %2493 = vmatpush.bf16.msrb.mxu0 %v4921_v6  ;;  %v1016_v3 = vpop.f32.mrf.mxu0  ;;  %v5781_v5 = vld [vmem:[#allocation9 + $0x10c] sm:$0xf0]  ;;  %v5747_v6 = vld [vmem:[#allocation9 + $0x4] sm:$0xf]  ;;  %v4729_v16 = vor.u32 %v5749_v63, %v4728_v62 }
 0x151   :  { %2521 = vmatpush.bf16.msrb.mxu2 %v4797_v7  ;;  %v5017_v7 = vor.u32 %v5821_v58, %v5016_v57  ;;  %v4857_v18 = vor.u32 %v5781_v5, %v4856_v4  ;;  %v4733_v30 = vor.u32 %v5747_v6, %v4730_v8  ;;  %v4848_v57 = vld [vmem:[#allocation9 + $0xe8] sm:$0xf]  ;;  %v5778_v58 = vld [vmem:[#allocation9 + $0xf4] sm:$0xf0]  ;;  %v5831_v4 = vld [vmem:[#allocation9 + $0x2a4] sm:$0xf]  ;;  %v963_v6 = vadd.f32 %v6272_v28, %v949_v52 }
 0x152   :  { %v4849_v40 = vor.u32 %v5778_v58, %v4848_v57  ;;  %v5802_v5 = vld [vmem:[#allocation9 + $0x1b4] sm:$0xf0]  ;;  %v4832_v8 = vld [vmem:[#allocation9 + $0xc8] sm:$0xf] }
 0x153   :  { %2506 = vmatpush.bf16.msrb.mxu1 %v5065_v11  ;;  %v5839_v11 = vld [vmem:[#allocation9 + $0x2e4] sm:$0xf]  ;;  %v5794_v52 = vld [vmem:[#allocation9 + $0x174] sm:$0xf0] }
 0x154   :  { %2480 = vmatpush.bf16.msra.mxu3 %v4777_v21  ;;  %2494 = vmatpush.bf16.msrb.mxu0 %v4905_v24  ;;  %v5817_v21 = vld [vmem:[#allocation9 + $0x22c] sm:$0xf0]  ;;  %v961_v24 = vadd.f32 %v6260_v59, %v947_v0  ;;  %v5101_v32 = vor.u32 %v5839_v11, %v5098_v14  ;;  %v5835_v59 = vld [vmem:[#allocation9 + $0x2c4] sm:$0xf]  ;;  %v5069_v14 = vor.u32 %v5831_v4, %v5066_v50  ;;  %v4896_v50 = vld [vmem:[#allocation9 + $0x148] sm:$0xf] }
 0x155   :  { %2522 = vmatpush.bf16.msrb.mxu2 %v4781_v26  ;;  %v989_v26 = vadd.f32 %v6263_v13, %v450_v60  ;;  %v5001_v38 = vor.u32 %v5817_v21, %v5000_v19  ;;  %v5806_v13 = vld [vmem:[#allocation9 + $0x1d4] sm:$0xf0]  ;;  %v4833_v19 = vor.u32 %v5774_v9, %v4832_v8  ;;  %v5050_v21 = vld [vmem:[#allocation9 + $0x290] sm:$0xf0] }
 0x156   :  { %v4961_v0 = vor.u32 %v5806_v13, %v4960_v44  ;;  %v5791_v44 = vld [vmem:[#allocation9 + $0x164] sm:$0xf]  ;;  %v4906_v13 = vld [vmem:[#allocation9 + $0x170] sm:$0xf0] }
 0x157   :  { %2507 = vmatpush.bf16.msrb.mxu1 %v5049_v33  ;;  %v1002_v33 = vpop.f32.mrf.mxu3  ;;  %v4909_v58 = vor.u32 %v5791_v44, %v4906_v13  ;;  %v4986_v13 = vld [vmem:[#allocation9 + $0x210] sm:$0xf0] }
 0x158   :  { %2481 = vmatpush.bf16.msra.mxu3 %v4761_v41  ;;  %2495 = vmatpush.bf16.msrb.mxu0 %v4889_v42  ;;  %v1003_v39 = vadd.f32 %v1002_v33, %v989_v26  ;;  %v6286_v41 = vpop.f32.mrf.mxu1  ;;  %v6288_v42 = vpop.f32.mrf.mxu2  ;;  %v5798_v26 = vld [vmem:[#allocation9 + $0x194] sm:$0xf0] }
 0x159   :  { %2523 = vmatpush.bf16.msrb.mxu2 %v4765_v43  ;;  %v5082_v43 = vld [vmem:[#allocation9 + $0x2d0] sm:$0xf0]  ;;  %v1018_v55 = vpop.f32.mrf.mxu0  ;;  %v5770_v33 = vld [vmem:[#allocation9 + $0xb4] sm:$0xf0] }
 0x15a   :  { %v1017_v53 = vadd.f32 %v1016_v3, %v1003_v39  ;;  %v5085_v62 = vor.u32 %v5835_v59, %v5082_v43  ;;  %v4944_v3 = vld [vmem:[#allocation9 + $0x1a8] sm:$0xf] }
 0x15b   :  { %2508 = vmatpush.bf16.msrb.mxu1 %v5033_v47  ;;  %v975_v47 = vadd.f32 %v6265_v17, %v961_v24  ;;  %v4938_v17 = vld [vmem:[#allocation9 + $0x1b0] sm:$0xf0]  ;;  %v4945_v15 = vor.u32 %v5802_v5, %v4944_v3  ;;  %v4928_v24 = vld [vmem:[#allocation9 + $0x188] sm:$0xf]  ;;  %v5790_v3 = vld [vmem:[#allocation9 + $0x154] sm:$0xf0] }
 0x15c   :  { %2482 = vmatpush.bf16.msra.mxu3 %v4745_v61  ;;  %2496 = vmatpush.bf16.msrb.mxu0 %v4873_v1  ;;  %v4957_v61 = vor.u32 %v5803_v34, %v4954_v36  ;;  %v4985_v1 = vor.u32 %v5813_v46, %v4984_v45  ;;  %v451_v34 = vperm.slane %v6270_v20, 2  ;;  %v452_v36 = vperm.slane %v6270_v20, 3  ;;  %v5034_v46 = vld [vmem:[#allocation9 + $0x270] sm:$0xf0] }
 0x15d   :  { %2524 = vmatpush.bf16.msrb.mxu2 %v4749_v2  ;;  %v1105_v63 = vpack.c.bf16 %v1017_v53, %v975_v47  ;;  %v5799_v2 = vld [vmem:[#allocation9 + $0x1a4] sm:$0xf]  ;;  %v4929_v43 = vor.u32 %v5798_v26, %v4928_v24  ;;  %v4912_v47 = vld [vmem:[#allocation9 + $0x168] sm:$0xf]  ;;  %v5786_v26 = vld [vmem:[#allocation9 + $0x134] sm:$0xf0] }
 0x15e   :  { %v4941_v10 = vor.u32 %v5799_v2, %v4938_v17  ;;  %v4800_v53 = vld [vmem:[#allocation9 + $0x88] sm:$0xf]  ;;  %v1031_v57 = vadd.f32 %v6286_v41, %v451_v34  ;;  %v5819_v2 = vld [vmem:[#allocation9 + $0x244] sm:$0xf] }
 0x15f   :  { %2509 = vmatpush.bf16.msrb.mxu1 %v5017_v7  ;;  %v991_v7 = vadd.f32 %v6275_v51, %v450_v60  ;;  %1109 = vst [vmem:[#allocation3] sm:$0xff] %v1105_v63  ;;  %v1004_v11 = vpop.f32.mrf.mxu3  ;;  %v4922_v51 = vld [vmem:[#allocation9 + $0x190] sm:$0xf0]  ;;  %v5827_v60 = vld [vmem:[#allocation9 + $0x284] sm:$0xf] }
 0x160   :  { %2483 = vmatpush.bf16.msra.mxu3 %v4729_v16  ;;  %2497 = vmatpush.bf16.msrb.mxu0 %v4857_v18  ;;  %v6300_v18 = vpop.f32.mrf.mxu1  ;;  %v6302_v28 = vpop.f32.mrf.mxu2  ;;  %v5053_v59 = vor.u32 %v5827_v60, %v5050_v21  ;;  %v1045_v8 = vadd.f32 %v6288_v42, %v1031_v57  ;;  %v5002_v21 = vld [vmem:[#allocation9 + $0x230] sm:$0xf0]  ;;  %v4880_v24 = vld [vmem:[#allocation9 + $0x128] sm:$0xf]  ;;  %v5758_v42 = vld [vmem:[#allocation9 + $0x54] sm:$0xf0] }
 0x161   :  { %2525 = vmatpush.bf16.msrb.mxu2 %v4733_v30  ;;  %v1005_v16 = vadd.f32 %v1004_v11, %v991_v7  ;;  %v977_v30 = vadd.f32 %v6277_v56, %v963_v6  ;;  %v5823_v56 = vld [vmem:[#allocation9 + $0x264] sm:$0xf]  ;;  %v4784_v6 = vld [vmem:[#allocation9 + $0x68] sm:$0xf]  ;;  %v5762_v7 = vld [vmem:[#allocation9 + $0x74] sm:$0xf0]  ;;  %v4881_v44 = vor.u32 %v5786_v26, %v4880_v24 }
 0x162   :  { %v1072_v39 = vpop.f32.mrf.mxu0  ;;  %v4850_v57 = vld [vmem:[#allocation9 + $0xf8] sm:$0xf0]  ;;  %v5072_v24 = vld [vmem:[#allocation9 + $0x2a8] sm:$0xf]  ;;  %v5834_v26 = vld [vmem:[#allocation9 + $0x2b4] sm:$0xf0] }
 0x163   :  { %2510 = vmatpush.bf16.msrb.mxu1 %v5001_v38  ;;  %2484 = vmatmul.bf16.vlgmr.msra.gmra.mxu3 %v6223_v29  ;;  %v1073_v17 = vadd.f32 %v1072_v39, %v452_v36  ;;  %v4858_v39 = vld [vmem:[#allocation9 + $0x110] sm:$0xf0] }
 0x164   :  { %2532 = vmatpush.bf16.msrb.mxu3 %v4973_v31  ;;  %2546 = vmatpush.bf16.msra.mxu0 %v5101_v32  ;;  %v1019_v31 = vadd.f32 %v1018_v55, %v1005_v16  ;;  %v4816_v32 = vld [vmem:[#allocation9 + $0xa8] sm:$0xf]  ;;  %v5766_v55 = vld [vmem:[#allocation9 + $0x94] sm:$0xf0]  ;;  %v4874_v16 = vld [vmem:[#allocation9 + $0x130] sm:$0xf0] }
 0x165   :  { %2574 = vmatpush.bf16.msra.mxu2 %v4977_v37  ;;  %2498 = vmatmul.bf16.vlgmr.msrb.gmra.mxu0 %v6227_v35  ;;  %v4925_v37 = vor.u32 %v5795_v12, %v4922_v51  ;;  %v4817_v45 = vor.u32 %v5770_v33, %v4816_v32  ;;  %v4801_v4 = vor.u32 %v5766_v55, %v4800_v53  ;;  %v5815_v12 = vld [vmem:[#allocation9 + $0x224] sm:$0xf]  ;;  %v5776_v55 = vld [vmem:[#allocation9 + $0xec] sm:$0xf] }
 0x166   :  { %2526 = vmatmul.bf16.vlgmr.msrb.gmra.mxu2 %v6223_v29  ;;  %v1107_v38 = vpack.c.bf16 %v1019_v31, %v977_v30  ;;  %v4768_v31 = vld [vmem:[#allocation9 + $0x48] sm:$0xf]  ;;  %v1033_v32 = vadd.f32 %v6300_v18, %v451_v34  ;;  %v5842_v34 = vld [vmem:[#allocation9 + $0x2f4] sm:$0xf0] }
 0x167   :  { %2511 = vmatpush.bf16.msrb.mxu1 %v4985_v1  ;;  %v1058_v63 = vpop.f32.mrf.mxu3  ;;  %v4890_v1 = vld [vmem:[#allocation9 + $0x150] sm:$0xf0]  ;;  %v5104_v18 = vld [vmem:[#allocation9 + $0x2e8] sm:$0xf] }
 0x168   :  { %2533 = vmatpush.bf16.msrb.mxu3 %v4957_v61  ;;  %2547 = vmatpush.bf16.msra.mxu0 %v5085_v62  ;;  %1111 = vst [vmem:[#allocation3 + $0x10] sm:$0xff] %v1107_v38  ;;  %v5037_v61 = vor.u32 %v5823_v56, %v5034_v46  ;;  %v4913_v62 = vor.u32 %v5794_v52, %v4912_v47  ;;  %v1086_v5 = vpop.f32.mrf.mxu1  ;;  %v5779_v38 = vld [vmem:[#allocation9 + $0x104] sm:$0xf]  ;;  %v4864_v56 = vld [vmem:[#allocation9 + $0x108] sm:$0xf] }
 0x169   :  { %2575 = vmatpush.bf16.msra.mxu2 %v4961_v0  ;;  %v5787_v0 = vld [vmem:[#allocation9 + $0x144] sm:$0xf]  ;;  %v1100_v41 = vpop.f32.mrf.mxu2  ;;  %v1087_v9 = vadd.f32 %v1086_v5, %v1073_v17  ;;  %v1059_v51 = vadd.f32 %v1058_v63, %v1045_v8  ;;  %v4769_v47 = vor.u32 %v5758_v42, %v4768_v31  ;;  %v4861_v63 = vor.u32 %v5779_v38, %v4858_v39  ;;  %v5088_v5 = vld [vmem:[#allocation9 + $0x2c8] sm:$0xf]  ;;  %v4834_v8 = vld [vmem:[#allocation9 + $0xd8] sm:$0xf0] }
 0x16a   :  { %2512 = vmatmul.bf16.vlgmr.msrb.gmra.mxu1 %v6238_v54  ;;  %v1074_v30 = vpop.f32.mrf.mxu0  ;;  %v4818_v42 = vld [vmem:[#allocation9 + $0xb8] sm:$0xf0]  ;;  %v5073_v39 = vor.u32 %v5834_v26, %v5072_v24  ;;  %v5788_v24 = vld [vmem:[#allocation9 + $0x14c] sm:$0xf] }
 0x16b   :  { %2560 = vmatpush.bf16.msra.mxu1 %v4849_v40  ;;  %v5018_v40 = vld [vmem:[#allocation9 + $0x250] sm:$0xf0]  ;;  %v1101_v60 = vadd.f32 %v1100_v41, %v1087_v9  ;;  %v1075_v46 = vadd.f32 %v1074_v30, %v452_v36  ;;  %v5838_v41 = vld [vmem:[#allocation9 + $0x2d4] sm:$0xf0]  ;;  %v5836_v9 = vld [vmem:[#allocation9 + $0x2cc] sm:$0xf] }
 0x16c   :  { %2534 = vmatpush.bf16.msrb.mxu3 %v4941_v10  ;;  %2548 = vmatpush.bf16.msra.mxu0 %v5069_v14  ;;  %v4893_v10 = vor.u32 %v5787_v0, %v4890_v1  ;;  %v5021_v11 = vor.u32 %v5819_v2, %v5018_v40  ;;  %v4897_v14 = vor.u32 %v5790_v3, %v4896_v50  ;;  %v5106_v0 = vld [vmem:[#allocation9 + $0x2f8] sm:$0xf0]  ;;  %v4752_v1 = vld [vmem:[#allocation9 + $0x28] sm:$0xf]  ;;  %v5754_v2 = vld [vmem:[#allocation9 + $0x34] sm:$0xf0] }
 0x16d   :  { %2576 = vmatpush.bf16.msra.mxu2 %v4945_v15  ;;  %v5783_v15 = vld [vmem:[#allocation9 + $0x124] sm:$0xf]  ;;  %v1106_v33 = vpack.c.bf16 %v1101_v60, %v1059_v51  ;;  %v5105_v50 = vor.u32 %v5842_v34, %v5104_v18  ;;  %v4853_v3 = vor.u32 %v5776_v55, %v4850_v57  ;;  %v5089_v51 = vor.u32 %v5838_v41, %v5088_v5  ;;  %v5768_v30 = vld [vmem:[#allocation9 + $0xac] sm:$0xf]  ;;  %v4962_v38 = vld [vmem:[#allocation9 + $0x1d8] sm:$0xf0] }
 0x16e   :  { %v5058_v18 = vld [vmem:[#allocation9 + $0x298] sm:$0xf0]  ;;  %v5800_v34 = vld [vmem:[#allocation9 + $0x1ac] sm:$0xf] }
 0x16f   :  { %2561 = vmatpush.bf16.msra.mxu1 %v4833_v19  ;;  %v4785_v19 = vor.u32 %v5762_v7, %v4784_v6  ;;  %1110 = vst [vmem:[#allocation3 + $0x8] sm:$0xff] %v1106_v33  ;;  %v1060_v52 = vpop.f32.mrf.mxu3  ;;  %v5772_v7 = vld [vmem:[#allocation9 + $0xcc] sm:$0xf]  ;;  %v5074_v33 = vld [vmem:[#allocation9 + $0x2b8] sm:$0xf0] }
 0x170   :  { %2535 = vmatpush.bf16.msrb.mxu3 %v4925_v37  ;;  %2549 = vmatpush.bf16.msra.mxu0 %v5053_v59  ;;  %v4877_v37 = vor.u32 %v5783_v15, %v4874_v16  ;;  %v5811_v59 = vld [vmem:[#allocation9 + $0x204] sm:$0xf]  ;;  %v1088_v53 = vpop.f32.mrf.mxu1  ;;  %v5750_v15 = vld [vmem:[#allocation9 + $0x14] sm:$0xf0]  ;;  %v5808_v16 = vld [vmem:[#allocation9 + $0x1ec] sm:$0xf]  ;;  %v4837_v60 = vor.u32 %v5772_v7, %v4834_v8 }
 0x171   :  { %2577 = vmatpush.bf16.msra.mxu2 %v4929_v43  ;;  %v5005_v43 = vor.u32 %v5815_v12, %v5002_v21  ;;  %v1102_v20 = vpop.f32.mrf.mxu2  ;;  %v4989_v36 = vor.u32 %v5811_v59, %v4986_v13  ;;  %v4978_v12 = vld [vmem:[#allocation9 + $0x1f8] sm:$0xf0]  ;;  %v4821_v59 = vor.u32 %v5768_v30, %v4818_v42  ;;  %v5830_v13 = vld [vmem:[#allocation9 + $0x294] sm:$0xf0]  ;;  %v5756_v5 = vld [vmem:[#allocation9 + $0x4c] sm:$0xf] }
 0x172   :  { %v4981_v31 = vor.u32 %v5808_v16, %v4978_v12  ;;  %v5026_v7 = vld [vmem:[#allocation9 + $0x258] sm:$0xf0]  ;;  %v5792_v8 = vld [vmem:[#allocation9 + $0x16c] sm:$0xf]  ;;  %v5818_v16 = vld [vmem:[#allocation9 + $0x234] sm:$0xf0] }
 0x173   :  { %2562 = vmatpush.bf16.msra.mxu1 %v4817_v45  ;;  %v5782_v45 = vld [vmem:[#allocation9 + $0x114] sm:$0xf0]  ;;  %v5752_v12 = vld [vmem:[#allocation9 + $0x2c] sm:$0xf]  ;;  %v4898_v26 = vld [vmem:[#allocation9 + $0x158] sm:$0xf0] }
 0x174   :  { %2536 = vmatpush.bf16.msrb.mxu3 %v4909_v58  ;;  %2550 = vmatpush.bf16.msra.mxu0 %v5037_v61  ;;  %v5840_v58 = vld [vmem:[#allocation9 + $0x2ec] sm:$0xf]  ;;  %v1047_v61 = vadd.f32 %v6302_v28, %v1033_v32  ;;  %v4865_v17 = vor.u32 %v5782_v45, %v4864_v56  ;;  %v4753_v28 = vor.u32 %v5754_v2, %v4752_v1  ;;  %v5042_v2 = vld [vmem:[#allocation9 + $0x278] sm:$0xf0] }
 0x175   :  { %2578 = vmatpush.bf16.msra.mxu2 %v4913_v62  ;;  %v1089_v62 = vadd.f32 %v1088_v53, %v1075_v46  ;;  %v5109_v6 = vor.u32 %v5840_v58, %v5106_v0  ;;  %v5832_v32 = vld [vmem:[#allocation9 + $0x2ac] sm:$0xf]  ;;  %v4802_v46 = vld [vmem:[#allocation9 + $0x98] sm:$0xf0]  ;;  %v5040_v58 = vld [vmem:[#allocation9 + $0x268] sm:$0xf] }
 0x176   :  { %v5764_v56 = vld [vmem:[#allocation9 + $0x8c] sm:$0xf]  ;;  %v4786_v0 = vld [vmem:[#allocation9 + $0x78] sm:$0xf0] }
 0x177   :  { %2563 = vmatpush.bf16.msra.mxu1 %v4801_v4  ;;  %v1061_v4 = vadd.f32 %v1060_v52, %v1047_v61  ;;  %v1103_v40 = vadd.f32 %v1102_v20, %v1089_v62  ;;  %v4946_v52 = vld [vmem:[#allocation9 + $0x1b8] sm:$0xf0]  ;;  %v4805_v55 = vor.u32 %v5764_v56, %v4802_v46  ;;  %v5826_v61 = vld [vmem:[#allocation9 + $0x274] sm:$0xf0]  ;;  %v5760_v62 = vld [vmem:[#allocation9 + $0x6c] sm:$0xf] }
 0x178   :  { %2537 = vmatpush.bf16.msrb.mxu3 %v4893_v10  ;;  %2551 = vmatpush.bf16.msra.mxu0 %v5021_v11  ;;  %v5090_v11 = vld [vmem:[#allocation9 + $0x2d8] sm:$0xf0]  ;;  %v5824_v1 = vld [vmem:[#allocation9 + $0x26c] sm:$0xf] }
 0x179   :  { %2579 = vmatpush.bf16.msra.mxu2 %v4897_v14  ;;  %v1108_v10 = vpack.c.bf16 %v1103_v40, %v1061_v4  ;;  %v4736_v14 = vld [vmem:[#allocation9 + $0x8] sm:$0xf]  ;;  %v5796_v20 = vld [vmem:[#allocation9 + $0x18c] sm:$0xf]  ;;  %v4789_v4 = vor.u32 %v5760_v62, %v4786_v0  ;;  %v5045_v40 = vor.u32 %v5824_v1, %v5042_v2  ;;  %v4882_v56 = vld [vmem:[#allocation9 + $0x138] sm:$0xf0] }
 0x17a   :  { %v4737_v21 = vor.u32 %v5750_v15, %v4736_v14  ;;  %v5008_v15 = vld [vmem:[#allocation9 + $0x228] sm:$0xf]  ;;  %v5780_v1 = vld [vmem:[#allocation9 + $0x10c] sm:$0xf]  ;;  %v4866_v2 = vld [vmem:[#allocation9 + $0x118] sm:$0xf0] }
 0x17b   :  { %2564 = vmatpush.bf16.msra.mxu1 %v4785_v19  ;;  %1112 = vst [vmem:[#allocation3 + $0x18] sm:$0xff] %v1108_v10  ;;  %v5093_v19 = vor.u32 %v5836_v9, %v5090_v11  ;;  %v4914_v9 = vld [vmem:[#allocation9 + $0x178] sm:$0xf0]  ;;  %v5009_v30 = vor.u32 %v5818_v16, %v5008_v15 }
 0x17c   :  { %2538 = vmatpush.bf16.msrb.mxu3 %v4877_v37  ;;  %2552 = vmatpush.bf16.msra.mxu0 %v5005_v43  ;;  %v5804_v37 = vld [vmem:[#allocation9 + $0x1cc] sm:$0xf]  ;;  %v5077_v43 = vor.u32 %v5832_v32, %v5074_v33  ;;  %v4992_v32 = vld [vmem:[#allocation9 + $0x208] sm:$0xf]  ;;  %v5814_v33 = vld [vmem:[#allocation9 + $0x214] sm:$0xf0] }
 0x17d   :  { %2580 = vmatpush.bf16.msra.mxu2 %v4881_v44  ;;  %v5056_v44 = vld [vmem:[#allocation9 + $0x288] sm:$0xf]  ;;  %v4965_v45 = vor.u32 %v5804_v37, %v4962_v38  ;;  %v5748_v37 = vld [vmem:[#allocation9 + $0xc] sm:$0xf]  ;;  %v4901_v38 = vor.u32 %v5788_v24, %v4898_v26 }
 0x17e   :  { %v5057_v53 = vor.u32 %v5830_v13, %v5056_v44  ;;  %v4993_v44 = vor.u32 %v5814_v33, %v4992_v32  ;;  %v5784_v13 = vld [vmem:[#allocation9 + $0x12c] sm:$0xf] }
 0x17f   :  { %2565 = vmatpush.bf16.msra.mxu1 %v4769_v47  ;;  %v5828_v47 = vld [vmem:[#allocation9 + $0x28c] sm:$0xf] }
 0x180   :  { %2539 = vmatpush.bf16.msrb.mxu3 %v4861_v63  ;;  %2553 = vmatpush.bf16.msra.mxu0 %v4989_v36  ;;  %v5061_v57 = vor.u32 %v5828_v47, %v5058_v18  ;;  %v4949_v63 = vor.u32 %v5800_v34, %v4946_v52  ;;  %v4930_v36 = vld [vmem:[#allocation9 + $0x198] sm:$0xf0]  ;;  %v5845_v34 = vld [vmem:[#allocation3 + $0xc] sm:$0xf0]  ;;  %v5119_v52 = vld [vmem:[#allocation3 + $0x10] sm:$0xf0] }
 0x181   :  { %2581 = vmatpush.bf16.msra.mxu2 %v4865_v17  ;;  %v5041_v17 = vor.u32 %v5826_v61, %v5040_v58  ;;  %v4933_v41 = vor.u32 %v5796_v20, %v4930_v36  ;;  %v5130_v58 = vld [vmem:[#allocation3 + $0x8] sm:$0xf]  ;;  %v4885_v61 = vor.u32 %v5784_v13, %v4882_v56  ;;  %v5844_v36 = vld [vmem:[#allocation3 + $0xc] sm:$0xf] }
 0x182   :  { %v5137_v0 = vld [vmem:[#allocation3 + $0x18] sm:$0xf0] }
 0x183   :  { %2566 = vmatpush.bf16.msra.mxu1 %v4753_v28  ;;  %2540 = vmatmul.bf16.vlgmr.msrb.gmra.mxu3 %v6227_v35  ;;  %v5820_v28 = vld [vmem:[#allocation9 + $0x24c] sm:$0xf] }
 0x184   :  { %2588 = vmatpush.bf16.msra.mxu3 %v5105_v50  ;;  %2602 = vmatpush.bf16.msrb.mxu0 %v4853_v3  ;;  %v5024_v50 = vld [vmem:[#allocation9 + $0x248] sm:$0xf]  ;;  %v5822_v3 = vld [vmem:[#allocation9 + $0x254] sm:$0xf0]  ;;  %v5029_v14 = vor.u32 %v5820_v28, %v5026_v7 }
 0x185   :  { %2630 = vmatpush.bf16.msrb.mxu2 %v5109_v6  ;;  %2554 = vmatmul.bf16.vlgmr.msra.gmra.mxu0 %v6238_v54  ;;  %v4770_v6 = vld [vmem:[#allocation9 + $0x58] sm:$0xf0]  ;;  %v5025_v10 = vor.u32 %v5822_v3, %v5024_v50 }
 0x186   :  { %2582 = vmatmul.bf16.vlgmr.msra.gmra.mxu2 %v6227_v35  ;;  %v4773_v11 = vor.u32 %v5756_v5, %v4770_v6  ;;  %v1708_v46 = vpop.f32.mrf.mxu3 }
 0x187   :  { %2567 = vmatpush.bf16.msra.mxu1 %v4737_v21  ;;  %v5010_v21 = vld [vmem:[#allocation9 + $0x238] sm:$0xf0] }
 0x188   :  { %2589 = vmatpush.bf16.msra.mxu3 %v5089_v51  ;;  %2603 = vmatpush.bf16.msrb.mxu0 %v4837_v60  ;;  %v4917_v51 = vor.u32 %v5792_v8, %v4914_v9  ;;  %v4754_v60 = vld [vmem:[#allocation9 + $0x38] sm:$0xf0] }
 0x189   :  { %2631 = vmatpush.bf16.msrb.mxu2 %v5093_v19  ;;  %v5816_v19 = vld [vmem:[#allocation9 + $0x22c] sm:$0xf]  ;;  %v1750_v6 = vpop.f32.mrf.mxu2 }
 0x18a   :  { %2568 = vmatmul.bf16.vlgmr.msra.gmra.mxu1 %v6223_v29  ;;  %v5013_v42 = vor.u32 %v5816_v19, %v5010_v21 }
 0x18b   :  { %2616 = vmatpush.bf16.msrb.mxu1 %v4981_v31  ;;  %v4757_v31 = vor.u32 %v5752_v12, %v4754_v60 }
 0x18c   :  { %2590 = vmatpush.bf16.msra.mxu3 %v5073_v39  ;;  %2604 = vmatpush.bf16.msrb.mxu0 %v4821_v59  ;;  %v4738_v39 = vld [vmem:[#allocation9 + $0x18] sm:$0xf0]  ;;  %v5812_v59 = vld [vmem:[#allocation9 + $0x20c] sm:$0xf] }
 0x18d   :  { %2632 = vmatpush.bf16.msrb.mxu2 %v5077_v43  ;;  %v4994_v43 = vld [vmem:[#allocation9 + $0x218] sm:$0xf0]  ;;  %v4741_v47 = vor.u32 %v5748_v37, %v4738_v39 }
 0x18e   :  { %v4997_v18 = vor.u32 %v5812_v59, %v4994_v43  ;;  %v1710_v5 = vpop.f32.mrf.mxu3 }
 0x18f   :  { %2617 = vmatpush.bf16.msrb.mxu1 %v4965_v45  ;;  %v1722_v45 = vpop.f32.mrf.mxu0 }
 0x190   :  { %2591 = vmatpush.bf16.msra.mxu3 %v5057_v53  ;;  %2605 = vmatpush.bf16.msrb.mxu0 %v4805_v55  ;;  %v5846_v53 = vld [vmem:[#allocation3 + $0x14] sm:$0xf0]  ;;  %v5112_v55 = vld [vmem:[#allocation3] sm:$0xf] }
 0x191   :  { %2633 = vmatpush.bf16.msrb.mxu2 %v5061_v57  ;;  %v5843_v57 = vld [vmem:[#allocation3 + $0x4] sm:$0xf]  ;;  %v5113_v62 = vor.u32 %v5845_v34, %v5112_v55  ;;  %v5131_v20 = vor.u32 %v5846_v53, %v5130_v58  ;;  %v1752_v12 = vpop.f32.mrf.mxu2 }
 0x193   :  { %2618 = vmatpush.bf16.msrb.mxu1 %v4949_v63  ;;  %v5122_v63 = vor.u32 %v5843_v57, %v5119_v52 }
 0x194   :  { %2592 = vmatpush.bf16.msra.mxu3 %v5041_v17  ;;  %2606 = vmatpush.bf16.msrb.mxu0 %v4789_v4  ;;  %v6327_v17 = vld [vmem:[%s6450_s9] sm:$0xf]  ;;  %v5140_v4 = vor.u32 %v5844_v36, %v5137_v0 }
 0x195   :  { %2634 = vmatpush.bf16.msrb.mxu2 %v5045_v40  ;;  %v4869_v40 = vor.u32 %v5780_v1, %v4866_v2  ;;  %v1211_v50 = vperm.slane %v6327_v17, 0  ;;  %v1212_v7 = vperm.slane %v6327_v17, 1  ;;  %v1213_v43 = vperm.slane %v6327_v17, 2 }
 0x197   :  { %2619 = vmatpush.bf16.msrb.mxu1 %v4933_v41  ;;  %v1724_v3 = vpop.f32.mrf.mxu0  ;;  %v1736_v41 = vpop.f32.mrf.mxu1  ;;  %v1709_v28 = vadd.f32 %v1708_v46, %v1211_v50  ;;  %v1751_v9 = vadd.f32 %v1750_v6, %v1212_v7  ;;  %v1753_v19 = vadd.f32 %v1752_v12, %v1212_v7  ;;  %v1214_v46 = vperm.slane %v6327_v17, 3 }
 0x198   :  { %2593 = vmatpush.bf16.msra.mxu3 %v5025_v10  ;;  %2607 = vmatpush.bf16.msrb.mxu0 %v4773_v11 }
 0x199   :  { %2635 = vmatpush.bf16.msrb.mxu2 %v5029_v14  ;;  %v1723_v8 = vadd.f32 %v1722_v45, %v1709_v28 }
 0x19b   :  { %2620 = vmatpush.bf16.msrb.mxu1 %v4917_v51  ;;  %v1737_v14 = vadd.f32 %v1736_v41, %v1723_v8 }
 0x19c   :  { %2594 = vmatpush.bf16.msra.mxu3 %v5009_v30  ;;  %2608 = vmatpush.bf16.msrb.mxu0 %v4757_v31 }
 0x19d   :  { %2636 = vmatpush.bf16.msrb.mxu2 %v5013_v42 }
 0x19f   :  { %2621 = vmatpush.bf16.msrb.mxu1 %v4901_v38  ;;  %v1738_v16 = vpop.f32.mrf.mxu1 }
 0x1a0   :  { %2595 = vmatpush.bf16.msra.mxu3 %v4993_v44  ;;  %2609 = vmatpush.bf16.msrb.mxu0 %v4741_v47 }
 0x1a1   :  { %2637 = vmatpush.bf16.msrb.mxu2 %v4997_v18 }
 0x1a2   :  { %v1778_v10 = vpop.f32.mrf.mxu0 }
 0x1a3   :  { %2622 = vmatpush.bf16.msrb.mxu1 %v4885_v61  ;;  %2596 = vmatmul.bf16.vlgmr.msra.gmra.mxu3 %v6238_v54 }
 0x1a4   :  { %2679 = vmatpush.bf16.xpose.msrb.mxu3 %v5113_v62  ;;  %2754 = vmatpush.bf16.xpose.msra.mxu0 %v5122_v63 }
 0x1a5   :  { %2828 = vmatpush.bf16.xpose.msra.mxu2 %v5131_v20  ;;  %2610 = vmatmul.bf16.vlgmr.msrb.gmra.mxu0 %v6223_v29 }
 0x1a6   :  { %2638 = vmatmul.bf16.vlgmr.msrb.gmra.mxu2 %v6238_v54  ;;  %v1764_v11 = vpop.f32.mrf.mxu3  ;;  %v1711_v54 = vadd.f32 %v1710_v5, %v1211_v50 }
 0x1a7   :  { %2623 = vmatpush.bf16.msrb.mxu1 %v4869_v40  ;;  %v1765_v29 = vadd.f32 %v1764_v11, %v1751_v9 }
 0x1a8   :  { %v1725_v60 = vadd.f32 %v1724_v3, %v1711_v54 }
 0x1a9   :  { %v1779_v15 = vadd.f32 %v1778_v10, %v1765_v29  ;;  %v1806_v42 = vpop.f32.mrf.mxu2  ;;  %v1986_v10 = vld [vmem:[%s6446_s5] sm:$0xf] }
 0x1aa   :  { %2624 = vmatmul.bf16.vlgmr.msrb.gmra.mxu1 %v6227_v35  ;;  %v1780_v26 = vpop.f32.mrf.mxu0  ;;  %v1739_v30 = vadd.f32 %v1738_v16, %v1725_v60  ;;  %v1792_v35 = vpop.f32.mrf.mxu1  ;;  %v1989_v54 = vperm.slane %v1986_v10, 1 }
 0x1ab   :  { %v1867_v51 = vpack.c.bf16 %v1779_v15, %v1737_v14  ;;  %v1793_v47 = vadd.f32 %v1792_v35, %v1213_v43  ;;  %v1988_v14 = vperm.slane %v1986_v10, 0 }
 0x1ac   :  { %2900 = vmatpush.bf16.xpose.msrb.mxu0 %v5140_v4 }
 0x1ad   :  { %1871 = vst [vmem:[#allocation4] sm:$0xff] %v1867_v51  ;;  %v1807_v53 = vadd.f32 %v1806_v42, %v1793_v47 }
 0x1ae   :  { %v1766_v21 = vpop.f32.mrf.mxu3 }
 0x1af   :  { %v1767_v24 = vadd.f32 %v1766_v21, %v1753_v19 }
 0x1b1   :  { %v1781_v31 = vadd.f32 %v1780_v26, %v1767_v24  ;;  %v1808_v44 = vpop.f32.mrf.mxu2 }
 0x1b2   :  { %v1794_v37 = vpop.f32.mrf.mxu1 }
 0x1b3   :  { %v1869_v32 = vpack.c.bf16 %v1781_v31, %v1739_v30  ;;  %v1795_v63 = vadd.f32 %v1794_v37, %v1213_v43 }
 0x1b4   :  { %v5116_v33 = vld [vmem:[#allocation4] sm:$0xf]  ;;  %v5847_v39 = vld [vmem:[#allocation4 + $0x4] sm:$0xf] }
 0x1b5   :  { %1873 = vst [vmem:[#allocation4 + $0x10] sm:$0xff] %v1869_v32  ;;  %v1809_v36 = vadd.f32 %v1808_v44, %v1795_v63  ;;  %v1990_v63 = vperm.slane %v1986_v10, 2 }
 0x1bc   :  { %v5849_v38 = vld [vmem:[#allocation4 + $0xc] sm:$0xf0]  ;;  %v5123_v59 = vld [vmem:[#allocation4 + $0x10] sm:$0xf0] }
 0x1bd   :  { %v5117_v13 = vor.u32 %v5849_v38, %v5116_v33  ;;  %v5126_v56 = vor.u32 %v5847_v39, %v5123_v59 }
 0x1bf   :  { %2730 = vmatpush.bf16.msra.mxu3 %v5117_v13  ;;  %2800 = vmatpush.bf16.msra.mxu1 %v5126_v56 }
 0x1c2   :  { %v1834_v45 = vpop.f32.mrf.mxu0 }
 0x1c3   :  { %v1835_v18 = vadd.f32 %v1834_v45, %v1214_v46 }
 0x1c6   :  { %v1820_v34 = vpop.f32.mrf.mxu3 }
 0x1c7   :  { %v1848_v52 = vpop.f32.mrf.mxu1  ;;  %v1821_v58 = vadd.f32 %v1820_v34, %v1807_v53 }
 0x1c8   :  { %v1849_v55 = vadd.f32 %v1848_v52, %v1835_v18 }
 0x1c9   :  { %v1862_v57 = vpop.f32.mrf.mxu2 }
 0x1ca   :  { %v1863_v61 = vadd.f32 %v1862_v57, %v1849_v55  ;;  %v1836_v62 = vpop.f32.mrf.mxu0 }
 0x1cb   :  { %v1837_v1 = vadd.f32 %v1836_v62, %v1214_v46  ;;  %v1991_v62 = vperm.slane %v1986_v10, 3 }
 0x1cc   :  { %v1868_v0 = vpack.c.bf16 %v1863_v61, %v1821_v58 }
 0x1ce   :  { %1872 = vst [vmem:[#allocation4 + $0x8] sm:$0xff] %v1868_v0  ;;  %v1822_v2 = vpop.f32.mrf.mxu3 }
 0x1cf   :  { %v1850_v20 = vpop.f32.mrf.mxu1  ;;  %v1823_v40 = vadd.f32 %v1822_v2, %v1809_v36 }
 0x1d0   :  { %v1851_v17 = vadd.f32 %v1850_v20, %v1837_v1 }
 0x1d1   :  { %v1864_v4 = vpop.f32.mrf.mxu2 }
 0x1d2   :  { %v1865_v50 = vadd.f32 %v1864_v4, %v1851_v17 }
 0x1d4   :  { %v1870_v3 = vpack.c.bf16 %v1865_v50, %v1823_v40 }
 0x1d5   :  { %v5848_v5 = vld [vmem:[#allocation4 + $0xc] sm:$0xf]  ;;  %v5134_v53 = vld [vmem:[#allocation4 + $0x8] sm:$0xf] }
 0x1d6   :  { %1874 = vst [vmem:[#allocation4 + $0x18] sm:$0xff] %v1870_v3 }
 0x1dd   :  { %v5141_v41 = vld [vmem:[#allocation4 + $0x18] sm:$0xf0]  ;;  %v5850_v18 = vld [vmem:[#allocation4 + $0x14] sm:$0xf0] }
 0x1de   :  { %v5144_v6 = vor.u32 %v5848_v5, %v5141_v41  ;;  %v5135_v55 = vor.u32 %v5850_v18, %v5134_v53 }
 0x1e0   :  { %2946 = vmatpush.bf16.msrb.mxu1 %v5144_v6 }
 0x1e2   :  { %v2499_v28 = vpop.f32.mrf.mxu0 }
 0x1e6   :  { %v2485_v7 = vpop.f32.mrf.mxu3 }
 0x1e7   :  { %v2513_v11 = vpop.f32.mrf.mxu1  ;;  %v2486_v12 = vadd.f32 %v2485_v7, %v1988_v14 }
 0x1e9   :  { %v2527_v29 = vpop.f32.mrf.mxu2  ;;  %v2500_v26 = vadd.f32 %v2499_v28, %v2486_v12 }
 0x1ea   :  { %v2501_v8 = vpop.f32.mrf.mxu0  ;;  %v2528_v51 = vadd.f32 %v2527_v29, %v1989_v54 }
 0x1eb   :  { %v2514_v32 = vadd.f32 %v2513_v11, %v2500_v26 }
 0x1ee   :  { %v2487_v9 = vpop.f32.mrf.mxu3 }
 0x1ef   :  { %v2488_v60 = vadd.f32 %v2487_v9, %v1988_v14  ;;  %v2515_v21 = vpop.f32.mrf.mxu1 }
 0x1f1   :  { %v2529_v24 = vpop.f32.mrf.mxu2  ;;  %v2502_v30 = vadd.f32 %v2501_v8, %v2488_v60 }
 0x1f2   :  { %v2530_v31 = vadd.f32 %v2529_v24, %v1989_v54  ;;  %v2658_v24 = vstv %s6441_s0 }
 0x1f3   :  { %v2516_v38 = vadd.f32 %v2515_v21, %v2502_v30 }
 0x202   :  { %v2555_v15 = vpop.f32.mrf.mxu0 }
 0x206   :  { %v2541_v16 = vpop.f32.mrf.mxu3 }
 0x207   :  { %v2542_v19 = vadd.f32 %v2541_v16, %v2528_v51  ;;  %v2569_v43 = vpop.f32.mrf.mxu1 }
 0x208   :  { %v2570_v36 = vadd.f32 %v2569_v43, %v1990_v63 }
 0x209   :  { %v2556_v35 = vadd.f32 %v2555_v15, %v2542_v19  ;;  %v2583_v44 = vpop.f32.mrf.mxu2  ;;  %v2656_v19 = vlaneseq }
 0x20a   :  { %v2557_v37 = vpop.f32.mrf.mxu0  ;;  %v2584_v50 = vadd.f32 %v2583_v44, %v2570_v36 }
 0x20b   :  { %v2644_v39 = vpack.c.bf16 %v2556_v35, %v2514_v32  ;;  %v2657_v21 = vand.u32 127, %v2656_v19 }
 0x20d   :  { %v2662_v56 = vunpack.c.l.b16 %v2644_v39  ;;  %v2739_v45 = vunpack.c.h.b16 %v2644_v39  ;;  %vm6343_vm0 = vcmp.lt.s32.totalorder %v2657_v21, %v2658_v24 }
 0x20e   :  { %v2543_v42 = vpop.f32.mrf.mxu3 }
 0x20f   :  { %v2544_v33 = vadd.f32 %v2543_v42, %v2530_v31  ;;  %v2571_v57 = vpop.f32.mrf.mxu1 }
 0x210   :  { %v2572_v40 = vadd.f32 %v2571_v57, %v1990_v63 }
 0x211   :  { %v2558_v59 = vadd.f32 %v2557_v37, %v2544_v33  ;;  %v2585_v58 = vpop.f32.mrf.mxu2 }
 0x212   :  { %v2586_v28 = vadd.f32 %v2585_v58, %v2572_v40 }
 0x213   :  { %v2646_v13 = vpack.c.bf16 %v2558_v59, %v2516_v38 }
 0x215   :  { %v2663_v46 = vunpack.c.l.b16 %v2646_v13  ;;  %v2740_v47 = vunpack.c.h.b16 %v2646_v13 }
 0x217   :  { %v2664_v34 = vpack.c.b16 %v2663_v46, %v2662_v56  ;;  %v2741_v52 = vpack.c.b16 %v2740_v47, %v2739_v45 }
 0x219   :  { %2680 = vmatmul.bf16.vlgmr.msrb.gmra.mxu3 %v2664_v34  ;;  %2755 = vmatmul.bf16.vlgmr.msra.gmra.mxu0 %v2741_v52 }
 0x21a   :  { %2876 = vmatpush.bf16.msrb.mxu3 %v5135_v55 }
 0x222   :  { %v2611_v61 = vpop.f32.mrf.mxu0 }
 0x223   :  { %v2612_v2 = vadd.f32 %v2611_v61, %v1991_v62 }
 0x226   :  { %v2597_v0 = vpop.f32.mrf.mxu3 }
 0x227   :  { %v2625_v1 = vpop.f32.mrf.mxu1  ;;  %v2598_v7 = vadd.f32 %v2597_v0, %v2584_v50 }
 0x228   :  { %v2626_v17 = vadd.f32 %v2625_v1, %v2612_v2 }
 0x229   :  { %v2639_v20 = vpop.f32.mrf.mxu2 }
 0x22a   :  { %v2613_v4 = vpop.f32.mrf.mxu0  ;;  %v2640_v3 = vadd.f32 %v2639_v20, %v2626_v17 }
 0x22b   :  { %v2614_v5 = vadd.f32 %v2613_v4, %v1991_v62 }
 0x22c   :  { %v2645_v11 = vpack.c.bf16 %v2640_v3, %v2598_v7 }
 0x22e   :  { %v2599_v41 = vpop.f32.mrf.mxu3  ;;  %v2811_v54 = vunpack.c.l.b16 %v2645_v11  ;;  %v2885_v15 = vunpack.c.h.b16 %v2645_v11 }
 0x22f   :  { %v2627_v6 = vpop.f32.mrf.mxu1  ;;  %v2600_v29 = vadd.f32 %v2599_v41, %v2586_v28 }
 0x230   :  { %v2628_v8 = vadd.f32 %v2627_v6, %v2614_v5 }
 0x231   :  { %v2641_v9 = vpop.f32.mrf.mxu2 }
 0x232   :  { %v2642_v10 = vadd.f32 %v2641_v9, %v2628_v8 }
 0x234   :  { %v2647_v14 = vpack.c.bf16 %v2642_v10, %v2600_v29 }
 0x236   :  { %v2812_v16 = vunpack.c.l.b16 %v2647_v14  ;;  %v2886_v12 = vunpack.c.h.b16 %v2647_v14 }
 0x238   :  { %v2813_v51 = vpack.c.b16 %v2812_v16, %v2811_v54  ;;  %v2887_v60 = vpack.c.b16 %v2886_v12, %v2885_v15 }
 0x23a   :  { %2829 = vmatmul.bf16.vlgmr.msra.gmra.mxu2 %v2813_v51  ;;  %2901 = vmatmul.bf16.vlgmr.msrb.gmra.mxu0 %v2887_v60 }
 0x296   :  { %v2756_v30 = vpop.f32.mrf.mxu0 }
 0x297   :  { %v2761_v31 = vsel %vm6343_vm0, %v2756_v30, -1e+30 }
 0x298   :  { %v2763_v35 = vsel %vm2690_vm1, %v2761_v31, -inf }
 0x299   :  { %2764 = vmax.xlane.f32.xlu1 %v2763_v35 }
 0x29c   :  { %v2681_v42 = vpop.f32.mrf.mxu3 }
 0x29d   :  { %v2688_v32 = vsel %vm6343_vm0, %v2681_v42, -1e+30 }
 0x29e   :  { %v2758_v33 = vpop.f32.mrf.mxu0  ;;  %v2691_v37 = vsel %vm2690_vm1, %v2688_v32, -inf }
 0x29f   :  { %v2762_v38 = vsel %vm6343_vm0, %v2758_v33, -1e+30  ;;  %2692 = vmax.xlane.f32.xlu0 %v2691_v37 }
 0x2a0   :  { %v2766_v39 = vsel %vm2690_vm1, %v2762_v38, -inf }
 0x2a1   :  { %2767 = vmax.xlane.f32.xlu1 %v2766_v39 }
 0x2a4   :  { %v2683_v59 = vpop.f32.mrf.mxu3 }
 0x2a5   :  { %v2689_v43 = vsel %vm6343_vm0, %v2683_v59, -1e+30 }
 0x2a6   :  { %v2694_v44 = vsel %vm2690_vm1, %v2689_v43, -inf }
 0x2a7   :  { %2695 = vmax.xlane.f32.xlu0 %v2694_v44 }
 0x2b7   :  { %v2902_v13 = vpop.f32.mrf.mxu0 }
 0x2b8   :  { %v2907_v56 = vsel %vm6343_vm0, %v2902_v13, -1e+30 }
 0x2b9   :  { %v2909_v45 = vsel %vm2690_vm1, %v2907_v56, -inf }
 0x2ba   :  { %2910 = vmax.xlane.f32.xlu0 %v2909_v45 }
 0x2bd   :  { %v2830_v46 = vpop.f32.mrf.mxu2 }
 0x2be   :  { %v2835_v47 = vsel %vm6343_vm0, %v2830_v46, -1e+30 }
 0x2bf   :  { %v2904_v18 = vpop.f32.mrf.mxu0  ;;  %v2837_v34 = vsel %vm2690_vm1, %v2835_v47, -inf }
 0x2c0   :  { %v2908_v52 = vsel %vm6343_vm0, %v2904_v18, -1e+30  ;;  %2838 = vmax.xlane.f32.xlu2 %v2837_v34 }
 0x2c1   :  { %v2912_v53 = vsel %vm2690_vm1, %v2908_v52, -inf }
 0x2c2   :  { %2913 = vmax.xlane.f32.xlu1 %v2912_v53  ;;  %v5328_v53 = vld [vmem:[#allocation14 + $0x168] sm:$0xf] }
 0x2c5   :  { %v2832_v55 = vpop.f32.mrf.mxu2 }
 0x2c6   :  { %v2836_v57 = vsel %vm6343_vm0, %v2832_v55, -1e+30  ;;  %v5897_v55 = vld [vmem:[#allocation14 + $0x170] sm:$0xf0] }
 0x2c7   :  { %v2840_v58 = vsel %vm2690_vm1, %v2836_v57, -inf }
 0x2c8   :  { %2841 = vmax.xlane.f32.xlu2 %v2840_v58  ;;  %v5329_v58 = vor.u32 %v5897_v55, %v5328_v53 }
 0x30c   :  { %v2765_v61 = vpop.xlane.xlu1 %2764 }
 0x30d   :  { %v2769_v62 = vsub.f32 %v2761_v31, %v2765_v61  ;;  %v5894_v61 = vld [vmem:[#allocation14 + $0x158] sm:$0xf0] }
 0x30f   :  { %v2771_v63 = vmul.f32 1.442695, %v2769_v62  ;;  %v5232_v62 = vld [vmem:[#allocation14 + $0xa8] sm:$0xf] }
 0x311   :  { %5956 = vpow2.f32 %v2771_v63  ;;  %v5873_v63 = vld [vmem:[#allocation14 + $0xb0] sm:$0xf0] }
 0x312   :  { %v2693_v0 = vpop.xlane.xlu0 %2692 }
 0x313   :  { %v2697_v1 = vsub.f32 %v2688_v32, %v2693_v0  ;;  %v5233_v0 = vor.u32 %v5873_v63, %v5232_v62  ;;  %v5160_v63 = vld [vmem:[#allocation14 + $0x18] sm:$0xf] }
 0x314   :  { %v2768_v2 = vpop.xlane.xlu1 %2767 }
 0x315   :  { %v2699_v20 = vmul.f32 1.442695, %v2697_v1  ;;  %v2770_v36 = vsub.f32 %v2762_v38, %v2768_v2  ;;  %v5220_v1 = vld [vmem:[#allocation14 + $0x90] sm:$0xf]  ;;  %3627 = vmatpush.bf16.msrb.mxu2 %v5233_v0  ;;  %v5855_v0 = vld [vmem:[#allocation14 + $0x20] sm:$0xf0] }
 0x317   :  { %v5957_v17 = vpop.eup %5956  ;;  %5958 = vpow2.f32 %v2699_v20  ;;  %v2773_v40 = vmul.f32 1.442695, %v2770_v36  ;;  %v5870_v20 = vld [vmem:[#allocation14 + $0x98] sm:$0xf0]  ;;  %v5304_v36 = vld [vmem:[#allocation14 + $0x138] sm:$0xf] }
 0x318   :  { %v2775_v4 = vsel %vm2690_vm1, %v5957_v17, 0.0 }
 0x319   :  { %2776 = vadd.xlane.f32.xlu1 %v2775_v4  ;;  %5960 = vpow2.f32 %v2773_v40  ;;  %v5221_v4 = vor.u32 %v5870_v20, %v5220_v1  ;;  %v5208_v40 = vld [vmem:[#allocation14 + $0x78] sm:$0xf]  ;;  %v5244_v20 = vld [vmem:[#allocation14 + $0xc0] sm:$0xf] }
 0x31a   :  { %v2696_v50 = vpop.xlane.xlu0 %2695 }
 0x31b   :  { %v2698_v3 = vsub.f32 %v2689_v43, %v2696_v50  ;;  %v5867_v50 = vld [vmem:[#allocation14 + $0x80] sm:$0xf0]  ;;  %3628 = vmatpush.bf16.msrb.mxu2 %v5221_v4 }
 0x31d   :  { %v5959_v5 = vpop.eup %5958  ;;  %v2701_v41 = vmul.f32 1.442695, %v2698_v3 }
 0x31e   :  { %v2703_v6 = vsel %vm2690_vm1, %v5959_v5, 0.0 }
 0x31f   :  { %5962 = vpow2.f32 %v2701_v41  ;;  %2704 = vadd.xlane.f32.xlu2 %v2703_v6  ;;  %v5961_v28 = vpop.eup %5960  ;;  %v5888_v41 = vld [vmem:[#allocation14 + $0x128] sm:$0xf0]  ;;  %v5209_v6 = vor.u32 %v5867_v50, %v5208_v40  ;;  %v5148_v50 = vld [vmem:[#allocation14] sm:$0xf] }
 0x320   :  { %v2778_v9 = vsel %vm2690_vm1, %v5961_v28, 0.0  ;;  %v5896_v40 = vld [vmem:[#allocation14 + $0x16c] sm:$0xf] }
 0x321   :  { %3629 = vmatpush.bf16.msrb.mxu2 %v5209_v6  ;;  %v5872_v6 = vld [vmem:[#allocation14 + $0xac] sm:$0xf] }
 0x325   :  { %v5963_v7 = vpop.eup %5962 }
 0x326   :  { %v2706_v8 = vsel %vm2690_vm1, %v5963_v7, 0.0 }
 0x327   :  { %2707 = vadd.xlane.f32.xlu0 %v2706_v8  ;;  %2779 = vadd.xlane.f32.xlu2 %v2778_v9  ;;  %v5520_v8 = vld [vmem:[#allocation14 + $0x2e8] sm:$0xf]  ;;  %v5945_v9 = vld [vmem:[#allocation14 + $0x2f0] sm:$0xf0] }
 0x32d   :  { %v2911_v11 = vpop.xlane.xlu0 %2910 }
 0x32e   :  { %v2915_v29 = vsub.f32 %v2907_v56, %v2911_v11  ;;  %v5521_v11 = vor.u32 %v5945_v9, %v5520_v8 }
 0x330   :  { %v2917_v10 = vmul.f32 1.442695, %v2915_v29 }
 0x332   :  { %5964 = vpow2.f32 %v2917_v10 }
 0x333   :  { %v2839_v14 = vpop.xlane.xlu2 %2838 }
 0x334   :  { %v2843_v54 = vsub.f32 %v2835_v47, %v2839_v14  ;;  %v5508_v14 = vld [vmem:[#allocation14 + $0x2d0] sm:$0xf] }
 0x335   :  { %v2914_v15 = vpop.xlane.xlu1 %2913 }
 0x336   :  { %v2845_v16 = vmul.f32 1.442695, %v2843_v54  ;;  %v2916_v12 = vsub.f32 %v2908_v52, %v2914_v15  ;;  %v5942_v54 = vld [vmem:[#allocation14 + $0x2d8] sm:$0xf0]  ;;  %v5280_v15 = vld [vmem:[#allocation14 + $0x108] sm:$0xf] }
 0x338   :  { %v6375_v51 = vpop.eup %5964  ;;  %5966 = vpow2.f32 %v2845_v16  ;;  %v2919_v19 = vmul.f32 1.442695, %v2916_v12  ;;  %v5885_v16 = vld [vmem:[#allocation14 + $0x110] sm:$0xf0] }
 0x339   :  { %v2921_v60 = vsel %vm2690_vm1, %v6375_v51, 0.0 }
 0x33a   :  { %2922 = vadd.xlane.f32.xlu2 %v2921_v60  ;;  %5968 = vpow2.f32 %v2919_v19  ;;  %v5184_v60 = vld [vmem:[#allocation14 + $0x48] sm:$0xf]  ;;  %v5509_v19 = vor.u32 %v5942_v54, %v5508_v14 }
 0x33b   :  { %v2842_v21 = vpop.xlane.xlu2 %2841 }
 0x33c   :  { %v2844_v24 = vsub.f32 %v2836_v57, %v2842_v21  ;;  %v5316_v57 = vld [vmem:[#allocation14 + $0x150] sm:$0xf]  ;;  %v5861_v21 = vld [vmem:[#allocation14 + $0x50] sm:$0xf0] }
 0x33d   :  { %v5317_v2 = vor.u32 %v5894_v61, %v5316_v57  ;;  %v5256_v57 = vld [vmem:[#allocation14 + $0xd8] sm:$0xf] }
 0x33e   :  { %v6379_v26 = vpop.eup %5966  ;;  %v2847_v30 = vmul.f32 1.442695, %v2844_v24  ;;  %v5424_v24 = vld [vmem:[#allocation14 + $0x228] sm:$0xf] }
 0x33f   :  { %v2849_v31 = vsel %vm2690_vm1, %v6379_v26, 0.0 }
 0x340   :  { %5970 = vpow2.f32 %v2847_v30  ;;  %2850 = vadd.xlane.f32.xlu0 %v2849_v31  ;;  %v6383_v35 = vpop.eup %5968  ;;  %v5921_v30 = vld [vmem:[#allocation14 + $0x230] sm:$0xf0] }
 0x341   :  { %v2924_v33 = vsel %vm2690_vm1, %v6383_v35, 0.0  ;;  %v5425_v31 = vor.u32 %v5921_v30, %v5424_v24  ;;  %v5222_v24 = vld [vmem:[#allocation14 + $0x9c] sm:$0xf0] }
 0x343   :  { %3655 = vmatpush.bf16.msra.mxu0 %v5425_v31  ;;  %v5887_v31 = vld [vmem:[#allocation14 + $0x124] sm:$0xf] }
 0x346   :  { %v6385_v42 = vpop.eup %5970 }
 0x347   :  { %v2852_v32 = vsel %vm2690_vm1, %v6385_v42, 0.0 }
 0x348   :  { %2853 = vadd.xlane.f32.xlu1 %v2852_v32  ;;  %2925 = vadd.xlane.f32.xlu0 %v2924_v33  ;;  %v5496_v32 = vld [vmem:[#allocation14 + $0x2b8] sm:$0xf] }
 0x38c   :  { %v2777_v38 = vpop.xlane.xlu1 %2776 }
 0x392   :  { %v2705_v37 = vpop.xlane.xlu2 %2704 }
 0x393   :  { %5972 = vrcp.f32 %v2705_v37  ;;  %v5281_v37 = vor.u32 %v5885_v16, %v5280_v15  ;;  %v5893_v16 = vld [vmem:[#allocation14 + $0x154] sm:$0xf] }
 0x394   :  { %5974 = vrcp.f32 %v2777_v38  ;;  %v5268_v38 = vld [vmem:[#allocation14 + $0xf0] sm:$0xf] }
 0x399   :  { %v5973_v43 = vpop.eup %5972 }
 0x39a   :  { %v2708_v39 = vpop.xlane.xlu0 %2707  ;;  %v2780_v59 = vpop.xlane.xlu2 %2779  ;;  %v2711_v45 = vmul.f32 %v5973_v43, %v5959_v5  ;;  %v5292_v5 = vld [vmem:[#allocation14 + $0x120] sm:$0xf]  ;;  %v5185_v43 = vor.u32 %v5861_v21, %v5184_v60  ;;  %v5869_v21 = vld [vmem:[#allocation14 + $0x94] sm:$0xf] }
 0x39b   :  { %5976 = vrcp.f32 %v2708_v39  ;;  %v5975_v44 = vpop.eup %5974  ;;  %v5293_v10 = vor.u32 %v5888_v41, %v5292_v5  ;;  %v5882_v39 = vld [vmem:[#allocation14 + $0xf8] sm:$0xf0]  ;;  %v5330_v41 = vld [vmem:[#allocation14 + $0x174] sm:$0xf0] }
 0x39c   :  { %5978 = vrcp.f32 %v2780_v59  ;;  %v2783_v47 = vmul.f32 %v5975_v44, %v5957_v17  ;;  %v5891_v17 = vld [vmem:[#allocation14 + $0x140] sm:$0xf0]  ;;  %v5172_v44 = vld [vmem:[#allocation14 + $0x30] sm:$0xf]  ;;  %v5269_v55 = vor.u32 %v5882_v39, %v5268_v38  ;;  %v5333_v15 = vor.u32 %v5896_v40, %v5330_v41  ;;  %v5866_v39 = vld [vmem:[#allocation14 + $0x7c] sm:$0xf] }
 0x39d   :  { %v5305_v3 = vor.u32 %v5891_v17, %v5304_v36  ;;  %v5939_v59 = vld [vmem:[#allocation14 + $0x2c0] sm:$0xf0]  ;;  %v5876_v36 = vld [vmem:[#allocation14 + $0xc8] sm:$0xf0]  ;;  %v5161_v17 = vor.u32 %v5855_v0, %v5160_v63  ;;  %v5881_v63 = vld [vmem:[#allocation14 + $0xf4] sm:$0xf] }
 0x39e   :  { %v5915_v38 = vld [vmem:[#allocation14 + $0x200] sm:$0xf0]  ;;  %v5186_v40 = vld [vmem:[#allocation14 + $0x54] sm:$0xf0]  ;;  %v5878_v41 = vld [vmem:[#allocation14 + $0xdc] sm:$0xf] }
 0x3a1   :  { %v5977_v13 = vpop.eup %5976 }
 0x3a2   :  { %v5979_v56 = vpop.eup %5978  ;;  %v2712_v46 = vmul.f32 %v5977_v13, %v5963_v7  ;;  %v5864_v7 = vld [vmem:[#allocation14 + $0x68] sm:$0xf0]  ;;  %v5497_v13 = vor.u32 %v5939_v59, %v5496_v32  ;;  %v5294_v32 = vld [vmem:[#allocation14 + $0x12c] sm:$0xf0] }
 0x3a3   :  { %v2784_v18 = vmul.f32 %v5979_v56, %v5961_v28  ;;  %v5196_v28 = vld [vmem:[#allocation14 + $0x60] sm:$0xf]  ;;  %v5412_v56 = vld [vmem:[#allocation14 + $0x210] sm:$0xf] }
 0x3a4   :  { %v2713_v34 = vpack.c.bf16 %v2712_v46, %v2711_v45  ;;  %v5197_v12 = vor.u32 %v5864_v7, %v5196_v28  ;;  %v5918_v45 = vld [vmem:[#allocation14 + $0x218] sm:$0xf0]  ;;  %v5234_v28 = vld [vmem:[#allocation14 + $0xb4] sm:$0xf0] }
 0x3a5   :  { %v2785_v52 = vpack.c.bf16 %v2784_v18, %v2783_v47  ;;  %v5858_v46 = vld [vmem:[#allocation14 + $0x38] sm:$0xf0]  ;;  %v5413_v47 = vor.u32 %v5918_v45, %v5412_v56  ;;  %v5484_v18 = vld [vmem:[#allocation14 + $0x2a0] sm:$0xf]  ;;  %v5933_v56 = vld [vmem:[#allocation14 + $0x290] sm:$0xf0] }
 0x3a6   :  { %5118 = vmatmul.msk.bf16.vlgmr.msra.gmra.mxu3 %vm2690_vm1, %v2713_v34  ;;  %3630 = vmatpush.bf16.msrb.mxu2 %v5197_v12  ;;  %v5936_v34 = vld [vmem:[#allocation14 + $0x2a8] sm:$0xf0]  ;;  %v5173_v61 = vor.u32 %v5858_v46, %v5172_v44  ;;  %v5237_v12 = vor.u32 %v5872_v6, %v5234_v28  ;;  %v5258_v28 = vld [vmem:[#allocation14 + $0xe4] sm:$0xf0] }
 0x3a7   :  { %5127 = vmatmul.msk.bf16.vlgmr.msra.gmra.mxu1 %vm2690_vm1, %v2785_v52  ;;  %3641 = vmatpush.bf16.msra.mxu3 %v5329_v58  ;;  %v5879_v58 = vld [vmem:[#allocation14 + $0xe0] sm:$0xf0]  ;;  %v5485_v62 = vor.u32 %v5936_v34, %v5484_v18  ;;  %v5884_v45 = vld [vmem:[#allocation14 + $0x10c] sm:$0xf]  ;;  %v5388_v34 = vld [vmem:[#allocation14 + $0x1e0] sm:$0xf] }
 0x3a8   :  { %3669 = vmatpush.bf16.msra.mxu1 %v5521_v11  ;;  %3656 = vmatpush.bf16.msra.mxu0 %v5413_v47  ;;  %v5257_v1 = vor.u32 %v5879_v58, %v5256_v57  ;;  %v5245_v11 = vor.u32 %v5876_v36, %v5244_v20  ;;  %v5282_v47 = vld [vmem:[#allocation14 + $0x114] sm:$0xf0]  ;;  %v5198_v57 = vld [vmem:[#allocation14 + $0x6c] sm:$0xf0]  ;;  %v5376_v20 = vld [vmem:[#allocation14 + $0x1c8] sm:$0xf] }
 0x3a9   :  { %v5285_v18 = vor.u32 %v5884_v45, %v5282_v47  ;;  %v5909_v36 = vld [vmem:[#allocation14 + $0x1d0] sm:$0xf0] }
 0x3aa   :  { %3631 = vmatpush.bf16.msrb.mxu2 %v5185_v43  ;;  %v5210_v43 = vld [vmem:[#allocation14 + $0x84] sm:$0xf0] }
 0x3ab   :  { %3642 = vmatpush.bf16.msra.mxu3 %v5317_v2  ;;  %v5213_v44 = vor.u32 %v5866_v39, %v5210_v43  ;;  %v5340_v39 = vld [vmem:[#allocation14 + $0x180] sm:$0xf] }
 0x3ac   :  { %3670 = vmatpush.bf16.msra.mxu1 %v5509_v19  ;;  %v5318_v19 = vld [vmem:[#allocation14 + $0x15c] sm:$0xf0] }
 0x3ad   :  { %v2923_v33 = vpop.xlane.xlu2 %2922 }
 0x3ae   :  { %5980 = vrcp.f32 %v2923_v33  ;;  %3632 = vmatpush.bf16.msrb.mxu2 %v5173_v61  ;;  %v5297_v33 = vor.u32 %v5887_v31, %v5294_v32  ;;  %v5460_v61 = vld [vmem:[#allocation14 + $0x270] sm:$0xf] }
 0x3af   :  { %3643 = vmatpush.bf16.msra.mxu3 %v5305_v3  ;;  %v5852_v3 = vld [vmem:[#allocation14 + $0x8] sm:$0xf0] }
 0x3b0   :  { %3671 = vmatpush.bf16.msra.mxu1 %v5497_v13  ;;  %v5149_v14 = vor.u32 %v5852_v3, %v5148_v50  ;;  %v5472_v13 = vld [vmem:[#allocation14 + $0x288] sm:$0xf]  ;;  %v5448_v3 = vld [vmem:[#allocation14 + $0x258] sm:$0xf] }
 0x3b1   :  { %v5473_v46 = vor.u32 %v5933_v56, %v5472_v13  ;;  %v5150_v13 = vld [vmem:[#allocation14 + $0xc] sm:$0xf0]  ;;  %v5920_v56 = vld [vmem:[#allocation14 + $0x22c] sm:$0xf] }
 0x3b2   :  { %3633 = vmatpush.bf16.msrb.mxu2 %v5161_v17  ;;  %v5860_v17 = vld [vmem:[#allocation14 + $0x4c] sm:$0xf] }
 0x3b3   :  { %v2851_v29 = vpop.xlane.xlu0 %2850  ;;  %3644 = vmatpush.bf16.msra.mxu3 %v5293_v10  ;;  %v5189_v50 = vor.u32 %v5860_v17, %v5186_v40  ;;  %v5390_v40 = vld [vmem:[#allocation14 + $0x1ec] sm:$0xf0] }
 0x3b4   :  { %5982 = vrcp.f32 %v2851_v29  ;;  %v5981_v2 = vpop.eup %5980  ;;  %3672 = vmatpush.bf16.msra.mxu1 %v5485_v62  ;;  %v5930_v62 = vld [vmem:[#allocation14 + $0x278] sm:$0xf0] }
 0x3b5   :  { %v2929_v8 = vmul.f32 %v5981_v2, %v6375_v51  ;;  %v5321_v51 = vor.u32 %v5893_v16, %v5318_v19  ;;  %v5461_v0 = vor.u32 %v5930_v62, %v5460_v61  ;;  %v5875_v16 = vld [vmem:[#allocation14 + $0xc4] sm:$0xf]  ;;  %v5944_v19 = vld [vmem:[#allocation14 + $0x2ec] sm:$0xf]  ;;  %v5486_v61 = vld [vmem:[#allocation14 + $0x2ac] sm:$0xf0] }
 0x3b6   :  { %3634 = vmatpush.bf16.msrb.mxu2 %v5149_v14 }
 0x3b7   :  { %3645 = vmatpush.bf16.msra.mxu3 %v5281_v37  ;;  %v5400_v37 = vld [vmem:[#allocation14 + $0x1f8] sm:$0xf] }
 0x3b8   :  { %v5401_v59 = vor.u32 %v5915_v38, %v5400_v37  ;;  %3673 = vmatpush.bf16.msra.mxu1 %v5473_v46  ;;  %v5510_v37 = vld [vmem:[#allocation14 + $0x2dc] sm:$0xf0]  ;;  %v5426_v46 = vld [vmem:[#allocation14 + $0x234] sm:$0xf0] }
 0x3b9   :  { %v5429_v47 = vor.u32 %v5920_v56, %v5426_v46 }
 0x3ba   :  { %v5983_v4 = vpop.eup %5982  ;;  %3683 = vmatpush.bf16.msra.mxu2 %v5237_v12  ;;  %3657 = vmatpush.bf16.msra.mxu0 %v5401_v59  ;;  %v5900_v59 = vld [vmem:[#allocation14 + $0x188] sm:$0xf0] }
 0x3bb   :  { %v2926_v52 = vpop.xlane.xlu0 %2925  ;;  %v2854_v53 = vpop.xlane.xlu1 %2853  ;;  %3646 = vmatpush.bf16.msra.mxu3 %v5269_v55  ;;  %v2857_v29 = vmul.f32 %v5983_v4, %v6379_v26  ;;  %v5225_v26 = vor.u32 %v5869_v21, %v5222_v24  ;;  %v5377_v4 = vor.u32 %v5909_v36, %v5376_v20  ;;  %v5522_v21 = vld [vmem:[#allocation14 + $0x2f4] sm:$0xf0]  ;;  %v5341_v43 = vor.u32 %v5900_v59, %v5340_v39  ;;  %v5895_v39 = vld [vmem:[#allocation14 + $0x160] sm:$0xf0] }
 0x3bc   :  { %5984 = vrcp.f32 %v2926_v52  ;;  %v5912_v52 = vld [vmem:[#allocation14 + $0x1e8] sm:$0xf0]  ;;  %3674 = vmatpush.bf16.msra.mxu1 %v5461_v0  ;;  %v5402_v0 = vld [vmem:[#allocation14 + $0x204] sm:$0xf0]  ;;  %v5474_v20 = vld [vmem:[#allocation14 + $0x294] sm:$0xf0] }
 0x3bd   :  { %5986 = vrcp.f32 %v2854_v53  ;;  %v5863_v53 = vld [vmem:[#allocation14 + $0x64] sm:$0xf]  ;;  %v5389_v55 = vor.u32 %v5912_v52, %v5388_v34  ;;  %v5498_v34 = vld [vmem:[#allocation14 + $0x2c4] sm:$0xf0] }
 0x3be   :  { %3684 = vmatpush.bf16.msra.mxu2 %v5225_v26  ;;  %v5201_v58 = vor.u32 %v5863_v53, %v5198_v57  ;;  %v5352_v26 = vld [vmem:[#allocation14 + $0x198] sm:$0xf]  ;;  %v5917_v53 = vld [vmem:[#allocation14 + $0x214] sm:$0xf] }
 0x3bf   :  { %3647 = vmatpush.bf16.msra.mxu3 %v5257_v1  ;;  %3658 = vmatpush.bf16.msra.mxu0 %v5389_v55  ;;  %v5270_v1 = vld [vmem:[#allocation14 + $0xfc] sm:$0xf0] }
 0x3c0   :  { %v5273_v2 = vor.u32 %v5881_v63, %v5270_v1  ;;  %v5414_v55 = vld [vmem:[#allocation14 + $0x21c] sm:$0xf0]  ;;  %v5914_v63 = vld [vmem:[#allocation14 + $0x1fc] sm:$0xf] }
 0x3c1   :  { %v5417_v57 = vor.u32 %v5917_v53, %v5414_v55  ;;  %v5405_v1 = vor.u32 %v5914_v63, %v5402_v0  ;;  %v5892_v53 = vld [vmem:[#allocation14 + $0x148] sm:$0xf0]  ;;  %v5300_v0 = vld [vmem:[#allocation14 + $0x128] sm:$0xf] }
 0x3c2   :  { %v5985_v5 = vpop.eup %5984  ;;  %3685 = vmatpush.bf16.msra.mxu2 %v5213_v44  ;;  %v5851_v44 = vld [vmem:[#allocation14 + $0x4] sm:$0xf] }
 0x3c3   :  { %v5987_v7 = vpop.eup %5986  ;;  %v2930_v9 = vmul.f32 %v5985_v5, %v6383_v35  ;;  %3648 = vmatpush.bf16.msra.mxu3 %v5245_v11  ;;  %v5890_v35 = vld [vmem:[#allocation14 + $0x13c] sm:$0xf]  ;;  %v5927_v5 = vld [vmem:[#allocation14 + $0x260] sm:$0xf0]  ;;  %3659 = vmatpush.bf16.msra.mxu0 %v5377_v4  ;;  %v5857_v11 = vld [vmem:[#allocation14 + $0x34] sm:$0xf]  ;;  %v5153_v45 = vor.u32 %v5851_v44, %v5150_v13 }
 0x3c4   :  { %v2858_v10 = vmul.f32 %v5987_v7, %v6385_v42  ;;  %v5306_v42 = vld [vmem:[#allocation14 + $0x144] sm:$0xf0]  ;;  %v5449_v6 = vor.u32 %v5927_v5, %v5448_v3  ;;  %v5261_v7 = vor.u32 %v5878_v41, %v5258_v28  ;;  %v5911_v4 = vld [vmem:[#allocation14 + $0x1e4] sm:$0xf]  ;;  %v5929_v3 = vld [vmem:[#allocation14 + $0x274] sm:$0xf] }
 0x3c5   :  { %v2931_v54 = vpack.c.bf16 %v2930_v9, %v2929_v8  ;;  %v5309_v30 = vor.u32 %v5890_v35, %v5306_v42  ;;  %v5364_v8 = vld [vmem:[#allocation14 + $0x1b0] sm:$0xf]  ;;  %v5906_v9 = vld [vmem:[#allocation14 + $0x1b8] sm:$0xf0]  ;;  %v5903_v35 = vld [vmem:[#allocation14 + $0x1a0] sm:$0xf0] }
 0x3c6   :  { %v2859_v60 = vpack.c.bf16 %v2858_v10, %v2857_v29  ;;  %3686 = vmatpush.bf16.msra.mxu2 %v5201_v58  ;;  %3675 = vmatpush.bf16.msra.mxu1 %v5449_v6  ;;  %v5365_v29 = vor.u32 %v5906_v9, %v5364_v8  ;;  %v5174_v10 = vld [vmem:[#allocation14 + $0x3c] sm:$0xf0]  ;;  %v5854_v42 = vld [vmem:[#allocation14 + $0x1c] sm:$0xf]  ;;  %v5353_v31 = vor.u32 %v5903_v35, %v5352_v26  ;;  %v5935_v58 = vld [vmem:[#allocation14 + $0x2a4] sm:$0xf] }
 0x3c7   :  { %5145 = vmatmul.msk.bf16.vlgmr.msrb.gmra.mxu1 %vm2690_vm1, %v2931_v54  ;;  %v5177_v14 = vor.u32 %v5857_v11, %v5174_v10  ;;  %v5436_v54 = vld [vmem:[#allocation14 + $0x240] sm:$0xf]  ;;  %v5489_v62 = vor.u32 %v5935_v58, %v5486_v61  ;;  %v5908_v6 = vld [vmem:[#allocation14 + $0x1cc] sm:$0xf]  ;;  %v5378_v28 = vld [vmem:[#allocation14 + $0x1d4] sm:$0xf0] }
 0x3c8   :  { %5136 = vmatmul.msk.bf16.vlgmr.msrb.gmra.mxu3 %vm2690_vm1, %v2859_v60  ;;  %3660 = vmatpush.bf16.msra.mxu0 %v5365_v29  ;;  %v5246_v60 = vld [vmem:[#allocation14 + $0xcc] sm:$0xf0]  ;;  %v5462_v5 = vld [vmem:[#allocation14 + $0x27c] sm:$0xf0]  ;;  %v5381_v8 = vor.u32 %v5908_v6, %v5378_v28  ;;  %v5926_v9 = vld [vmem:[#allocation14 + $0x25c] sm:$0xf] }
 0x3c9   :  { %3697 = vmatpush.bf16.msrb.mxu3 %v5333_v15  ;;  %v5924_v15 = vld [vmem:[#allocation14 + $0x248] sm:$0xf0]  ;;  %v5249_v24 = vor.u32 %v5875_v16, %v5246_v60  ;;  %v5465_v41 = vor.u32 %v5929_v3, %v5462_v5  ;;  %v5450_v11 = vld [vmem:[#allocation14 + $0x264] sm:$0xf0]  ;;  %v5898_v60 = vld [vmem:[#allocation14 + $0x178] sm:$0xf0] }
 0x3ca   :  { %3687 = vmatpush.bf16.msra.mxu2 %v5189_v50  ;;  %v5437_v12 = vor.u32 %v5924_v15, %v5436_v54  ;;  %v5393_v50 = vor.u32 %v5911_v4, %v5390_v40  ;;  %v5453_v10 = vor.u32 %v5926_v9, %v5450_v11  ;;  %v5905_v54 = vld [vmem:[#allocation14 + $0x1b4] sm:$0xf]  ;;  %v5366_v15 = vld [vmem:[#allocation14 + $0x1bc] sm:$0xf0]  ;;  %v5240_v44 = vld [vmem:[#allocation14 + $0xb0] sm:$0xf] }
 0x3cb   :  { %v5874_v13 = vld [vmem:[#allocation14 + $0xb8] sm:$0xf0]  ;;  %v5228_v58 = vld [vmem:[#allocation14 + $0x98] sm:$0xf]  ;;  %v5871_v61 = vld [vmem:[#allocation14 + $0xa0] sm:$0xf0] }
 0x3cc   :  { %3676 = vmatpush.bf16.msra.mxu1 %v5437_v12  ;;  %3661 = vmatpush.bf16.msra.mxu0 %v5353_v31  ;;  %v5336_v12 = vld [vmem:[#allocation14 + $0x170] sm:$0xf]  ;;  %v5902_v31 = vld [vmem:[#allocation14 + $0x19c] sm:$0xf]  ;;  %v5229_v63 = vor.u32 %v5871_v61, %v5228_v58  ;;  %v5865_v3 = vld [vmem:[#allocation14 + $0x70] sm:$0xf0] }
 0x3cd   :  { %3698 = vmatpush.bf16.msrb.mxu3 %v5321_v51  ;;  %v5525_v51 = vor.u32 %v5944_v19, %v5522_v21  ;;  %v5369_v19 = vor.u32 %v5905_v54, %v5366_v15  ;;  %v5923_v21 = vld [vmem:[#allocation14 + $0x244] sm:$0xf]  ;;  %v5288_v4 = vld [vmem:[#allocation14 + $0x110] sm:$0xf]  ;;  %v5886_v40 = vld [vmem:[#allocation14 + $0x118] sm:$0xf0] }
 0x3ce   :  { %3688 = vmatpush.bf16.msra.mxu2 %v5177_v14  ;;  %v5289_v5 = vor.u32 %v5886_v40, %v5288_v4  ;;  %v5276_v28 = vld [vmem:[#allocation14 + $0xf8] sm:$0xf]  ;;  %v5862_v9 = vld [vmem:[#allocation14 + $0x58] sm:$0xf0]  ;;  %v5859_v15 = vld [vmem:[#allocation14 + $0x40] sm:$0xf0] }
 0x3cf   :  { %v5180_v54 = vld [vmem:[#allocation14 + $0x38] sm:$0xf]  ;;  %v5504_v58 = vld [vmem:[#allocation14 + $0x2c0] sm:$0xf]  ;;  %v5940_v61 = vld [vmem:[#allocation14 + $0x2c8] sm:$0xf0] }
 0x3d0   :  { %3725 = vmatpush.bf16.msrb.mxu1 %v5525_v51  ;;  %3662 = vmatpush.bf16.msra.mxu0 %v5341_v43  ;;  %v5937_v4 = vld [vmem:[#allocation14 + $0x2b0] sm:$0xf0] }
 0x3d1   :  { %3699 = vmatpush.bf16.msrb.mxu3 %v5309_v30  ;;  %v5162_v30 = vld [vmem:[#allocation14 + $0x24] sm:$0xf0] }
 0x3d2   :  { %v5165_v32 = vor.u32 %v5854_v42, %v5162_v30  ;;  %v5337_v30 = vor.u32 %v5898_v60, %v5336_v12 }
 0x3d4   :  { %3689 = vmatpush.bf16.msra.mxu2 %v5165_v32  ;;  %3711 = vmatpush.bf16.msrb.mxu0 %v5429_v47  ;;  %v5354_v32 = vld [vmem:[#allocation14 + $0x1a4] sm:$0xf0]  ;;  %v5899_v47 = vld [vmem:[#allocation14 + $0x184] sm:$0xf] }
 0x3d5   :  { %3700 = vmatpush.bf16.msrb.mxu3 %v5297_v33  ;;  %v5941_v33 = vld [vmem:[#allocation14 + $0x2d4] sm:$0xf]  ;;  %v5357_v59 = vor.u32 %v5902_v31, %v5354_v32  ;;  %v5856_v31 = vld [vmem:[#allocation14 + $0x28] sm:$0xf0] }
 0x3d6   :  { %v5513_v38 = vor.u32 %v5941_v33, %v5510_v37 }
 0x3d8   :  { %3726 = vmatpush.bf16.msrb.mxu1 %v5513_v38  ;;  %3690 = vmatpush.bf16.msra.mxu2 %v5153_v45  ;;  %v5324_v38 = vld [vmem:[#allocation14 + $0x158] sm:$0xf] }
 0x3d9   :  { %3701 = vmatpush.bf16.msrb.mxu3 %v5285_v18  ;;  %v5938_v18 = vld [vmem:[#allocation14 + $0x2bc] sm:$0xf]  ;;  %3712 = vmatpush.bf16.msrb.mxu0 %v5417_v57  ;;  %v5325_v46 = vor.u32 %v5895_v39, %v5324_v38 }
 0x3da   :  { %v5501_v52 = vor.u32 %v5938_v18, %v5498_v34  ;;  %v5342_v18 = vld [vmem:[#allocation14 + $0x18c] sm:$0xf0]  ;;  %v5241_v34 = vor.u32 %v5874_v13, %v5240_v44  ;;  %v5943_v13 = vld [vmem:[#allocation14 + $0x2e0] sm:$0xf0] }
 0x3db   :  { %v5345_v55 = vor.u32 %v5899_v47, %v5342_v18 }
 0x3dc   :  { %3727 = vmatpush.bf16.msrb.mxu1 %v5501_v52  ;;  %v5312_v52 = vld [vmem:[#allocation14 + $0x140] sm:$0xf] }
 0x3dd   :  { %3702 = vmatpush.bf16.msrb.mxu3 %v5273_v2  ;;  %v5932_v2 = vld [vmem:[#allocation14 + $0x28c] sm:$0xf]  ;;  %3713 = vmatpush.bf16.msrb.mxu0 %v5405_v1  ;;  %v5889_v1 = vld [vmem:[#allocation14 + $0x130] sm:$0xf0] }
 0x3de   :  { %v5477_v36 = vor.u32 %v5932_v2, %v5474_v20  ;;  %v5216_v2 = vld [vmem:[#allocation14 + $0x80] sm:$0xf]  ;;  %v5868_v20 = vld [vmem:[#allocation14 + $0x88] sm:$0xf0] }
 0x3e0   :  { %3728 = vmatpush.bf16.msrb.mxu1 %v5489_v62  ;;  %v5313_v62 = vor.u32 %v5892_v53, %v5312_v52  ;;  %v5432_v53 = vld [vmem:[#allocation14 + $0x230] sm:$0xf] }
 0x3e1   :  { %3703 = vmatpush.bf16.msrb.mxu3 %v5261_v7  ;;  %3714 = vmatpush.bf16.msrb.mxu0 %v5393_v50  ;;  %v5204_v50 = vld [vmem:[#allocation14 + $0x68] sm:$0xf] }
 0x3e2   :  { %v5205_v6 = vor.u32 %v5865_v3, %v5204_v50  ;;  %v5408_v3 = vld [vmem:[#allocation14 + $0x200] sm:$0xf] }
 0x3e4   :  { %3729 = vmatpush.bf16.msrb.mxu1 %v5477_v36  ;;  %v5301_v36 = vor.u32 %v5889_v1, %v5300_v0 }
 0x3e5   :  { %3704 = vmatpush.bf16.msrb.mxu3 %v5249_v24  ;;  %3715 = vmatpush.bf16.msrb.mxu0 %v5381_v8  ;;  %v5438_v24 = vld [vmem:[#allocation14 + $0x24c] sm:$0xf0] }
 0x3e6   :  { %v5441_v35 = vor.u32 %v5923_v21, %v5438_v24  ;;  %v5192_v8 = vld [vmem:[#allocation14 + $0x50] sm:$0xf]  ;;  %v5181_v21 = vor.u32 %v5859_v15, %v5180_v54  ;;  %v5252_v24 = vld [vmem:[#allocation14 + $0xc8] sm:$0xf]  ;;  %v5456_v54 = vld [vmem:[#allocation14 + $0x260] sm:$0xf] }
 0x3e7   :  { %v5928_v15 = vld [vmem:[#allocation14 + $0x268] sm:$0xf0] }
 0x3e8   :  { %3730 = vmatpush.bf16.msrb.mxu1 %v5465_v41 }
 0x3e9   :  { %3716 = vmatpush.bf16.msrb.mxu0 %v5369_v19 }
 0x3ec   :  { %3731 = vmatpush.bf16.msrb.mxu1 %v5453_v10  ;;  %v5264_v10 = vld [vmem:[#allocation14 + $0xe0] sm:$0xf] }
 0x3ed   :  { %3717 = vmatpush.bf16.msrb.mxu0 %v5357_v59 }
 0x3f0   :  { %3732 = vmatpush.bf16.msrb.mxu1 %v5441_v35 }
 0x3f1   :  { %3718 = vmatpush.bf16.msrb.mxu0 %v5345_v55  ;;  %v5922_v55 = vld [vmem:[#allocation14 + $0x238] sm:$0xf0] }
 0x3f2   :  { %v5433_v0 = vor.u32 %v5922_v55, %v5432_v53 }
 0x424   :  { %v2802_v17 = vpop.f32.mrf.mxu1 }
 0x425   :  { %v2807_v29 = vpack.c.bf16 %v2802_v17, %v2802_v17  ;;  %v5217_v17 = vor.u32 %v5868_v20, %v5216_v2  ;;  %v5505_v2 = vor.u32 %v5940_v61, %v5504_v58  ;;  %v5420_v20 = vld [vmem:[#allocation14 + $0x218] sm:$0xf] }
 0x427   :  { %v2963_v51 = vunpack.c.l.b16 %v2807_v29  ;;  %v5193_v29 = vor.u32 %v5862_v9, %v5192_v8  ;;  %v5913_v8 = vld [vmem:[#allocation14 + $0x1f0] sm:$0xf0]  ;;  %v5468_v9 = vld [vmem:[#allocation14 + $0x278] sm:$0xf] }
 0x429   :  { %v2732_v7 = vpop.f32.mrf.mxu3 }
 0x42a   :  { %v2737_v42 = vpack.c.bf16 %v2732_v7, %v2732_v7  ;;  %v5883_v7 = vld [vmem:[#allocation14 + $0x100] sm:$0xf0] }
 0x42b   :  { %v5277_v11 = vor.u32 %v5883_v7, %v5276_v28  ;;  %v5396_v7 = vld [vmem:[#allocation14 + $0x1e8] sm:$0xf] }
 0x42c   :  { %v2804_v14 = vpop.f32.mrf.mxu1  ;;  %v2957_v56 = vunpack.c.l.b16 %v2737_v42  ;;  %v5946_v42 = vld [vmem:[#allocation14 + $0x2f8] sm:$0xf0] }
 0x42d   :  { %v2808_v16 = vpack.c.bf16 %v2804_v14, %v2804_v14  ;;  %v5880_v14 = vld [vmem:[#allocation14 + $0xe8] sm:$0xf0] }
 0x42e   :  { %v5265_v60 = vor.u32 %v5880_v14, %v5264_v10  ;;  %v5384_v10 = vld [vmem:[#allocation14 + $0x1d0] sm:$0xf]  ;;  %v5910_v14 = vld [vmem:[#allocation14 + $0x1d8] sm:$0xf0] }
 0x42f   :  { %v2964_v26 = vunpack.c.l.b16 %v2808_v16 }
 0x431   :  { %v6399_v33 = vpack.c.b16 %v2964_v26, %v2963_v51  ;;  %v2734_v37 = vpop.f32.mrf.mxu3  ;;  %v5877_v51 = vld [vmem:[#allocation14 + $0xd0] sm:$0xf0]  ;;  %v5528_v26 = vld [vmem:[#allocation14 + $0x2f0] sm:$0xf] }
 0x432   :  { %v2738_v43 = vpack.c.bf16 %v2734_v37, %v2734_v37  ;;  %v5253_v38 = vor.u32 %v5877_v51, %v5252_v24  ;;  %v5529_v39 = vor.u32 %v5946_v42, %v5528_v26  ;;  %v5925_v24 = vld [vmem:[#allocation14 + $0x250] sm:$0xf0]  ;;  %v5904_v42 = vld [vmem:[#allocation14 + $0x1a8] sm:$0xf0] }
 0x433   :  { %3649 = vmatmul.bf16.vlgmr.msra.gmra.mxu3 %v6399_v33 }
 0x434   :  { %v2958_v45 = vunpack.c.l.b16 %v2738_v43  ;;  %3753 = vmatpush.bf16.msra.mxu3 %v5337_v30  ;;  %v5168_v30 = vld [vmem:[#allocation14 + $0x20] sm:$0xf]  ;;  %v5516_v43 = vld [vmem:[#allocation14 + $0x2d8] sm:$0xf] }
 0x435   :  { %v5169_v59 = vor.u32 %v5856_v31, %v5168_v30  ;;  %v5348_v31 = vld [vmem:[#allocation14 + $0x188] sm:$0xf] }
 0x436   :  { %v6402_v57 = vpack.c.b16 %v2958_v45, %v2957_v56  ;;  %v5156_v56 = vld [vmem:[#allocation14 + $0x8] sm:$0xf]  ;;  %v5853_v45 = vld [vmem:[#allocation14 + $0x10] sm:$0xf0] }
 0x437   :  { %v5157_v52 = vor.u32 %v5853_v45, %v5156_v56 }
 0x438   :  { %3754 = vmatpush.bf16.msra.mxu3 %v5325_v46  ;;  %3635 = vmatmul.bf16.vlgmr.msrb.gmra.mxu2 %v6402_v57 }
 0x439   :  { %3739 = vmatpush.bf16.msrb.mxu2 %v5241_v34  ;;  %v5517_v34 = vor.u32 %v5943_v13, %v5516_v43 }
 0x43c   :  { %3755 = vmatpush.bf16.msra.mxu3 %v5313_v62 }
 0x43d   :  { %3740 = vmatpush.bf16.msrb.mxu2 %v5229_v63 }
 0x440   :  { %3756 = vmatpush.bf16.msra.mxu3 %v5301_v36  ;;  %v5919_v36 = vld [vmem:[#allocation14 + $0x220] sm:$0xf0] }
 0x441   :  { %3741 = vmatpush.bf16.msrb.mxu2 %v5217_v17  ;;  %v5492_v17 = vld [vmem:[#allocation14 + $0x2a8] sm:$0xf]  ;;  %v5421_v40 = vor.u32 %v5919_v36, %v5420_v20 }
 0x442   :  { %v5493_v50 = vor.u32 %v5937_v4, %v5492_v17 }
 0x443   :  { %3705 = vmatmul.bf16.vlgmr.msrb.gmra.mxu3 %v6399_v33 }
 0x444   :  { %v2948_v41 = vpop.f32.mrf.mxu1  ;;  %3757 = vmatpush.bf16.msra.mxu3 %v5289_v5  ;;  %v5916_v5 = vld [vmem:[#allocation14 + $0x208] sm:$0xf0] }
 0x445   :  { %3742 = vmatpush.bf16.msrb.mxu2 %v5205_v6  ;;  %v2953_v16 = vpack.c.bf16 %v2948_v41, %v2948_v41  ;;  %v5480_v41 = vld [vmem:[#allocation14 + $0x290] sm:$0xf]  ;;  %v5409_v6 = vor.u32 %v5916_v5, %v5408_v3 }
 0x447   :  { %v2975_v32 = vunpack.c.l.b16 %v2953_v16  ;;  %v5385_v16 = vor.u32 %v5910_v14, %v5384_v10 }
 0x448   :  { %3758 = vmatpush.bf16.msra.mxu3 %v5277_v11  ;;  %3691 = vmatmul.bf16.vlgmr.msra.gmra.mxu2 %v6402_v57  ;;  %v5931_v11 = vld [vmem:[#allocation14 + $0x280] sm:$0xf0] }
 0x449   :  { %3743 = vmatpush.bf16.msrb.mxu2 %v5193_v29  ;;  %v5397_v29 = vor.u32 %v5913_v8, %v5396_v7 }
 0x44b   :  { %v2878_v12 = vpop.f32.mrf.mxu3 }
 0x44c   :  { %v2950_v19 = vpop.f32.mrf.mxu1  ;;  %3759 = vmatpush.bf16.msra.mxu3 %v5265_v60  ;;  %v2883_v46 = vpack.c.bf16 %v2878_v12, %v2878_v12  ;;  %v5457_v12 = vor.u32 %v5928_v15, %v5456_v54  ;;  %v5372_v60 = vld [vmem:[#allocation14 + $0x1b8] sm:$0xf] }
 0x44d   :  { %v2954_v35 = vpack.c.bf16 %v2950_v19, %v2950_v19  ;;  %3744 = vmatpush.bf16.msrb.mxu2 %v5181_v21  ;;  %v5907_v19 = vld [vmem:[#allocation14 + $0x1c0] sm:$0xf0]  ;;  %v5444_v21 = vld [vmem:[#allocation14 + $0x248] sm:$0xf] }
 0x44e   :  { %v2969_v62 = vunpack.c.l.b16 %v2883_v46  ;;  %v5373_v51 = vor.u32 %v5907_v19, %v5372_v60  ;;  %v5445_v26 = vor.u32 %v5925_v24, %v5444_v21 }
 0x44f   :  { %v2976_v37 = vunpack.c.l.b16 %v2954_v35  ;;  %v5360_v35 = vld [vmem:[#allocation14 + $0x1a0] sm:$0xf] }
 0x450   :  { %3760 = vmatpush.bf16.msra.mxu3 %v5253_v38  ;;  %v5361_v30 = vor.u32 %v5904_v42, %v5360_v35 }
 0x451   :  { %v6407_v44 = vpack.c.b16 %v2976_v37, %v2975_v32  ;;  %3745 = vmatpush.bf16.msrb.mxu2 %v5169_v59  ;;  %v5901_v32 = vld [vmem:[#allocation14 + $0x190] sm:$0xf0] }
 0x452   :  { %v5349_v37 = vor.u32 %v5901_v32, %v5348_v31 }
 0x453   :  { %v2880_v47 = vpop.f32.mrf.mxu3  ;;  %3677 = vmatmul.bf16.vlgmr.msra.gmra.mxu1 %v6407_v44  ;;  %3761 = vmatmul.bf16.vlgmr.msra.gmra.mxu3 %v6399_v33  ;;  %v5934_v33 = vld [vmem:[#allocation14 + $0x298] sm:$0xf0] }
 0x454   :  { %v2884_v18 = vpack.c.bf16 %v2880_v47, %v2880_v47  ;;  %3781 = vmatpush.bf16.msra.mxu1 %v5529_v39  ;;  %v5481_v28 = vor.u32 %v5934_v33, %v5480_v41 }
 0x455   :  { %3746 = vmatpush.bf16.msrb.mxu2 %v5157_v52  ;;  %v3107_v52 = vld [vmem:[%s6452_s11] sm:$0x7] }
 0x456   :  { %v2970_v63 = vunpack.c.l.b16 %v2884_v18  ;;  %v3109_v55 = vperm.slane %v3107_v52, 0  ;;  %v3111_v36 = vperm.slane %v3107_v52, 2 }
 0x458   :  { %v2971_v1 = vpack.c.b16 %v2970_v63, %v2969_v62  ;;  %3782 = vmatpush.bf16.msra.mxu1 %v5517_v34  ;;  %3747 = vmatmul.bf16.vlgmr.msrb.gmra.mxu2 %v6402_v57  ;;  %v5469_v57 = vor.u32 %v5931_v11, %v5468_v9 }
 0x45a   :  { %3663 = vmatmul.bf16.vlgmr.msra.gmra.mxu0 %v2971_v1 }
 0x45b   :  { %3767 = vmatpush.bf16.msra.mxu0 %v5433_v0 }
 0x45c   :  { %3783 = vmatpush.bf16.msra.mxu1 %v5505_v2 }
 0x45f   :  { %3768 = vmatpush.bf16.msra.mxu0 %v5421_v40 }
 0x460   :  { %3784 = vmatpush.bf16.msra.mxu1 %v5493_v50 }
 0x463   :  { %3769 = vmatpush.bf16.msra.mxu0 %v5409_v6  ;;  %3733 = vmatmul.bf16.vlgmr.msrb.gmra.mxu1 %v6407_v44 }
 0x464   :  { %3785 = vmatpush.bf16.msra.mxu1 %v5481_v28 }
 0x467   :  { %3770 = vmatpush.bf16.msra.mxu0 %v5397_v29 }
 0x468   :  { %3786 = vmatpush.bf16.msra.mxu1 %v5469_v57 }
 0x46a   :  { %3719 = vmatmul.bf16.vlgmr.msrb.gmra.mxu0 %v2971_v1 }
 0x46b   :  { %3771 = vmatpush.bf16.msra.mxu0 %v5385_v16 }
 0x46c   :  { %3787 = vmatpush.bf16.msra.mxu1 %v5457_v12 }
 0x46f   :  { %3772 = vmatpush.bf16.msra.mxu0 %v5373_v51 }
 0x470   :  { %3788 = vmatpush.bf16.msra.mxu1 %v5445_v26 }
 0x473   :  { %3773 = vmatpush.bf16.msra.mxu0 %v5361_v30  ;;  %3789 = vmatmul.bf16.vlgmr.msra.gmra.mxu1 %v6407_v44  ;;  %v3110_v44 = vperm.slane %v3107_v52, 1 }
 0x477   :  { %3774 = vmatpush.bf16.msra.mxu0 %v5349_v37 }
 0x47a   :  { %3775 = vmatmul.bf16.vlgmr.msra.gmra.mxu0 %v2971_v1 }
 0x4b6   :  { %v3650_v39 = vpop.f32.mrf.mxu3 }
 0x4bb   :  { %v3636_v38 = vpop.f32.mrf.mxu2 }
 0x4bc   :  { %v3637_v63 = vadd.f32 %v3636_v38, %v3109_v55 }
 0x4be   :  { %v3652_v13 = vpop.f32.mrf.mxu3  ;;  %v3651_v20 = vadd.f32 %v3650_v39, %v3637_v63 }
 0x4c3   :  { %v3638_v59 = vpop.f32.mrf.mxu2 }
 0x4c4   :  { %v3639_v3 = vadd.f32 %v3638_v59, %v3109_v55 }
 0x4c6   :  { %v3706_v47 = vpop.f32.mrf.mxu3  ;;  %v3653_v7 = vadd.f32 %v3652_v13, %v3639_v3 }
 0x4cb   :  { %v3692_v45 = vpop.f32.mrf.mxu2 }
 0x4cc   :  { %v3693_v61 = vadd.f32 %v3692_v45, %v3110_v44 }
 0x4ce   :  { %v3708_v62 = vpop.f32.mrf.mxu3  ;;  %v3707_v1 = vadd.f32 %v3706_v47, %v3693_v61 }
 0x4d0   :  { %v3678_v43 = vpop.f32.mrf.mxu1 }
 0x4d3   :  { %v3694_v34 = vpop.f32.mrf.mxu2 }
 0x4d4   :  { %v3695_v50 = vadd.f32 %v3694_v34, %v3110_v44 }
 0x4d6   :  { %v3762_v33 = vpop.f32.mrf.mxu3  ;;  %v3709_v28 = vadd.f32 %v3708_v62, %v3695_v50 }
 0x4d7   :  { %v3664_v56 = vpop.f32.mrf.mxu0 }
 0x4d8   :  { %v3680_v46 = vpop.f32.mrf.mxu1  ;;  %v3665_v40 = vadd.f32 %v3664_v56, %v3651_v20 }
 0x4da   :  { %v3679_v6 = vadd.f32 %v3678_v43, %v3665_v40 }
 0x4db   :  { %v3748_v0 = vpop.f32.mrf.mxu2 }
 0x4dc   :  { %v3749_v5 = vadd.f32 %v3748_v0, %v3111_v36  ;;  %v3795_v14 = vadd.f32 %v3679_v6, %v6213_v22 }
 0x4de   :  { %v3763_v29 = vadd.f32 %v3762_v33, %v3749_v5  ;;  %v3801_v51 = vmul.f32 %v3795_v14, %v3795_v14  ;;  %v3764_v26 = vpop.f32.mrf.mxu3 }
 0x4df   :  { %v3666_v18 = vpop.f32.mrf.mxu0 }
 0x4e0   :  { %v3734_v53 = vpop.f32.mrf.mxu1  ;;  %v3667_v54 = vadd.f32 %v3666_v18, %v3653_v7 }
 0x4e2   :  { %v3681_v21 = vadd.f32 %v3680_v46, %v3667_v54 }
 0x4e3   :  { %v3750_v9 = vpop.f32.mrf.mxu2 }
 0x4e4   :  { %v3751_v16 = vadd.f32 %v3750_v9, %v3111_v36  ;;  %v3798_v32 = vadd.f32 %v3681_v21, %v6215_v23 }
 0x4e6   :  { %v3765_v35 = vadd.f32 %v3764_v26, %v3751_v16  ;;  %v3804_v13 = vmul.f32 %v3798_v32, %v3798_v32 }
 0x4e7   :  { %v3720_v58 = vpop.f32.mrf.mxu0 }
 0x4e8   :  { %v3736_v2 = vpop.f32.mrf.mxu1  ;;  %v3721_v17 = vadd.f32 %v3720_v58, %v3707_v1 }
 0x4ea   :  { %v3735_v41 = vadd.f32 %v3734_v53, %v3721_v17 }
 0x4ec   :  { %v3796_v8 = vadd.f32 %v3735_v41, %v6217_v25 }
 0x4ee   :  { %v3802_v19 = vmul.f32 %v3796_v8, %v3796_v8 }
 0x4ef   :  { %v3722_v4 = vpop.f32.mrf.mxu0 }
 0x4f0   :  { %v3723_v11 = vadd.f32 %v3722_v4, %v3709_v28  ;;  %v3790_v57 = vpop.f32.mrf.mxu1  ;;  %v3807_v30 = vadd.f32 %v3802_v19, %v3801_v51 }
 0x4f2   :  { %v3737_v12 = vadd.f32 %v3736_v2, %v3723_v11 }
 0x4f4   :  { %v3799_v25 = vadd.f32 %v3737_v12, %v6219_v27 }
 0x4f6   :  { %v3805_v59 = vmul.f32 %v3799_v25, %v3799_v25 }
 0x4f7   :  { %v3776_v10 = vpop.f32.mrf.mxu0 }
 0x4f8   :  { %v3777_v15 = vadd.f32 %v3776_v10, %v3763_v29  ;;  %v3792_v38 = vpop.f32.mrf.mxu1  ;;  %v3811_v56 = vadd.f32 %v3805_v59, %v3804_v13 }
 0x4fa   :  { %v3791_v60 = vadd.f32 %v3790_v57, %v3777_v15 }
 0x4fc   :  { %v3797_v24 = vadd.f32 %v3791_v60, %v6232_v48 }
 0x4fe   :  { %v3803_v42 = vmul.f32 %v3797_v24, %v3797_v24 }
 0x4ff   :  { %v3778_v31 = vpop.f32.mrf.mxu0 }
 0x500   :  { %v3779_v22 = vadd.f32 %v3778_v31, %v3765_v35  ;;  %v3808_v37 = vadd.f32 %v3807_v30, %v3803_v42 }
 0x502   :  { %v3793_v39 = vadd.f32 %v3792_v38, %v3779_v22  ;;  %3809 = vadd.xlane.f32.xlu1 %v3808_v37 }
 0x504   :  { %v3800_v43 = vadd.f32 %v3793_v39, %v6234_v49 }
 0x506   :  { %v3806_v48 = vmul.f32 %v3800_v43, %v3800_v43 }
 0x508   :  { %v3812_v45 = vadd.f32 %v3811_v56, %v3806_v48 }
 0x50a   :  { %3813 = vadd.xlane.f32.xlu2 %v3812_v45 }
 0x575   :  { %v3810_v27 = vpop.xlane.xlu1 %3809 }
 0x576   :  { %v3815_v46 = vmax.f32 %v3810_v27, 1e-24 }
 0x578   :  { %5988 = vrsqrt.f32 %v3815_v46  ;;  %vm3823_vm3 = vweird.f32 %v3815_v46 }
 0x57d   :  { %v3814_v47 = vpop.xlane.xlu2 %3813 }
 0x57e   :  { %v5989_v18 = vpop.eup %5988  ;;  %v3816_v34 = vmax.f32 %v3814_v47, 1e-24 }
 0x57f   :  { %v3818_v23 = vmul.f32 %v5989_v18, %v3815_v46  ;;  %vm3824_vm2 = vweird.f32 %v5989_v18 }
 0x580   :  { %5990 = vrsqrt.f32 %v3816_v34  ;;  %vm3825_vm4 = vmor %vm3823_vm3, %vm3824_vm2  ;;  %vm3833_vm6 = vweird.f32 %v3816_v34 }
 0x581   :  { %v3819_v52 = vmul.f32 %v5989_v18, %v3818_v23 }
 0x583   :  { %v3820_v53 = vmul.f32 0.5, %v3819_v52 }
 0x585   :  { %v3821_v44 = vsub.f32 1.5, %v3820_v53 }
 0x586   :  { %v5991_v55 = vpop.eup %5990 }
 0x587   :  { %v3822_v58 = vmul.f32 %v5989_v18, %v3821_v44  ;;  %v3828_v49 = vmul.f32 %v5991_v55, %v3816_v34  ;;  %vm3834_vm5 = vweird.f32 %v5991_v55 }
 0x588   :  { %vm3835_vm7 = vmor %vm3833_vm6, %vm3834_vm5 }
 0x589   :  { %v3826_v61 = vsel %vm3825_vm4, %v5989_v18, %v3822_v58  ;;  %v3829_v62 = vmul.f32 %v5991_v55, %v3828_v49 }
 0x58a   :  { %v3837_v63 = vmul.f32 %v3826_v61, %v3795_v14  ;;  %v3838_v0 = vmul.f32 %v3826_v61, %v3796_v8  ;;  %v3839_v1 = vmul.f32 %v3826_v61, %v3797_v24 }
 0x58b   :  { %v3830_v2 = vmul.f32 0.5, %v3829_v62 }
 0x58c   :  { %3843 = vst [vmem:[%s6453_s12] sm:$0xff] %v3837_v63 }
 0x58d   :  { %3844 = vst [vmem:[%s6453_s12 + $0x8] sm:$0xff] %v3838_v0  ;;  %v3831_v20 = vsub.f32 1.5, %v3830_v2 }
 0x58e   :  { %3845 = vst [vmem:[%s6453_s12 + $0x10] sm:$0xff] %v3839_v1 }
 0x58f   :  { %v3832_v36 = vmul.f32 %v5991_v55, %v3831_v20 }
 0x591   :  { %v3836_v17 = vsel %vm3835_vm7, %v5991_v55, %v3832_v36 }
 0x592   :  { %v3840_v4 = vmul.f32 %v3836_v17, %v3798_v32  ;;  %v3841_v40 = vmul.f32 %v3836_v17, %v3799_v25  ;;  %v3842_v50 = vmul.f32 %v3836_v17, %v3800_v43 }
 0x594   :  { %3846 = vst [vmem:[%s6453_s12 + $0x18] sm:$0xff] %v3840_v4 }
 0x595   :  { %3847 = vst [vmem:[%s6453_s12 + $0x20] sm:$0xff] %v3841_v40 }
 0x596   :  { %3848 = vst [vmem:[%s6453_s12 + $0x28] sm:$0xff] %v3842_v50 }
 0x597   :  { %3853 = vsyncpa [#allocation8], 1 }
 0x598   :  { %3854 = vsyncpa [#allocation10], 1 }
 0x599   :  { %3855 = vsyncpa [#allocation13], 1 }

</bundles_post_ra>
